<compile_context>
chip_gen: v7x
topology: tpu7x:2x2x1
jax: 0.10.0
libtpu: 0.0.40
codegen_flags: <defaults>
</compile_context>

<pallas_src>
import numpy as np
import jax
import jax.numpy as jnp
from jax.experimental import pallas as pl
from jax.experimental.pallas import tpu as pltpu


# ----------------------------------------------------------------------------
# Fused Pallas kernel: all layers x all timesteps in a single invocation.
# Everything is VMEM resident at these sizes (a few tens of KiB).
# ----------------------------------------------------------------------------
def make_stacked_attn_lstm_kernel(num_layers, T, B, H):
    NW = 5                       # per-layer weights: w_ih, w_hh, b, w_ao_c, w_ao_h
    N_IN = 6 + NW * num_layers   # x2d, ctx, ctxw, mask, h0, c0 + weights

    def kernel(*refs):
        (x2d_ref, ctx_ref, ctxw_ref, mask_ref, h0_ref, c0_ref) = refs[:6]
        w_refs = refs[6:N_IN]
        out_ref, hfin_ref, cfin_ref = refs[N_IN:N_IN + 3]
        gx_ref, buf_ref = refs[N_IN + 3:N_IN + 5]

        ctx = ctx_ref[...]                                        # [B, L, H]
        # Additive mask bias computed ONCE (no per-step select, no -inf NaN
        # hazard for fully masked rows).
        mask_bias = jnp.where(mask_ref[...] > 0.5, -1e30, 0.0)    # [B, 1, L]
        h0 = h0_ref[...]
        c0 = c0_ref[...]

        # Layer-0 input-side gates for ALL timesteps: one big MXU matmul.
        gx_ref[...] = (
            jnp.dot(x2d_ref[...], w_refs[0][...],
                    preferred_element_type=jnp.float32) + w_refs[2][...])

        for layer in range(num_layers):
            base = NW * layer
            w_hh = w_refs[base + 1][...]                          # [H, 4H] (i|f|o|g)
            w_ao_c = w_refs[base + 3][...]                        # [H, H]
            w_ao_h = w_refs[base + 4][...]                        # [H, H]
            ctx_w = ctxw_ref[layer]                               # [B, L, H]
            is_last = layer == num_layers - 1
            dst = out_ref if is_last else buf_ref                 # [T*B, H]

            h = h0
            c = c0
            # Full static unroll of the recurrence (T small & static).
            for t in range(T):
                # LSTM cell: x-part precomputed, only h @ w_hh is recurrent.
                gates = gx_ref[t * B:(t + 1) * B, :] + jnp.dot(
                    h, w_hh, preferred_element_type=jnp.float32)  # [B, 4H]
                sig = jax.nn.sigmoid(gates[:, :3 * H])            # i | f | o
                g_g = jnp.tanh(gates[:, 3 * H:])
                i_g = sig[:, :H]
                f_g = sig[:, H:2 * H]
                o_g = sig[:, 2 * H:]
                c = f_g * c + i_g * g_g
                hy = o_g * jnp.tanh(c)                            # [B, H]

                # Bilinear attention; in-projection already folded into ctx_w.
                scores = jnp.einsum(
                    'bqh,blh->bql', hy[:, None, :], ctx_w,
                    preferred_element_type=jnp.float32) + mask_bias   # [B,1,L]
                m = jnp.max(scores, axis=-1, keepdims=True)
                e = jnp.exp(scores - m)
                denom = jnp.sum(e, axis=-1, keepdims=True)
                probs = e * pl.reciprocal(denom, approx=True)         # [B,1,L]
                wctx = jnp.einsum(
                    'bql,blh->bqh', probs, ctx,
                    preferred_element_type=jnp.float32)[:, 0, :]      # [B, H]

                # out-projection of concat(wctx, hy): split weight, no concat.
                h = jnp.tanh(
                    jnp.dot(wctx, w_ao_c, preferred_element_type=jnp.float32)
                    + jnp.dot(hy, w_ao_h, preferred_element_type=jnp.float32))

                dst[t * B:(t + 1) * B, :] = h.astype(dst.dtype)

            hfin_ref[layer] = h.astype(hfin_ref.dtype)
            cfin_ref[layer] = c.astype(cfin_ref.dtype)

            # Next layer's input-side gates: one MXU matmul over the buffered
            # activations (off the recurrent critical path of both layers).
            if not is_last:
                nbase = NW * (layer + 1)
                gx_ref[...] = (
                    jnp.dot(buf_ref[...], w_refs[nbase][...],
                            preferred_element_type=jnp.float32)
                    + w_refs[nbase + 2][...])

    return kernel


def _reorder_gates_ifog(w):
    """PyTorch LSTM gate order (i, f, g, o) -> (i, f, o, g) along last axis."""
    i, f, g, o = jnp.split(w, 4, axis=-1)
    return jnp.concatenate([i, f, o, g], axis=-1)


# ----------------------------------------------------------------------------
# StackedAttentionLSTM forward (thin wrapper around the single fused kernel)
# ----------------------------------------------------------------------------
def stacked_attention_lstm(x_btd, ctx, mask, h0, c0, layer_params):
    """x_btd: [B, T, emb]; ctx: [B, L, H]; mask: [B, L] float (1 = masked).

    Returns (output [B, T, H], (h_final, c_final) each [num_layers, B, H]).
    Dropout is identity (eval mode)."""
    B, T, E = x_btd.shape
    L = ctx.shape[1]
    H = h0.shape[1]
    NL = len(layer_params)

    # Time-major, flattened to [T*B, E] so every in-kernel matmul is plain 2D.
    x2d = jnp.transpose(x_btd, (1, 0, 2)).reshape(T * B, E)
    mask3 = mask.reshape(B, 1, L)
    # Attention in-projection is layer-constant: hoist ctx @ W_a^T out of the
    # kernel's time loop entirely (tiny [NL, B, L, H] tensor).
    ctxw = jnp.stack(
        [jnp.einsum('blo,io->bli', ctx, p['w_ain']) for p in layer_params])

    # TODO(synk): optionally cast the MXU operands (weights/x/ctx) to bf16 on
    # v5e/v6e/v7x; kept f32 here to preserve tight agreement with the reference.
    weight_args = []
    for p in layer_params:
        weight_args += [
            _reorder_gates_ifog(p['w_ih']),      # [Din, 4H]  (i|f|o|g)
            _reorder_gates_ifog(p['w_hh']),      # [H, 4H]
            _reorder_gates_ifog(p['b']),         # [1, 4H]
            p['w_aout'][:H],                     # [H, H]  context half
            p['w_aout'][H:],                     # [H, H]  query half
        ]

    vmem = pl.BlockSpec(memory_space=pltpu.MemorySpace.VMEM)
    n_in = 6 + 5 * NL
    # TODO(synk): on v7x (2 TensorCores) a batch grid with
    # dimension_semantics=("parallel",) could split independent batch rows
    # across cores; skipped here because B=2 < 8 sublanes makes batch blocking
    # violate the (8,128) block constraint and serializes work on 1-TC chips.
    out2d, hfin, cfin = pl.pallas_call(
        make_stacked_attn_lstm_kernel(NL, T, B, H),
        out_shape=(jax.ShapeDtypeStruct((T * B, H), jnp.float32),
                   jax.ShapeDtypeStruct((NL, B, H), jnp.float32),
                   jax.ShapeDtypeStruct((NL, B, H), jnp.float32)),
        in_specs=[vmem] * n_in,
        out_specs=(vmem, vmem, vmem),
        scratch_shapes=[pltpu.VMEM((T * B, 4 * H), jnp.float32),   # gates_x
                        pltpu.VMEM((T * B, H), jnp.float32)],      # layer acts
    )(x2d, ctx, ctxw, mask3, h0, c0, *weight_args)

    output = out2d.reshape(T, B, H).transpose(1, 0, 2)             # [B, T, H]
    return output, (hfin, cfin)


# ----------------------------------------------------------------------------
# Pure-JAX reference (faithful to the PyTorch math) for verification
# ----------------------------------------------------------------------------
def reference_forward(x_btd, ctx, mask, h0, c0, layer_params):
    inp = x_btd
    H = h0.shape[1]
    h_finals, c_finals = [], []
    for p in layer_params:
        B, T, _ = inp.shape
        h, c = h0, c0
        outs = []
        for t in range(T):
            x_t = inp[:, t, :]
            gates = x_t @ p['w_ih'] + h @ p['w_hh'] + p['b'][0]
            i_g = jax.nn.sigmoid(gates[:, :H])
            f_g = jax.nn.sigmoid(gates[:, H:2 * H])
            g_g = jnp.tanh(gates[:, 2 * H:3 * H])
            o_g = jax.nn.sigmoid(gates[:, 3 * H:])
            c = f_g * c + i_g * g_g
            hy = o_g * jnp.tanh(c)
            proj = hy @ p['w_ain']
            scores = jnp.einsum('blh,bh->bl', ctx, proj)
            scores = jnp.where(mask > 0.5, -jnp.inf, scores)
            probs = jax.nn.softmax(scores, axis=-1)
            wctx = jnp.einsum('bl,blh->bh', probs, ctx)
            h = jnp.tanh(jnp.concatenate([wctx, hy], axis=1) @ p['w_aout'])
            outs.append(h)
        inp = jnp.stack(outs, axis=1)
        h_finals.append(h)
        c_finals.append(c)
    return inp, jnp.stack(h_finals), jnp.stack(c_finals)


# ----------------------------------------------------------------------------
# Deterministic parameter init (shapes from the module __init__)
# ----------------------------------------------------------------------------
def init_layer_params(key, din, hidden):
    k = 1.0 / np.sqrt(hidden)
    ks = jax.random.split(key, 5)
    u = lambda kk, shape: jax.random.uniform(kk, shape, jnp.float32, -k, k)
    return {
        'w_ih':   u(ks[0], (din, 4 * hidden)),      # LSTMCell weight_ih^T
        'w_hh':   u(ks[1], (hidden, 4 * hidden)),   # LSTMCell weight_hh^T
        'b':      u(ks[2], (1, 4 * hidden)),        # b_ih + b_hh combined
        'w_ain':  u(ks[3], (hidden, hidden)),       # attention in_projection^T
        'w_aout': u(ks[4], (2 * hidden, hidden)),   # attention out_projection^T
    }


if __name__ == "__main__":
    # config: emb_dim=32, tgt_hidden_dim=32, tgt_layers=2, attention=True, dropout=0.0
    B, T, L = 2, 8, 10
    EMB, HID, NLAYERS = 32, 32, 2

    key = jax.random.PRNGKey(0)
    k_x, k_ctx, k_p = jax.random.split(key, 3)

    x = jax.random.normal(k_x, (B, T, EMB), jnp.float32)          # decoder inputs
    ctx = jax.random.normal(k_ctx, (B, L, HID), jnp.float32)      # encoder context
    # srcmask: 1 = masked. batch 0: nothing masked; batch 1: last 2 positions masked.
    mask = jnp.zeros((B, L), jnp.float32).at[1, L - 2:].set(1.0)
    h0 = jnp.zeros((B, HID), jnp.float32)
    c0 = jnp.zeros((B, HID), jnp.float32)

    layer_keys = jax.random.split(k_p, NLAYERS)
    layer_params = []
    din = EMB
    for l in range(NLAYERS):
        layer_params.append(init_layer_params(layer_keys[l], din, HID))
        din = HID

    fwd = jax.jit(stacked_attention_lstm)
    out, (h_final, c_final) = fwd(x, ctx, mask, h0, c0, layer_params)
    out = jax.block_until_ready(out)
    h_final = jax.block_until_ready(h_final)
    c_final = jax.block_until_ready(c_final)

    ref_out, ref_h, ref_c = reference_forward(x, ctx, mask, h0, c0, layer_params)
    assert out.shape == (B, T, HID)
    assert h_final.shape == (NLAYERS, B, HID) and c_final.shape == (NLAYERS, B, HID)
    # tolerance loosened slightly vs 1e-5 because of the approx EUP reciprocal
    # in the in-kernel softmax (per the perf review).
    assert np.allclose(np.asarray(out), np.asarray(ref_out), rtol=1e-3, atol=3e-3)
    assert np.allclose(np.asarray(h_final), np.asarray(ref_h), rtol=1e-3, atol=3e-3)
    assert np.allclose(np.asarray(c_final), np.asarray(ref_c), rtol=1e-3, atol=3e-3)

    print("KERNEL_OK")
</pallas_src>

<mosaic_0001>
module attributes {stable_mosaic.version = 11 : i64} {
  func.func @kernel(%arg0: memref<16x32xf32, #tpu.memory_space<vmem>>, %arg1: memref<2x10x32xf32, #tpu.memory_space<vmem>>, %arg2: memref<2x2x10x32xf32, #tpu.memory_space<vmem>>, %arg3: memref<2x1x10xf32, #tpu.memory_space<vmem>>, %arg4: memref<2x32xf32, #tpu.memory_space<vmem>>, %arg5: memref<2x32xf32, #tpu.memory_space<vmem>>, %arg6: memref<32x128xf32, #tpu.memory_space<vmem>>, %arg7: memref<32x128xf32, #tpu.memory_space<vmem>>, %arg8: memref<1x128xf32, #tpu.memory_space<vmem>>, %arg9: memref<32x32xf32, #tpu.memory_space<vmem>>, %arg10: memref<32x32xf32, #tpu.memory_space<vmem>>, %arg11: memref<32x128xf32, #tpu.memory_space<vmem>>, %arg12: memref<32x128xf32, #tpu.memory_space<vmem>>, %arg13: memref<1x128xf32, #tpu.memory_space<vmem>>, %arg14: memref<32x32xf32, #tpu.memory_space<vmem>>, %arg15: memref<32x32xf32, #tpu.memory_space<vmem>>, %arg16: memref<16x32xf32, #tpu.memory_space<vmem>>, %arg17: memref<2x2x32xf32, #tpu.memory_space<vmem>>, %arg18: memref<2x2x32xf32, #tpu.memory_space<vmem>>, %arg19: memref<16x128xf32, #tpu.memory_space<vmem>>, %arg20: memref<16x32xf32, #tpu.memory_space<vmem>>) attributes {dimension_semantics = [], scalar_prefetch = 0 : i64, scratch_operands = 2 : i64, tpu.core_type = #tpu.core_type<tc>} {
    %c0 = arith.constant 0 : index
    %c0_0 = arith.constant 0 : index
    %c0_1 = arith.constant 0 : index
    %0 = vector.load %arg1[%c0, %c0_0, %c0_1] : memref<2x10x32xf32, #tpu.memory_space<vmem>>, vector<2x10x32xf32>
    %c0_2 = arith.constant 0 : index
    %c0_3 = arith.constant 0 : index
    %c0_4 = arith.constant 0 : index
    %1 = vector.load %arg3[%c0_2, %c0_3, %c0_4] : memref<2x1x10xf32, #tpu.memory_space<vmem>>, vector<2x1x10xf32>
    %cst = arith.constant 5.000000e-01 : f32
    %2 = vector.broadcast %cst : f32 to vector<2x1x10xf32>
    %3 = arith.cmpf ogt, %1, %2 : vector<2x1x10xf32>
    %cst_5 = arith.constant -1.000000e+30 : f32
    %cst_6 = arith.constant 0.000000e+00 : f32
    %4 = vector.broadcast %cst_5 : f32 to vector<2x1x10xf32>
    %5 = vector.broadcast %cst_6 : f32 to vector<2x1x10xf32>
    %6 = arith.select %3, %4, %5 : vector<2x1x10xi1>, vector<2x1x10xf32>
    %c0_7 = arith.constant 0 : index
    %c0_8 = arith.constant 0 : index
    %7 = vector.load %arg4[%c0_7, %c0_8] : memref<2x32xf32, #tpu.memory_space<vmem>>, vector<2x32xf32>
    %c0_9 = arith.constant 0 : index
    %c0_10 = arith.constant 0 : index
    %8 = vector.load %arg5[%c0_9, %c0_10] : memref<2x32xf32, #tpu.memory_space<vmem>>, vector<2x32xf32>
    %c0_11 = arith.constant 0 : index
    %c0_12 = arith.constant 0 : index
    %9 = vector.load %arg0[%c0_11, %c0_12] : memref<16x32xf32, #tpu.memory_space<vmem>>, vector<16x32xf32>
    %c0_13 = arith.constant 0 : index
    %c0_14 = arith.constant 0 : index
    %10 = vector.load %arg6[%c0_13, %c0_14] : memref<32x128xf32, #tpu.memory_space<vmem>>, vector<32x128xf32>
    %cst_15 = arith.constant dense<0.000000e+00> : vector<16x128xf32>
    %11 = tpu.matmul %9, %10, %cst_15 {dimension_numbers = #tpu.dot_dimension_numbers<[1], [0], [0], [1], [0, 0, 1, 1], [], []>} : vector<16x32xf32>, vector<32x128xf32>, vector<16x128xf32> -> vector<16x128xf32>
    %c0_16 = arith.constant 0 : index
    %c0_17 = arith.constant 0 : index
    %12 = vector.load %arg8[%c0_16, %c0_17] : memref<1x128xf32, #tpu.memory_space<vmem>>, vector<1x128xf32>
    %13 = vector.broadcast %12 : vector<1x128xf32> to vector<16x128xf32>
    %14 = arith.addf %11, %13 : vector<16x128xf32>
    %c0_18 = arith.constant 0 : index
    %c0_19 = arith.constant 0 : index
    %15 = vector.load %arg19[%c0_18, %c0_19] : memref<16x128xf32, #tpu.memory_space<vmem>>, vector<16x128xf32>
    tpu.vector_store %arg19[%c0_18, %c0_19], %14 {strides = array<i32>} : memref<16x128xf32, #tpu.memory_space<vmem>>, vector<16x128xf32>,
    %c0_20 = arith.constant 0 : index
    %c0_21 = arith.constant 0 : index
    %16 = vector.load %arg7[%c0_20, %c0_21] : memref<32x128xf32, #tpu.memory_space<vmem>>, vector<32x128xf32>
    %c0_22 = arith.constant 0 : index
    %c0_23 = arith.constant 0 : index
    %17 = vector.load %arg9[%c0_22, %c0_23] : memref<32x32xf32, #tpu.memory_space<vmem>>, vector<32x32xf32>
    %c0_24 = arith.constant 0 : index
    %c0_25 = arith.constant 0 : index
    %18 = vector.load %arg10[%c0_24, %c0_25] : memref<32x32xf32, #tpu.memory_space<vmem>>, vector<32x32xf32>
    %c0_26 = arith.constant 0 : index
    %c0_27 = arith.constant 0 : index
    %c0_28 = arith.constant 0 : index
    %c0_29 = arith.constant 0 : index
    %19 = vector.load %arg2[%c0_26, %c0_27, %c0_28, %c0_29] : memref<2x2x10x32xf32, #tpu.memory_space<vmem>>, vector<1x2x10x32xf32>
    %20 = vector.shape_cast %19 : vector<1x2x10x32xf32> to vector<2x10x32xf32>
    %c0_30 = arith.constant 0 : index
    %c0_31 = arith.constant 0 : index
    %21 = vector.load %arg19[%c0_30, %c0_31] : memref<16x128xf32, #tpu.memory_space<vmem>>, vector<2x128xf32>
    %cst_32 = arith.constant dense<0.000000e+00> : vector<2x128xf32>
    %22 = tpu.matmul %7, %16, %cst_32 {dimension_numbers = #tpu.dot_dimension_numbers<[1], [0], [0], [1], [0, 0, 1, 1], [], []>} : vector<2x32xf32>, vector<32x128xf32>, vector<2x128xf32> -> vector<2x128xf32>
    %23 = arith.addf %21, %22 : vector<2x128xf32>
    %24 = vector.extract_strided_slice %23 {offsets = [0, 0], sizes = [2, 96], strides = [1, 1]} : vector<2x128xf32> to vector<2x96xf32>
    %25 = arith.negf %24 : vector<2x96xf32>
    %26 = math.exp %25 : vector<2x96xf32>
    %cst_33 = arith.constant 1.000000e+00 : f32
    %27 = vector.broadcast %cst_33 : f32 to vector<2x96xf32>
    %28 = arith.addf %27, %26 : vector<2x96xf32>
    %29 = arith.divf %27, %28 : vector<2x96xf32>
    %30 = vector.extract_strided_slice %23 {offsets = [0, 96], sizes = [2, 32], strides = [1, 1]} : vector<2x128xf32> to vector<2x32xf32>
    %31 = math.tanh %30 : vector<2x32xf32>
    %32 = vector.extract_strided_slice %29 {offsets = [0, 0], sizes = [2, 32], strides = [1, 1]} : vector<2x96xf32> to vector<2x32xf32>
    %33 = vector.extract_strided_slice %29 {offsets = [0, 32], sizes = [2, 32], strides = [1, 1]} : vector<2x96xf32> to vector<2x32xf32>
    %34 = vector.extract_strided_slice %29 {offsets = [0, 64], sizes = [2, 32], strides = [1, 1]} : vector<2x96xf32> to vector<2x32xf32>
    %35 = arith.mulf %33, %8 : vector<2x32xf32>
    %36 = arith.mulf %32, %31 : vector<2x32xf32>
    %37 = arith.addf %35, %36 : vector<2x32xf32>
    %38 = math.tanh %37 : vector<2x32xf32>
    %39 = arith.mulf %34, %38 : vector<2x32xf32>
    %40 = vector.shape_cast %39 : vector<2x32xf32> to vector<2x1x32xf32>
    "tpu.trace_start"() <{level = 10 : i32, message = "bqh,blh->bql"}> : () -> ()
    %cst_34 = arith.constant dense<0.000000e+00> : vector<2x1x10xf32>
    %41 = tpu.matmul %40, %20, %cst_34 {dimension_numbers = #tpu.dot_dimension_numbers<[2], [2], [1], [1], [0, 0, 0, 1, 1, 1], [0], [0]>} : vector<2x1x32xf32>, vector<2x10x32xf32>, vector<2x1x10xf32> -> vector<2x1x10xf32>
    "tpu.trace_stop"() : () -> ()
    %42 = arith.addf %41, %6 : vector<2x1x10xf32>
    %cst_35 = arith.constant dense<0xFF800000> : vector<2x1xf32>
    %43 = vector.multi_reduction <maximumf>, %42, %cst_35 [2] : vector<2x1x10xf32> to vector<2x1xf32>
    %44 = vector.shape_cast %43 : vector<2x1xf32> to vector<2x1x1xf32>
    %45 = vector.broadcast %44 : vector<2x1x1xf32> to vector<2x1x10xf32>
    %46 = arith.subf %42, %45 : vector<2x1x10xf32>
    %47 = math.exp %46 : vector<2x1x10xf32>
    %cst_36 = arith.constant dense<0.000000e+00> : vector<2x1xf32>
    %48 = vector.multi_reduction <add>, %47, %cst_36 [2] : vector<2x1x10xf32> to vector<2x1xf32>
    %49 = vector.shape_cast %48 : vector<2x1xf32> to vector<2x1x1xf32>
    %50 = tpu.reciprocal %49 {approx = true} : vector<2x1x1xf32> -> vector<2x1x1xf32>
    %51 = vector.broadcast %50 : vector<2x1x1xf32> to vector<2x1x10xf32>
    %52 = arith.mulf %47, %51 : vector<2x1x10xf32>
    "tpu.trace_start"() <{level = 10 : i32, message = "bql,blh->bqh"}> : () -> ()
    %cst_37 = arith.constant dense<0.000000e+00> : vector<2x1x32xf32>
    %53 = tpu.matmul %52, %0, %cst_37 {dimension_numbers = #tpu.dot_dimension_numbers<[2], [1], [1], [2], [0, 0, 0, 1, 1, 2], [0], [0]>} : vector<2x1x10xf32>, vector<2x10x32xf32>, vector<2x1x32xf32> -> vector<2x1x32xf32>
    "tpu.trace_stop"() : () -> ()
    %54 = vector.shape_cast %53 : vector<2x1x32xf32> to vector<2x32xf32>
    %cst_38 = arith.constant dense<0.000000e+00> : vector<2x32xf32>
    %55 = tpu.matmul %54, %17, %cst_38 {dimension_numbers = #tpu.dot_dimension_numbers<[1], [0], [0], [1], [0, 0, 1, 1], [], []>} : vector<2x32xf32>, vector<32x32xf32>, vector<2x32xf32> -> vector<2x32xf32>
    %cst_39 = arith.constant dense<0.000000e+00> : vector<2x32xf32>
    %56 = tpu.matmul %39, %18, %cst_39 {dimension_numbers = #tpu.dot_dimension_numbers<[1], [0], [0], [1], [0, 0, 1, 1], [], []>} : vector<2x32xf32>, vector<32x32xf32>, vector<2x32xf32> -> vector<2x32xf32>
    %57 = arith.addf %55, %56 : vector<2x32xf32>
    %58 = math.tanh %57 : vector<2x32xf32>
    %c0_40 = arith.constant 0 : index
    %c0_41 = arith.constant 0 : index
    %59 = vector.load %arg20[%c0_40, %c0_41] : memref<16x32xf32, #tpu.memory_space<vmem>>, vector<2x32xf32>
    tpu.vector_store %arg20[%c0_40, %c0_41], %58 {strides = array<i32>} : memref<16x32xf32, #tpu.memory_space<vmem>>, vector<2x32xf32>,
    %c2 = arith.constant 2 : index
    %c0_42 = arith.constant 0 : index
    %60 = vector.load %arg19[%c2, %c0_42] : memref<16x128xf32, #tpu.memory_space<vmem>>, vector<2x128xf32>
    %cst_43 = arith.constant dense<0.000000e+00> : vector<2x128xf32>
    %61 = tpu.matmul %58, %16, %cst_43 {dimension_numbers = #tpu.dot_dimension_numbers<[1], [0], [0], [1], [0, 0, 1, 1], [], []>} : vector<2x32xf32>, vector<32x128xf32>, vector<2x128xf32> -> vector<2x128xf32>
    %62 = arith.addf %60, %61 : vector<2x128xf32>
    %63 = vector.extract_strided_slice %62 {offsets = [0, 0], sizes = [2, 96], strides = [1, 1]} : vector<2x128xf32> to vector<2x96xf32>
    %64 = arith.negf %63 : vector<2x96xf32>
    %65 = math.exp %64 : vector<2x96xf32>
    %cst_44 = arith.constant 1.000000e+00 : f32
    %66 = vector.broadcast %cst_44 : f32 to vector<2x96xf32>
    %67 = arith.addf %66, %65 : vector<2x96xf32>
    %68 = arith.divf %66, %67 : vector<2x96xf32>
    %69 = vector.extract_strided_slice %62 {offsets = [0, 96], sizes = [2, 32], strides = [1, 1]} : vector<2x128xf32> to vector<2x32xf32>
    %70 = math.tanh %69 : vector<2x32xf32>
    %71 = vector.extract_strided_slice %68 {offsets = [0, 0], sizes = [2, 32], strides = [1, 1]} : vector<2x96xf32> to vector<2x32xf32>
    %72 = vector.extract_strided_slice %68 {offsets = [0, 32], sizes = [2, 32], strides = [1, 1]} : vector<2x96xf32> to vector<2x32xf32>
    %73 = vector.extract_strided_slice %68 {offsets = [0, 64], sizes = [2, 32], strides = [1, 1]} : vector<2x96xf32> to vector<2x32xf32>
    %74 = arith.mulf %72, %37 : vector<2x32xf32>
    %75 = arith.mulf %71, %70 : vector<2x32xf32>
    %76 = arith.addf %74, %75 : vector<2x32xf32>
    %77 = math.tanh %76 : vector<2x32xf32>
    %78 = arith.mulf %73, %77 : vector<2x32xf32>
    %79 = vector.shape_cast %78 : vector<2x32xf32> to vector<2x1x32xf32>
    "tpu.trace_start"() <{level = 10 : i32, message = "bqh,blh->bql"}> : () -> ()
    %cst_45 = arith.constant dense<0.000000e+00> : vector<2x1x10xf32>
    %80 = tpu.matmul %79, %20, %cst_45 {dimension_numbers = #tpu.dot_dimension_numbers<[2], [2], [1], [1], [0, 0, 0, 1, 1, 1], [0], [0]>} : vector<2x1x32xf32>, vector<2x10x32xf32>, vector<2x1x10xf32> -> vector<2x1x10xf32>
    "tpu.trace_stop"() : () -> ()
    %81 = arith.addf %80, %6 : vector<2x1x10xf32>
    %cst_46 = arith.constant dense<0xFF800000> : vector<2x1xf32>
    %82 = vector.multi_reduction <maximumf>, %81, %cst_46 [2] : vector<2x1x10xf32> to vector<2x1xf32>
    %83 = vector.shape_cast %82 : vector<2x1xf32> to vector<2x1x1xf32>
    %84 = vector.broadcast %83 : vector<2x1x1xf32> to vector<2x1x10xf32>
    %85 = arith.subf %81, %84 : vector<2x1x10xf32>
    %86 = math.exp %85 : vector<2x1x10xf32>
    %cst_47 = arith.constant dense<0.000000e+00> : vector<2x1xf32>
    %87 = vector.multi_reduction <add>, %86, %cst_47 [2] : vector<2x1x10xf32> to vector<2x1xf32>
    %88 = vector.shape_cast %87 : vector<2x1xf32> to vector<2x1x1xf32>
    %89 = tpu.reciprocal %88 {approx = true} : vector<2x1x1xf32> -> vector<2x1x1xf32>
    %90 = vector.broadcast %89 : vector<2x1x1xf32> to vector<2x1x10xf32>
    %91 = arith.mulf %86, %90 : vector<2x1x10xf32>
    "tpu.trace_start"() <{level = 10 : i32, message = "bql,blh->bqh"}> : () -> ()
    %cst_48 = arith.constant dense<0.000000e+00> : vector<2x1x32xf32>
    %92 = tpu.matmul %91, %0, %cst_48 {dimension_numbers = #tpu.dot_dimension_numbers<[2], [1], [1], [2], [0, 0, 0, 1, 1, 2], [0], [0]>} : vector<2x1x10xf32>, vector<2x10x32xf32>, vector<2x1x32xf32> -> vector<2x1x32xf32>
    "tpu.trace_stop"() : () -> ()
    %93 = vector.shape_cast %92 : vector<2x1x32xf32> to vector<2x32xf32>
    %cst_49 = arith.constant dense<0.000000e+00> : vector<2x32xf32>
    %94 = tpu.matmul %93, %17, %cst_49 {dimension_numbers = #tpu.dot_dimension_numbers<[1], [0], [0], [1], [0, 0, 1, 1], [], []>} : vector<2x32xf32>, vector<32x32xf32>, vector<2x32xf32> -> vector<2x32xf32>
    %cst_50 = arith.constant dense<0.000000e+00> : vector<2x32xf32>
    %95 = tpu.matmul %78, %18, %cst_50 {dimension_numbers = #tpu.dot_dimension_numbers<[1], [0], [0], [1], [0, 0, 1, 1], [], []>} : vector<2x32xf32>, vector<32x32xf32>, vector<2x32xf32> -> vector<2x32xf32>
    %96 = arith.addf %94, %95 : vector<2x32xf32>
    %97 = math.tanh %96 : vector<2x32xf32>
    %c2_51 = arith.constant 2 : index
    %c0_52 = arith.constant 0 : index
    %98 = vector.load %arg20[%c2_51, %c0_52] : memref<16x32xf32, #tpu.memory_space<vmem>>, vector<2x32xf32>
    tpu.vector_store %arg20[%c2_51, %c0_52], %97 {strides = array<i32>} : memref<16x32xf32, #tpu.memory_space<vmem>>, vector<2x32xf32>,
    %c4 = arith.constant 4 : index
    %c0_53 = arith.constant 0 : index
    %99 = vector.load %arg19[%c4, %c0_53] : memref<16x128xf32, #tpu.memory_space<vmem>>, vector<2x128xf32>
    %cst_54 = arith.constant dense<0.000000e+00> : vector<2x128xf32>
    %100 = tpu.matmul %97, %16, %cst_54 {dimension_numbers = #tpu.dot_dimension_numbers<[1], [0], [0], [1], [0, 0, 1, 1], [], []>} : vector<2x32xf32>, vector<32x128xf32>, vector<2x128xf32> -> vector<2x128xf32>
    %101 = arith.addf %99, %100 : vector<2x128xf32>
    %102 = vector.extract_strided_slice %101 {offsets = [0, 0], sizes = [2, 96], strides = [1, 1]} : vector<2x128xf32> to vector<2x96xf32>
    %103 = arith.negf %102 : vector<2x96xf32>
    %104 = math.exp %103 : vector<2x96xf32>
    %cst_55 = arith.constant 1.000000e+00 : f32
    %105 = vector.broadcast %cst_55 : f32 to vector<2x96xf32>
    %106 = arith.addf %105, %104 : vector<2x96xf32>
    %107 = arith.divf %105, %106 : vector<2x96xf32>
    %108 = vector.extract_strided_slice %101 {offsets = [0, 96], sizes = [2, 32], strides = [1, 1]} : vector<2x128xf32> to vector<2x32xf32>
    %109 = math.tanh %108 : vector<2x32xf32>
    %110 = vector.extract_strided_slice %107 {offsets = [0, 0], sizes = [2, 32], strides = [1, 1]} : vector<2x96xf32> to vector<2x32xf32>
    %111 = vector.extract_strided_slice %107 {offsets = [0, 32], sizes = [2, 32], strides = [1, 1]} : vector<2x96xf32> to vector<2x32xf32>
    %112 = vector.extract_strided_slice %107 {offsets = [0, 64], sizes = [2, 32], strides = [1, 1]} : vector<2x96xf32> to vector<2x32xf32>
    %113 = arith.mulf %111, %76 : vector<2x32xf32>
    %114 = arith.mulf %110, %109 : vector<2x32xf32>
    %115 = arith.addf %113, %114 : vector<2x32xf32>
    %116 = math.tanh %115 : vector<2x32xf32>
    %117 = arith.mulf %112, %116 : vector<2x32xf32>
    %118 = vector.shape_cast %117 : vector<2x32xf32> to vector<2x1x32xf32>
    "tpu.trace_start"() <{level = 10 : i32, message = "bqh,blh->bql"}> : () -> ()
    %cst_56 = arith.constant dense<0.000000e+00> : vector<2x1x10xf32>
    %119 = tpu.matmul %118, %20, %cst_56 {dimension_numbers = #tpu.dot_dimension_numbers<[2], [2], [1], [1], [0, 0, 0, 1, 1, 1], [0], [0]>} : vector<2x1x32xf32>, vector<2x10x32xf32>, vector<2x1x10xf32> -> vector<2x1x10xf32>
    "tpu.trace_stop"() : () -> ()
    %120 = arith.addf %119, %6 : vector<2x1x10xf32>
    %cst_57 = arith.constant dense<0xFF800000> : vector<2x1xf32>
    %121 = vector.multi_reduction <maximumf>, %120, %cst_57 [2] : vector<2x1x10xf32> to vector<2x1xf32>
    %122 = vector.shape_cast %121 : vector<2x1xf32> to vector<2x1x1xf32>
    %123 = vector.broadcast %122 : vector<2x1x1xf32> to vector<2x1x10xf32>
    %124 = arith.subf %120, %123 : vector<2x1x10xf32>
    %125 = math.exp %124 : vector<2x1x10xf32>
    %cst_58 = arith.constant dense<0.000000e+00> : vector<2x1xf32>
    %126 = vector.multi_reduction <add>, %125, %cst_58 [2] : vector<2x1x10xf32> to vector<2x1xf32>
    %127 = vector.shape_cast %126 : vector<2x1xf32> to vector<2x1x1xf32>
    %128 = tpu.reciprocal %127 {approx = true} : vector<2x1x1xf32> -> vector<2x1x1xf32>
    %129 = vector.broadcast %128 : vector<2x1x1xf32> to vector<2x1x10xf32>
    %130 = arith.mulf %125, %129 : vector<2x1x10xf32>
    "tpu.trace_start"() <{level = 10 : i32, message = "bql,blh->bqh"}> : () -> ()
    %cst_59 = arith.constant dense<0.000000e+00> : vector<2x1x32xf32>
    %131 = tpu.matmul %130, %0, %cst_59 {dimension_numbers = #tpu.dot_dimension_numbers<[2], [1], [1], [2], [0, 0, 0, 1, 1, 2], [0], [0]>} : vector<2x1x10xf32>, vector<2x10x32xf32>, vector<2x1x32xf32> -> vector<2x1x32xf32>
    "tpu.trace_stop"() : () -> ()
    %132 = vector.shape_cast %131 : vector<2x1x32xf32> to vector<2x32xf32>
    %cst_60 = arith.constant dense<0.000000e+00> : vector<2x32xf32>
    %133 = tpu.matmul %132, %17, %cst_60 {dimension_numbers = #tpu.dot_dimension_numbers<[1], [0], [0], [1], [0, 0, 1, 1], [], []>} : vector<2x32xf32>, vector<32x32xf32>, vector<2x32xf32> -> vector<2x32xf32>
    %cst_61 = arith.constant dense<0.000000e+00> : vector<2x32xf32>
    %134 = tpu.matmul %117, %18, %cst_61 {dimension_numbers = #tpu.dot_dimension_numbers<[1], [0], [0], [1], [0, 0, 1, 1], [], []>} : vector<2x32xf32>, vector<32x32xf32>, vector<2x32xf32> -> vector<2x32xf32>
    %135 = arith.addf %133, %134 : vector<2x32xf32>
    %136 = math.tanh %135 : vector<2x32xf32>
    %c4_62 = arith.constant 4 : index
    %c0_63 = arith.constant 0 : index
    %137 = vector.load %arg20[%c4_62, %c0_63] : memref<16x32xf32, #tpu.memory_space<vmem>>, vector<2x32xf32>
    tpu.vector_store %arg20[%c4_62, %c0_63], %136 {strides = array<i32>} : memref<16x32xf32, #tpu.memory_space<vmem>>, vector<2x32xf32>,
    %c6 = arith.constant 6 : index
    %c0_64 = arith.constant 0 : index
    %138 = vector.load %arg19[%c6, %c0_64] : memref<16x128xf32, #tpu.memory_space<vmem>>, vector<2x128xf32>
    %cst_65 = arith.constant dense<0.000000e+00> : vector<2x128xf32>
    %139 = tpu.matmul %136, %16, %cst_65 {dimension_numbers = #tpu.dot_dimension_numbers<[1], [0], [0], [1], [0, 0, 1, 1], [], []>} : vector<2x32xf32>, vector<32x128xf32>, vector<2x128xf32> -> vector<2x128xf32>
    %140 = arith.addf %138, %139 : vector<2x128xf32>
    %141 = vector.extract_strided_slice %140 {offsets = [0, 0], sizes = [2, 96], strides = [1, 1]} : vector<2x128xf32> to vector<2x96xf32>
    %142 = arith.negf %141 : vector<2x96xf32>
    %143 = math.exp %142 : vector<2x96xf32>
    %cst_66 = arith.constant 1.000000e+00 : f32
    %144 = vector.broadcast %cst_66 : f32 to vector<2x96xf32>
    %145 = arith.addf %144, %143 : vector<2x96xf32>
    %146 = arith.divf %144, %145 : vector<2x96xf32>
    %147 = vector.extract_strided_slice %140 {offsets = [0, 96], sizes = [2, 32], strides = [1, 1]} : vector<2x128xf32> to vector<2x32xf32>
    %148 = math.tanh %147 : vector<2x32xf32>
    %149 = vector.extract_strided_slice %146 {offsets = [0, 0], sizes = [2, 32], strides = [1, 1]} : vector<2x96xf32> to vector<2x32xf32>
    %150 = vector.extract_strided_slice %146 {offsets = [0, 32], sizes = [2, 32], strides = [1, 1]} : vector<2x96xf32> to vector<2x32xf32>
    %151 = vector.extract_strided_slice %146 {offsets = [0, 64], sizes = [2, 32], strides = [1, 1]} : vector<2x96xf32> to vector<2x32xf32>
    %152 = arith.mulf %150, %115 : vector<2x32xf32>
    %153 = arith.mulf %149, %148 : vector<2x32xf32>
    %154 = arith.addf %152, %153 : vector<2x32xf32>
    %155 = math.tanh %154 : vector<2x32xf32>
    %156 = arith.mulf %151, %155 : vector<2x32xf32>
    %157 = vector.shape_cast %156 : vector<2x32xf32> to vector<2x1x32xf32>
    "tpu.trace_start"() <{level = 10 : i32, message = "bqh,blh->bql"}> : () -> ()
    %cst_67 = arith.constant dense<0.000000e+00> : vector<2x1x10xf32>
    %158 = tpu.matmul %157, %20, %cst_67 {dimension_numbers = #tpu.dot_dimension_numbers<[2], [2], [1], [1], [0, 0, 0, 1, 1, 1], [0], [0]>} : vector<2x1x32xf32>, vector<2x10x32xf32>, vector<2x1x10xf32> -> vector<2x1x10xf32>
    "tpu.trace_stop"() : () -> ()
    %159 = arith.addf %158, %6 : vector<2x1x10xf32>
    %cst_68 = arith.constant dense<0xFF800000> : vector<2x1xf32>
    %160 = vector.multi_reduction <maximumf>, %159, %cst_68 [2] : vector<2x1x10xf32> to vector<2x1xf32>
    %161 = vector.shape_cast %160 : vector<2x1xf32> to vector<2x1x1xf32>
    %162 = vector.broadcast %161 : vector<2x1x1xf32> to vector<2x1x10xf32>
    %163 = arith.subf %159, %162 : vector<2x1x10xf32>
    %164 = math.exp %163 : vector<2x1x10xf32>
    %cst_69 = arith.constant dense<0.000000e+00> : vector<2x1xf32>
    %165 = vector.multi_reduction <add>, %164, %cst_69 [2] : vector<2x1x10xf32> to vector<2x1xf32>
    %166 = vector.shape_cast %165 : vector<2x1xf32> to vector<2x1x1xf32>
    %167 = tpu.reciprocal %166 {approx = true} : vector<2x1x1xf32> -> vector<2x1x1xf32>
    %168 = vector.broadcast %167 : vector<2x1x1xf32> to vector<2x1x10xf32>
    %169 = arith.mulf %164, %168 : vector<2x1x10xf32>
    "tpu.trace_start"() <{level = 10 : i32, message = "bql,blh->bqh"}> : () -> ()
    %cst_70 = arith.constant dense<0.000000e+00> : vector<2x1x32xf32>
    %170 = tpu.matmul %169, %0, %cst_70 {dimension_numbers = #tpu.dot_dimension_numbers<[2], [1], [1], [2], [0, 0, 0, 1, 1, 2], [0], [0]>} : vector<2x1x10xf32>, vector<2x10x32xf32>, vector<2x1x32xf32> -> vector<2x1x32xf32>
    "tpu.trace_stop"() : () -> ()
    %171 = vector.shape_cast %170 : vector<2x1x32xf32> to vector<2x32xf32>
    %cst_71 = arith.constant dense<0.000000e+00> : vector<2x32xf32>
    %172 = tpu.matmul %171, %17, %cst_71 {dimension_numbers = #tpu.dot_dimension_numbers<[1], [0], [0], [1], [0, 0, 1, 1], [], []>} : vector<2x32xf32>, vector<32x32xf32>, vector<2x32xf32> -> vector<2x32xf32>
    %cst_72 = arith.constant dense<0.000000e+00> : vector<2x32xf32>
    %173 = tpu.matmul %156, %18, %cst_72 {dimension_numbers = #tpu.dot_dimension_numbers<[1], [0], [0], [1], [0, 0, 1, 1], [], []>} : vector<2x32xf32>, vector<32x32xf32>, vector<2x32xf32> -> vector<2x32xf32>
    %174 = arith.addf %172, %173 : vector<2x32xf32>
    %175 = math.tanh %174 : vector<2x32xf32>
    %c6_73 = arith.constant 6 : index
    %c0_74 = arith.constant 0 : index
    %176 = vector.load %arg20[%c6_73, %c0_74] : memref<16x32xf32, #tpu.memory_space<vmem>>, vector<2x32xf32>
    tpu.vector_store %arg20[%c6_73, %c0_74], %175 {strides = array<i32>} : memref<16x32xf32, #tpu.memory_space<vmem>>, vector<2x32xf32>,
    %c8 = arith.constant 8 : index
    %c0_75 = arith.constant 0 : index
    %177 = vector.load %arg19[%c8, %c0_75] : memref<16x128xf32, #tpu.memory_space<vmem>>, vector<2x128xf32>
    %cst_76 = arith.constant dense<0.000000e+00> : vector<2x128xf32>
    %178 = tpu.matmul %175, %16, %cst_76 {dimension_numbers = #tpu.dot_dimension_numbers<[1], [0], [0], [1], [0, 0, 1, 1], [], []>} : vector<2x32xf32>, vector<32x128xf32>, vector<2x128xf32> -> vector<2x128xf32>
    %179 = arith.addf %177, %178 : vector<2x128xf32>
    %180 = vector.extract_strided_slice %179 {offsets = [0, 0], sizes = [2, 96], strides = [1, 1]} : vector<2x128xf32> to vector<2x96xf32>
    %181 = arith.negf %180 : vector<2x96xf32>
    %182 = math.exp %181 : vector<2x96xf32>
    %cst_77 = arith.constant 1.000000e+00 : f32
    %183 = vector.broadcast %cst_77 : f32 to vector<2x96xf32>
    %184 = arith.addf %183, %182 : vector<2x96xf32>
    %185 = arith.divf %183, %184 : vector<2x96xf32>
    %186 = vector.extract_strided_slice %179 {offsets = [0, 96], sizes = [2, 32], strides = [1, 1]} : vector<2x128xf32> to vector<2x32xf32>
    %187 = math.tanh %186 : vector<2x32xf32>
    %188 = vector.extract_strided_slice %185 {offsets = [0, 0], sizes = [2, 32], strides = [1, 1]} : vector<2x96xf32> to vector<2x32xf32>
    %189 = vector.extract_strided_slice %185 {offsets = [0, 32], sizes = [2, 32], strides = [1, 1]} : vector<2x96xf32> to vector<2x32xf32>
    %190 = vector.extract_strided_slice %185 {offsets = [0, 64], sizes = [2, 32], strides = [1, 1]} : vector<2x96xf32> to vector<2x32xf32>
    %191 = arith.mulf %189, %154 : vector<2x32xf32>
    %192 = arith.mulf %188, %187 : vector<2x32xf32>
    %193 = arith.addf %191, %192 : vector<2x32xf32>
    %194 = math.tanh %193 : vector<2x32xf32>
    %195 = arith.mulf %190, %194 : vector<2x32xf32>
    %196 = vector.shape_cast %195 : vector<2x32xf32> to vector<2x1x32xf32>
    "tpu.trace_start"() <{level = 10 : i32, message = "bqh,blh->bql"}> : () -> ()
    %cst_78 = arith.constant dense<0.000000e+00> : vector<2x1x10xf32>
    %197 = tpu.matmul %196, %20, %cst_78 {dimension_numbers = #tpu.dot_dimension_numbers<[2], [2], [1], [1], [0, 0, 0, 1, 1, 1], [0], [0]>} : vector<2x1x32xf32>, vector<2x10x32xf32>, vector<2x1x10xf32> -> vector<2x1x10xf32>
    "tpu.trace_stop"() : () -> ()
    %198 = arith.addf %197, %6 : vector<2x1x10xf32>
    %cst_79 = arith.constant dense<0xFF800000> : vector<2x1xf32>
    %199 = vector.multi_reduction <maximumf>, %198, %cst_79 [2] : vector<2x1x10xf32> to vector<2x1xf32>
    %200 = vector.shape_cast %199 : vector<2x1xf32> to vector<2x1x1xf32>
    %201 = vector.broadcast %200 : vector<2x1x1xf32> to vector<2x1x10xf32>
    %202 = arith.subf %198, %201 : vector<2x1x10xf32>
    %203 = math.exp %202 : vector<2x1x10xf32>
    %cst_80 = arith.constant dense<0.000000e+00> : vector<2x1xf32>
    %204 = vector.multi_reduction <add>, %203, %cst_80 [2] : vector<2x1x10xf32> to vector<2x1xf32>
    %205 = vector.shape_cast %204 : vector<2x1xf32> to vector<2x1x1xf32>
    %206 = tpu.reciprocal %205 {approx = true} : vector<2x1x1xf32> -> vector<2x1x1xf32>
    %207 = vector.broadcast %206 : vector<2x1x1xf32> to vector<2x1x10xf32>
    %208 = arith.mulf %203, %207 : vector<2x1x10xf32>
    "tpu.trace_start"() <{level = 10 : i32, message = "bql,blh->bqh"}> : () -> ()
    %cst_81 = arith.constant dense<0.000000e+00> : vector<2x1x32xf32>
    %209 = tpu.matmul %208, %0, %cst_81 {dimension_numbers = #tpu.dot_dimension_numbers<[2], [1], [1], [2], [0, 0, 0, 1, 1, 2], [0], [0]>} : vector<2x1x10xf32>, vector<2x10x32xf32>, vector<2x1x32xf32> -> vector<2x1x32xf32>
    "tpu.trace_stop"() : () -> ()
    %210 = vector.shape_cast %209 : vector<2x1x32xf32> to vector<2x32xf32>
    %cst_82 = arith.constant dense<0.000000e+00> : vector<2x32xf32>
    %211 = tpu.matmul %210, %17, %cst_82 {dimension_numbers = #tpu.dot_dimension_numbers<[1], [0], [0], [1], [0, 0, 1, 1], [], []>} : vector<2x32xf32>, vector<32x32xf32>, vector<2x32xf32> -> vector<2x32xf32>
    %cst_83 = arith.constant dense<0.000000e+00> : vector<2x32xf32>
    %212 = tpu.matmul %195, %18, %cst_83 {dimension_numbers = #tpu.dot_dimension_numbers<[1], [0], [0], [1], [0, 0, 1, 1], [], []>} : vector<2x32xf32>, vector<32x32xf32>, vector<2x32xf32> -> vector<2x32xf32>
    %213 = arith.addf %211, %212 : vector<2x32xf32>
    %214 = math.tanh %213 : vector<2x32xf32>
    %c8_84 = arith.constant 8 : index
    %c0_85 = arith.constant 0 : index
    %215 = vector.load %arg20[%c8_84, %c0_85] : memref<16x32xf32, #tpu.memory_space<vmem>>, vector<2x32xf32>
    tpu.vector_store %arg20[%c8_84, %c0_85], %214 {strides = array<i32>} : memref<16x32xf32, #tpu.memory_space<vmem>>, vector<2x32xf32>,
    %c10 = arith.constant 10 : index
    %c0_86 = arith.constant 0 : index
    %216 = vector.load %arg19[%c10, %c0_86] : memref<16x128xf32, #tpu.memory_space<vmem>>, vector<2x128xf32>
    %cst_87 = arith.constant dense<0.000000e+00> : vector<2x128xf32>
    %217 = tpu.matmul %214, %16, %cst_87 {dimension_numbers = #tpu.dot_dimension_numbers<[1], [0], [0], [1], [0, 0, 1, 1], [], []>} : vector<2x32xf32>, vector<32x128xf32>, vector<2x128xf32> -> vector<2x128xf32>
    %218 = arith.addf %216, %217 : vector<2x128xf32>
    %219 = vector.extract_strided_slice %218 {offsets = [0, 0], sizes = [2, 96], strides = [1, 1]} : vector<2x128xf32> to vector<2x96xf32>
    %220 = arith.negf %219 : vector<2x96xf32>
    %221 = math.exp %220 : vector<2x96xf32>
    %cst_88 = arith.constant 1.000000e+00 : f32
    %222 = vector.broadcast %cst_88 : f32 to vector<2x96xf32>
    %223 = arith.addf %222, %221 : vector<2x96xf32>
    %224 = arith.divf %222, %223 : vector<2x96xf32>
    %225 = vector.extract_strided_slice %218 {offsets = [0, 96], sizes = [2, 32], strides = [1, 1]} : vector<2x128xf32> to vector<2x32xf32>
    %226 = math.tanh %225 : vector<2x32xf32>
    %227 = vector.extract_strided_slice %224 {offsets = [0, 0], sizes = [2, 32], strides = [1, 1]} : vector<2x96xf32> to vector<2x32xf32>
    %228 = vector.extract_strided_slice %224 {offsets = [0, 32], sizes = [2, 32], strides = [1, 1]} : vector<2x96xf32> to vector<2x32xf32>
    %229 = vector.extract_strided_slice %224 {offsets = [0, 64], sizes = [2, 32], strides = [1, 1]} : vector<2x96xf32> to vector<2x32xf32>
    %230 = arith.mulf %228, %193 : vector<2x32xf32>
    %231 = arith.mulf %227, %226 : vector<2x32xf32>
    %232 = arith.addf %230, %231 : vector<2x32xf32>
    %233 = math.tanh %232 : vector<2x32xf32>
    %234 = arith.mulf %229, %233 : vector<2x32xf32>
    %235 = vector.shape_cast %234 : vector<2x32xf32> to vector<2x1x32xf32>
    "tpu.trace_start"() <{level = 10 : i32, message = "bqh,blh->bql"}> : () -> ()
    %cst_89 = arith.constant dense<0.000000e+00> : vector<2x1x10xf32>
    %236 = tpu.matmul %235, %20, %cst_89 {dimension_numbers = #tpu.dot_dimension_numbers<[2], [2], [1], [1], [0, 0, 0, 1, 1, 1], [0], [0]>} : vector<2x1x32xf32>, vector<2x10x32xf32>, vector<2x1x10xf32> -> vector<2x1x10xf32>
    "tpu.trace_stop"() : () -> ()
    %237 = arith.addf %236, %6 : vector<2x1x10xf32>
    %cst_90 = arith.constant dense<0xFF800000> : vector<2x1xf32>
    %238 = vector.multi_reduction <maximumf>, %237, %cst_90 [2] : vector<2x1x10xf32> to vector<2x1xf32>
    %239 = vector.shape_cast %238 : vector<2x1xf32> to vector<2x1x1xf32>
    %240 = vector.broadcast %239 : vector<2x1x1xf32> to vector<2x1x10xf32>
    %241 = arith.subf %237, %240 : vector<2x1x10xf32>
    %242 = math.exp %241 : vector<2x1x10xf32>
    %cst_91 = arith.constant dense<0.000000e+00> : vector<2x1xf32>
    %243 = vector.multi_reduction <add>, %242, %cst_91 [2] : vector<2x1x10xf32> to vector<2x1xf32>
    %244 = vector.shape_cast %243 : vector<2x1xf32> to vector<2x1x1xf32>
    %245 = tpu.reciprocal %244 {approx = true} : vector<2x1x1xf32> -> vector<2x1x1xf32>
    %246 = vector.broadcast %245 : vector<2x1x1xf32> to vector<2x1x10xf32>
    %247 = arith.mulf %242, %246 : vector<2x1x10xf32>
    "tpu.trace_start"() <{level = 10 : i32, message = "bql,blh->bqh"}> : () -> ()
    %cst_92 = arith.constant dense<0.000000e+00> : vector<2x1x32xf32>
    %248 = tpu.matmul %247, %0, %cst_92 {dimension_numbers = #tpu.dot_dimension_numbers<[2], [1], [1], [2], [0, 0, 0, 1, 1, 2], [0], [0]>} : vector<2x1x10xf32>, vector<2x10x32xf32>, vector<2x1x32xf32> -> vector<2x1x32xf32>
    "tpu.trace_stop"() : () -> ()
    %249 = vector.shape_cast %248 : vector<2x1x32xf32> to vector<2x32xf32>
    %cst_93 = arith.constant dense<0.000000e+00> : vector<2x32xf32>
    %250 = tpu.matmul %249, %17, %cst_93 {dimension_numbers = #tpu.dot_dimension_numbers<[1], [0], [0], [1], [0, 0, 1, 1], [], []>} : vector<2x32xf32>, vector<32x32xf32>, vector<2x32xf32> -> vector<2x32xf32>
    %cst_94 = arith.constant dense<0.000000e+00> : vector<2x32xf32>
    %251 = tpu.matmul %234, %18, %cst_94 {dimension_numbers = #tpu.dot_dimension_numbers<[1], [0], [0], [1], [0, 0, 1, 1], [], []>} : vector<2x32xf32>, vector<32x32xf32>, vector<2x32xf32> -> vector<2x32xf32>
    %252 = arith.addf %250, %251 : vector<2x32xf32>
    %253 = math.tanh %252 : vector<2x32xf32>
    %c10_95 = arith.constant 10 : index
    %c0_96 = arith.constant 0 : index
    %254 = vector.load %arg20[%c10_95, %c0_96] : memref<16x32xf32, #tpu.memory_space<vmem>>, vector<2x32xf32>
    tpu.vector_store %arg20[%c10_95, %c0_96], %253 {strides = array<i32>} : memref<16x32xf32, #tpu.memory_space<vmem>>, vector<2x32xf32>,
    %c12 = arith.constant 12 : index
    %c0_97 = arith.constant 0 : index
    %255 = vector.load %arg19[%c12, %c0_97] : memref<16x128xf32, #tpu.memory_space<vmem>>, vector<2x128xf32>
    %cst_98 = arith.constant dense<0.000000e+00> : vector<2x128xf32>
    %256 = tpu.matmul %253, %16, %cst_98 {dimension_numbers = #tpu.dot_dimension_numbers<[1], [0], [0], [1], [0, 0, 1, 1], [], []>} : vector<2x32xf32>, vector<32x128xf32>, vector<2x128xf32> -> vector<2x128xf32>
    %257 = arith.addf %255, %256 : vector<2x128xf32>
    %258 = vector.extract_strided_slice %257 {offsets = [0, 0], sizes = [2, 96], strides = [1, 1]} : vector<2x128xf32> to vector<2x96xf32>
    %259 = arith.negf %258 : vector<2x96xf32>
    %260 = math.exp %259 : vector<2x96xf32>
    %cst_99 = arith.constant 1.000000e+00 : f32
    %261 = vector.broadcast %cst_99 : f32 to vector<2x96xf32>
    %262 = arith.addf %261, %260 : vector<2x96xf32>
    %263 = arith.divf %261, %262 : vector<2x96xf32>
    %264 = vector.extract_strided_slice %257 {offsets = [0, 96], sizes = [2, 32], strides = [1, 1]} : vector<2x128xf32> to vector<2x32xf32>
    %265 = math.tanh %264 : vector<2x32xf32>
    %266 = vector.extract_strided_slice %263 {offsets = [0, 0], sizes = [2, 32], strides = [1, 1]} : vector<2x96xf32> to vector<2x32xf32>
    %267 = vector.extract_strided_slice %263 {offsets = [0, 32], sizes = [2, 32], strides = [1, 1]} : vector<2x96xf32> to vector<2x32xf32>
    %268 = vector.extract_strided_slice %263 {offsets = [0, 64], sizes = [2, 32], strides = [1, 1]} : vector<2x96xf32> to vector<2x32xf32>
    %269 = arith.mulf %267, %232 : vector<2x32xf32>
    %270 = arith.mulf %266, %265 : vector<2x32xf32>
    %271 = arith.addf %269, %270 : vector<2x32xf32>
    %272 = math.tanh %271 : vector<2x32xf32>
    %273 = arith.mulf %268, %272 : vector<2x32xf32>
    %274 = vector.shape_cast %273 : vector<2x32xf32> to vector<2x1x32xf32>
    "tpu.trace_start"() <{level = 10 : i32, message = "bqh,blh->bql"}> : () -> ()
    %cst_100 = arith.constant dense<0.000000e+00> : vector<2x1x10xf32>
    %275 = tpu.matmul %274, %20, %cst_100 {dimension_numbers = #tpu.dot_dimension_numbers<[2], [2], [1], [1], [0, 0, 0, 1, 1, 1], [0], [0]>} : vector<2x1x32xf32>, vector<2x10x32xf32>, vector<2x1x10xf32> -> vector<2x1x10xf32>
    "tpu.trace_stop"() : () -> ()
    %276 = arith.addf %275, %6 : vector<2x1x10xf32>
    %cst_101 = arith.constant dense<0xFF800000> : vector<2x1xf32>
    %277 = vector.multi_reduction <maximumf>, %276, %cst_101 [2] : vector<2x1x10xf32> to vector<2x1xf32>
    %278 = vector.shape_cast %277 : vector<2x1xf32> to vector<2x1x1xf32>
    %279 = vector.broadcast %278 : vector<2x1x1xf32> to vector<2x1x10xf32>
    %280 = arith.subf %276, %279 : vector<2x1x10xf32>
    %281 = math.exp %280 : vector<2x1x10xf32>
    %cst_102 = arith.constant dense<0.000000e+00> : vector<2x1xf32>
    %282 = vector.multi_reduction <add>, %281, %cst_102 [2] : vector<2x1x10xf32> to vector<2x1xf32>
    %283 = vector.shape_cast %282 : vector<2x1xf32> to vector<2x1x1xf32>
    %284 = tpu.reciprocal %283 {approx = true} : vector<2x1x1xf32> -> vector<2x1x1xf32>
    %285 = vector.broadcast %284 : vector<2x1x1xf32> to vector<2x1x10xf32>
    %286 = arith.mulf %281, %285 : vector<2x1x10xf32>
    "tpu.trace_start"() <{level = 10 : i32, message = "bql,blh->bqh"}> : () -> ()
    %cst_103 = arith.constant dense<0.000000e+00> : vector<2x1x32xf32>
    %287 = tpu.matmul %286, %0, %cst_103 {dimension_numbers = #tpu.dot_dimension_numbers<[2], [1], [1], [2], [0, 0, 0, 1, 1, 2], [0], [0]>} : vector<2x1x10xf32>, vector<2x10x32xf32>, vector<2x1x32xf32> -> vector<2x1x32xf32>
    "tpu.trace_stop"() : () -> ()
    %288 = vector.shape_cast %287 : vector<2x1x32xf32> to vector<2x32xf32>
    %cst_104 = arith.constant dense<0.000000e+00> : vector<2x32xf32>
    %289 = tpu.matmul %288, %17, %cst_104 {dimension_numbers = #tpu.dot_dimension_numbers<[1], [0], [0], [1], [0, 0, 1, 1], [], []>} : vector<2x32xf32>, vector<32x32xf32>, vector<2x32xf32> -> vector<2x32xf32>
    %cst_105 = arith.constant dense<0.000000e+00> : vector<2x32xf32>
    %290 = tpu.matmul %273, %18, %cst_105 {dimension_numbers = #tpu.dot_dimension_numbers<[1], [0], [0], [1], [0, 0, 1, 1], [], []>} : vector<2x32xf32>, vector<32x32xf32>, vector<2x32xf32> -> vector<2x32xf32>
    %291 = arith.addf %289, %290 : vector<2x32xf32>
    %292 = math.tanh %291 : vector<2x32xf32>
    %c12_106 = arith.constant 12 : index
    %c0_107 = arith.constant 0 : index
    %293 = vector.load %arg20[%c12_106, %c0_107] : memref<16x32xf32, #tpu.memory_space<vmem>>, vector<2x32xf32>
    tpu.vector_store %arg20[%c12_106, %c0_107], %292 {strides = array<i32>} : memref<16x32xf32, #tpu.memory_space<vmem>>, vector<2x32xf32>,
    %c14 = arith.constant 14 : index
    %c0_108 = arith.constant 0 : index
    %294 = vector.load %arg19[%c14, %c0_108] : memref<16x128xf32, #tpu.memory_space<vmem>>, vector<2x128xf32>
    %cst_109 = arith.constant dense<0.000000e+00> : vector<2x128xf32>
    %295 = tpu.matmul %292, %16, %cst_109 {dimension_numbers = #tpu.dot_dimension_numbers<[1], [0], [0], [1], [0, 0, 1, 1], [], []>} : vector<2x32xf32>, vector<32x128xf32>, vector<2x128xf32> -> vector<2x128xf32>
    %296 = arith.addf %294, %295 : vector<2x128xf32>
    %297 = vector.extract_strided_slice %296 {offsets = [0, 0], sizes = [2, 96], strides = [1, 1]} : vector<2x128xf32> to vector<2x96xf32>
    %298 = arith.negf %297 : vector<2x96xf32>
    %299 = math.exp %298 : vector<2x96xf32>
    %cst_110 = arith.constant 1.000000e+00 : f32
    %300 = vector.broadcast %cst_110 : f32 to vector<2x96xf32>
    %301 = arith.addf %300, %299 : vector<2x96xf32>
    %302 = arith.divf %300, %301 : vector<2x96xf32>
    %303 = vector.extract_strided_slice %296 {offsets = [0, 96], sizes = [2, 32], strides = [1, 1]} : vector<2x128xf32> to vector<2x32xf32>
    %304 = math.tanh %303 : vector<2x32xf32>
    %305 = vector.extract_strided_slice %302 {offsets = [0, 0], sizes = [2, 32], strides = [1, 1]} : vector<2x96xf32> to vector<2x32xf32>
    %306 = vector.extract_strided_slice %302 {offsets = [0, 32], sizes = [2, 32], strides = [1, 1]} : vector<2x96xf32> to vector<2x32xf32>
    %307 = vector.extract_strided_slice %302 {offsets = [0, 64], sizes = [2, 32], strides = [1, 1]} : vector<2x96xf32> to vector<2x32xf32>
    %308 = arith.mulf %306, %271 : vector<2x32xf32>
    %309 = arith.mulf %305, %304 : vector<2x32xf32>
    %310 = arith.addf %308, %309 : vector<2x32xf32>
    %311 = math.tanh %310 : vector<2x32xf32>
    %312 = arith.mulf %307, %311 : vector<2x32xf32>
    %313 = vector.shape_cast %312 : vector<2x32xf32> to vector<2x1x32xf32>
    "tpu.trace_start"() <{level = 10 : i32, message = "bqh,blh->bql"}> : () -> ()
    %cst_111 = arith.constant dense<0.000000e+00> : vector<2x1x10xf32>
    %314 = tpu.matmul %313, %20, %cst_111 {dimension_numbers = #tpu.dot_dimension_numbers<[2], [2], [1], [1], [0, 0, 0, 1, 1, 1], [0], [0]>} : vector<2x1x32xf32>, vector<2x10x32xf32>, vector<2x1x10xf32> -> vector<2x1x10xf32>
    "tpu.trace_stop"() : () -> ()
    %315 = arith.addf %314, %6 : vector<2x1x10xf32>
    %cst_112 = arith.constant dense<0xFF800000> : vector<2x1xf32>
    %316 = vector.multi_reduction <maximumf>, %315, %cst_112 [2] : vector<2x1x10xf32> to vector<2x1xf32>
    %317 = vector.shape_cast %316 : vector<2x1xf32> to vector<2x1x1xf32>
    %318 = vector.broadcast %317 : vector<2x1x1xf32> to vector<2x1x10xf32>
    %319 = arith.subf %315, %318 : vector<2x1x10xf32>
    %320 = math.exp %319 : vector<2x1x10xf32>
    %cst_113 = arith.constant dense<0.000000e+00> : vector<2x1xf32>
    %321 = vector.multi_reduction <add>, %320, %cst_113 [2] : vector<2x1x10xf32> to vector<2x1xf32>
    %322 = vector.shape_cast %321 : vector<2x1xf32> to vector<2x1x1xf32>
    %323 = tpu.reciprocal %322 {approx = true} : vector<2x1x1xf32> -> vector<2x1x1xf32>
    %324 = vector.broadcast %323 : vector<2x1x1xf32> to vector<2x1x10xf32>
    %325 = arith.mulf %320, %324 : vector<2x1x10xf32>
    "tpu.trace_start"() <{level = 10 : i32, message = "bql,blh->bqh"}> : () -> ()
    %cst_114 = arith.constant dense<0.000000e+00> : vector<2x1x32xf32>
    %326 = tpu.matmul %325, %0, %cst_114 {dimension_numbers = #tpu.dot_dimension_numbers<[2], [1], [1], [2], [0, 0, 0, 1, 1, 2], [0], [0]>} : vector<2x1x10xf32>, vector<2x10x32xf32>, vector<2x1x32xf32> -> vector<2x1x32xf32>
    "tpu.trace_stop"() : () -> ()
    %327 = vector.shape_cast %326 : vector<2x1x32xf32> to vector<2x32xf32>
    %cst_115 = arith.constant dense<0.000000e+00> : vector<2x32xf32>
    %328 = tpu.matmul %327, %17, %cst_115 {dimension_numbers = #tpu.dot_dimension_numbers<[1], [0], [0], [1], [0, 0, 1, 1], [], []>} : vector<2x32xf32>, vector<32x32xf32>, vector<2x32xf32> -> vector<2x32xf32>
    %cst_116 = arith.constant dense<0.000000e+00> : vector<2x32xf32>
    %329 = tpu.matmul %312, %18, %cst_116 {dimension_numbers = #tpu.dot_dimension_numbers<[1], [0], [0], [1], [0, 0, 1, 1], [], []>} : vector<2x32xf32>, vector<32x32xf32>, vector<2x32xf32> -> vector<2x32xf32>
    %330 = arith.addf %328, %329 : vector<2x32xf32>
    %331 = math.tanh %330 : vector<2x32xf32>
    %c14_117 = arith.constant 14 : index
    %c0_118 = arith.constant 0 : index
    %332 = vector.load %arg20[%c14_117, %c0_118] : memref<16x32xf32, #tpu.memory_space<vmem>>, vector<2x32xf32>
    tpu.vector_store %arg20[%c14_117, %c0_118], %331 {strides = array<i32>} : memref<16x32xf32, #tpu.memory_space<vmem>>, vector<2x32xf32>,
    %c0_119 = arith.constant 0 : index
    %c0_120 = arith.constant 0 : index
    %c0_121 = arith.constant 0 : index
    %333 = vector.load %arg17[%c0_119, %c0_120, %c0_121] : memref<2x2x32xf32, #tpu.memory_space<vmem>>, vector<1x2x32xf32>
    %334 = vector.shape_cast %333 : vector<1x2x32xf32> to vector<2x32xf32>
    %335 = vector.shape_cast %331 : vector<2x32xf32> to vector<1x2x32xf32>
    tpu.vector_store %arg17[%c0_119, %c0_120, %c0_121], %335 {strides = array<i32>} : memref<2x2x32xf32, #tpu.memory_space<vmem>>, vector<1x2x32xf32>,
    %c0_122 = arith.constant 0 : index
    %c0_123 = arith.constant 0 : index
    %c0_124 = arith.constant 0 : index
    %336 = vector.load %arg18[%c0_122, %c0_123, %c0_124] : memref<2x2x32xf32, #tpu.memory_space<vmem>>, vector<1x2x32xf32>
    %337 = vector.shape_cast %336 : vector<1x2x32xf32> to vector<2x32xf32>
    %338 = vector.shape_cast %310 : vector<2x32xf32> to vector<1x2x32xf32>
    tpu.vector_store %arg18[%c0_122, %c0_123, %c0_124], %338 {strides = array<i32>} : memref<2x2x32xf32, #tpu.memory_space<vmem>>, vector<1x2x32xf32>,
    %c0_125 = arith.constant 0 : index
    %c0_126 = arith.constant 0 : index
    %339 = vector.load %arg20[%c0_125, %c0_126] : memref<16x32xf32, #tpu.memory_space<vmem>>, vector<16x32xf32>
    %c0_127 = arith.constant 0 : index
    %c0_128 = arith.constant 0 : index
    %340 = vector.load %arg11[%c0_127, %c0_128] : memref<32x128xf32, #tpu.memory_space<vmem>>, vector<32x128xf32>
    %cst_129 = arith.constant dense<0.000000e+00> : vector<16x128xf32>
    %341 = tpu.matmul %339, %340, %cst_129 {dimension_numbers = #tpu.dot_dimension_numbers<[1], [0], [0], [1], [0, 0, 1, 1], [], []>} : vector<16x32xf32>, vector<32x128xf32>, vector<16x128xf32> -> vector<16x128xf32>
    %c0_130 = arith.constant 0 : index
    %c0_131 = arith.constant 0 : index
    %342 = vector.load %arg13[%c0_130, %c0_131] : memref<1x128xf32, #tpu.memory_space<vmem>>, vector<1x128xf32>
    %343 = vector.broadcast %342 : vector<1x128xf32> to vector<16x128xf32>
    %344 = arith.addf %341, %343 : vector<16x128xf32>
    %c0_132 = arith.constant 0 : index
    %c0_133 = arith.constant 0 : index
    %345 = vector.load %arg19[%c0_132, %c0_133] : memref<16x128xf32, #tpu.memory_space<vmem>>, vector<16x128xf32>
    tpu.vector_store %arg19[%c0_132, %c0_133], %344 {strides = array<i32>} : memref<16x128xf32, #tpu.memory_space<vmem>>, vector<16x128xf32>,
    %c0_134 = arith.constant 0 : index
    %c0_135 = arith.constant 0 : index
    %346 = vector.load %arg12[%c0_134, %c0_135] : memref<32x128xf32, #tpu.memory_space<vmem>>, vector<32x128xf32>
    %c0_136 = arith.constant 0 : index
    %c0_137 = arith.constant 0 : index
    %347 = vector.load %arg14[%c0_136, %c0_137] : memref<32x32xf32, #tpu.memory_space<vmem>>, vector<32x32xf32>
    %c0_138 = arith.constant 0 : index
    %c0_139 = arith.constant 0 : index
    %348 = vector.load %arg15[%c0_138, %c0_139] : memref<32x32xf32, #tpu.memory_space<vmem>>, vector<32x32xf32>
    %c1 = arith.constant 1 : index
    %c0_140 = arith.constant 0 : index
    %c0_141 = arith.constant 0 : index
    %c0_142 = arith.constant 0 : index
    %349 = vector.load %arg2[%c1, %c0_140, %c0_141, %c0_142] : memref<2x2x10x32xf32, #tpu.memory_space<vmem>>, vector<1x2x10x32xf32>
    %350 = vector.shape_cast %349 : vector<1x2x10x32xf32> to vector<2x10x32xf32>
    %c0_143 = arith.constant 0 : index
    %c0_144 = arith.constant 0 : index
    %351 = vector.load %arg19[%c0_143, %c0_144] : memref<16x128xf32, #tpu.memory_space<vmem>>, vector<2x128xf32>
    %cst_145 = arith.constant dense<0.000000e+00> : vector<2x128xf32>
    %352 = tpu.matmul %7, %346, %cst_145 {dimension_numbers = #tpu.dot_dimension_numbers<[1], [0], [0], [1], [0, 0, 1, 1], [], []>} : vector<2x32xf32>, vector<32x128xf32>, vector<2x128xf32> -> vector<2x128xf32>
    %353 = arith.addf %351, %352 : vector<2x128xf32>
    %354 = vector.extract_strided_slice %353 {offsets = [0, 0], sizes = [2, 96], strides = [1, 1]} : vector<2x128xf32> to vector<2x96xf32>
    %355 = arith.negf %354 : vector<2x96xf32>
    %356 = math.exp %355 : vector<2x96xf32>
    %cst_146 = arith.constant 1.000000e+00 : f32
    %357 = vector.broadcast %cst_146 : f32 to vector<2x96xf32>
    %358 = arith.addf %357, %356 : vector<2x96xf32>
    %359 = arith.divf %357, %358 : vector<2x96xf32>
    %360 = vector.extract_strided_slice %353 {offsets = [0, 96], sizes = [2, 32], strides = [1, 1]} : vector<2x128xf32> to vector<2x32xf32>
    %361 = math.tanh %360 : vector<2x32xf32>
    %362 = vector.extract_strided_slice %359 {offsets = [0, 0], sizes = [2, 32], strides = [1, 1]} : vector<2x96xf32> to vector<2x32xf32>
    %363 = vector.extract_strided_slice %359 {offsets = [0, 32], sizes = [2, 32], strides = [1, 1]} : vector<2x96xf32> to vector<2x32xf32>
    %364 = vector.extract_strided_slice %359 {offsets = [0, 64], sizes = [2, 32], strides = [1, 1]} : vector<2x96xf32> to vector<2x32xf32>
    %365 = arith.mulf %363, %8 : vector<2x32xf32>
    %366 = arith.mulf %362, %361 : vector<2x32xf32>
    %367 = arith.addf %365, %366 : vector<2x32xf32>
    %368 = math.tanh %367 : vector<2x32xf32>
    %369 = arith.mulf %364, %368 : vector<2x32xf32>
    %370 = vector.shape_cast %369 : vector<2x32xf32> to vector<2x1x32xf32>
    "tpu.trace_start"() <{level = 10 : i32, message = "bqh,blh->bql"}> : () -> ()
    %cst_147 = arith.constant dense<0.000000e+00> : vector<2x1x10xf32>
    %371 = tpu.matmul %370, %350, %cst_147 {dimension_numbers = #tpu.dot_dimension_numbers<[2], [2], [1], [1], [0, 0, 0, 1, 1, 1], [0], [0]>} : vector<2x1x32xf32>, vector<2x10x32xf32>, vector<2x1x10xf32> -> vector<2x1x10xf32>
    "tpu.trace_stop"() : () -> ()
    %372 = arith.addf %371, %6 : vector<2x1x10xf32>
    %cst_148 = arith.constant dense<0xFF800000> : vector<2x1xf32>
    %373 = vector.multi_reduction <maximumf>, %372, %cst_148 [2] : vector<2x1x10xf32> to vector<2x1xf32>
    %374 = vector.shape_cast %373 : vector<2x1xf32> to vector<2x1x1xf32>
    %375 = vector.broadcast %374 : vector<2x1x1xf32> to vector<2x1x10xf32>
    %376 = arith.subf %372, %375 : vector<2x1x10xf32>
    %377 = math.exp %376 : vector<2x1x10xf32>
    %cst_149 = arith.constant dense<0.000000e+00> : vector<2x1xf32>
    %378 = vector.multi_reduction <add>, %377, %cst_149 [2] : vector<2x1x10xf32> to vector<2x1xf32>
    %379 = vector.shape_cast %378 : vector<2x1xf32> to vector<2x1x1xf32>
    %380 = tpu.reciprocal %379 {approx = true} : vector<2x1x1xf32> -> vector<2x1x1xf32>
    %381 = vector.broadcast %380 : vector<2x1x1xf32> to vector<2x1x10xf32>
    %382 = arith.mulf %377, %381 : vector<2x1x10xf32>
    "tpu.trace_start"() <{level = 10 : i32, message = "bql,blh->bqh"}> : () -> ()
    %cst_150 = arith.constant dense<0.000000e+00> : vector<2x1x32xf32>
    %383 = tpu.matmul %382, %0, %cst_150 {dimension_numbers = #tpu.dot_dimension_numbers<[2], [1], [1], [2], [0, 0, 0, 1, 1, 2], [0], [0]>} : vector<2x1x10xf32>, vector<2x10x32xf32>, vector<2x1x32xf32> -> vector<2x1x32xf32>
    "tpu.trace_stop"() : () -> ()
    %384 = vector.shape_cast %383 : vector<2x1x32xf32> to vector<2x32xf32>
    %cst_151 = arith.constant dense<0.000000e+00> : vector<2x32xf32>
    %385 = tpu.matmul %384, %347, %cst_151 {dimension_numbers = #tpu.dot_dimension_numbers<[1], [0], [0], [1], [0, 0, 1, 1], [], []>} : vector<2x32xf32>, vector<32x32xf32>, vector<2x32xf32> -> vector<2x32xf32>
    %cst_152 = arith.constant dense<0.000000e+00> : vector<2x32xf32>
    %386 = tpu.matmul %369, %348, %cst_152 {dimension_numbers = #tpu.dot_dimension_numbers<[1], [0], [0], [1], [0, 0, 1, 1], [], []>} : vector<2x32xf32>, vector<32x32xf32>, vector<2x32xf32> -> vector<2x32xf32>
    %387 = arith.addf %385, %386 : vector<2x32xf32>
    %388 = math.tanh %387 : vector<2x32xf32>
    %c0_153 = arith.constant 0 : index
    %c0_154 = arith.constant 0 : index
    %389 = vector.load %arg16[%c0_153, %c0_154] : memref<16x32xf32, #tpu.memory_space<vmem>>, vector<2x32xf32>
    tpu.vector_store %arg16[%c0_153, %c0_154], %388 {strides = array<i32>} : memref<16x32xf32, #tpu.memory_space<vmem>>, vector<2x32xf32>,
    %c2_155 = arith.constant 2 : index
    %c0_156 = arith.constant 0 : index
    %390 = vector.load %arg19[%c2_155, %c0_156] : memref<16x128xf32, #tpu.memory_space<vmem>>, vector<2x128xf32>
    %cst_157 = arith.constant dense<0.000000e+00> : vector<2x128xf32>
    %391 = tpu.matmul %388, %346, %cst_157 {dimension_numbers = #tpu.dot_dimension_numbers<[1], [0], [0], [1], [0, 0, 1, 1], [], []>} : vector<2x32xf32>, vector<32x128xf32>, vector<2x128xf32> -> vector<2x128xf32>
    %392 = arith.addf %390, %391 : vector<2x128xf32>
    %393 = vector.extract_strided_slice %392 {offsets = [0, 0], sizes = [2, 96], strides = [1, 1]} : vector<2x128xf32> to vector<2x96xf32>
    %394 = arith.negf %393 : vector<2x96xf32>
    %395 = math.exp %394 : vector<2x96xf32>
    %cst_158 = arith.constant 1.000000e+00 : f32
    %396 = vector.broadcast %cst_158 : f32 to vector<2x96xf32>
    %397 = arith.addf %396, %395 : vector<2x96xf32>
    %398 = arith.divf %396, %397 : vector<2x96xf32>
    %399 = vector.extract_strided_slice %392 {offsets = [0, 96], sizes = [2, 32], strides = [1, 1]} : vector<2x128xf32> to vector<2x32xf32>
    %400 = math.tanh %399 : vector<2x32xf32>
    %401 = vector.extract_strided_slice %398 {offsets = [0, 0], sizes = [2, 32], strides = [1, 1]} : vector<2x96xf32> to vector<2x32xf32>
    %402 = vector.extract_strided_slice %398 {offsets = [0, 32], sizes = [2, 32], strides = [1, 1]} : vector<2x96xf32> to vector<2x32xf32>
    %403 = vector.extract_strided_slice %398 {offsets = [0, 64], sizes = [2, 32], strides = [1, 1]} : vector<2x96xf32> to vector<2x32xf32>
    %404 = arith.mulf %402, %367 : vector<2x32xf32>
    %405 = arith.mulf %401, %400 : vector<2x32xf32>
    %406 = arith.addf %404, %405 : vector<2x32xf32>
    %407 = math.tanh %406 : vector<2x32xf32>
    %408 = arith.mulf %403, %407 : vector<2x32xf32>
    %409 = vector.shape_cast %408 : vector<2x32xf32> to vector<2x1x32xf32>
    "tpu.trace_start"() <{level = 10 : i32, message = "bqh,blh->bql"}> : () -> ()
    %cst_159 = arith.constant dense<0.000000e+00> : vector<2x1x10xf32>
    %410 = tpu.matmul %409, %350, %cst_159 {dimension_numbers = #tpu.dot_dimension_numbers<[2], [2], [1], [1], [0, 0, 0, 1, 1, 1], [0], [0]>} : vector<2x1x32xf32>, vector<2x10x32xf32>, vector<2x1x10xf32> -> vector<2x1x10xf32>
    "tpu.trace_stop"() : () -> ()
    %411 = arith.addf %410, %6 : vector<2x1x10xf32>
    %cst_160 = arith.constant dense<0xFF800000> : vector<2x1xf32>
    %412 = vector.multi_reduction <maximumf>, %411, %cst_160 [2] : vector<2x1x10xf32> to vector<2x1xf32>
    %413 = vector.shape_cast %412 : vector<2x1xf32> to vector<2x1x1xf32>
    %414 = vector.broadcast %413 : vector<2x1x1xf32> to vector<2x1x10xf32>
    %415 = arith.subf %411, %414 : vector<2x1x10xf32>
    %416 = math.exp %415 : vector<2x1x10xf32>
    %cst_161 = arith.constant dense<0.000000e+00> : vector<2x1xf32>
    %417 = vector.multi_reduction <add>, %416, %cst_161 [2] : vector<2x1x10xf32> to vector<2x1xf32>
    %418 = vector.shape_cast %417 : vector<2x1xf32> to vector<2x1x1xf32>
    %419 = tpu.reciprocal %418 {approx = true} : vector<2x1x1xf32> -> vector<2x1x1xf32>
    %420 = vector.broadcast %419 : vector<2x1x1xf32> to vector<2x1x10xf32>
    %421 = arith.mulf %416, %420 : vector<2x1x10xf32>
    "tpu.trace_start"() <{level = 10 : i32, message = "bql,blh->bqh"}> : () -> ()
    %cst_162 = arith.constant dense<0.000000e+00> : vector<2x1x32xf32>
    %422 = tpu.matmul %421, %0, %cst_162 {dimension_numbers = #tpu.dot_dimension_numbers<[2], [1], [1], [2], [0, 0, 0, 1, 1, 2], [0], [0]>} : vector<2x1x10xf32>, vector<2x10x32xf32>, vector<2x1x32xf32> -> vector<2x1x32xf32>
    "tpu.trace_stop"() : () -> ()
    %423 = vector.shape_cast %422 : vector<2x1x32xf32> to vector<2x32xf32>
    %cst_163 = arith.constant dense<0.000000e+00> : vector<2x32xf32>
    %424 = tpu.matmul %423, %347, %cst_163 {dimension_numbers = #tpu.dot_dimension_numbers<[1], [0], [0], [1], [0, 0, 1, 1], [], []>} : vector<2x32xf32>, vector<32x32xf32>, vector<2x32xf32> -> vector<2x32xf32>
    %cst_164 = arith.constant dense<0.000000e+00> : vector<2x32xf32>
    %425 = tpu.matmul %408, %348, %cst_164 {dimension_numbers = #tpu.dot_dimension_numbers<[1], [0], [0], [1], [0, 0, 1, 1], [], []>} : vector<2x32xf32>, vector<32x32xf32>, vector<2x32xf32> -> vector<2x32xf32>
    %426 = arith.addf %424, %425 : vector<2x32xf32>
    %427 = math.tanh %426 : vector<2x32xf32>
    %c2_165 = arith.constant 2 : index
    %c0_166 = arith.constant 0 : index
    %428 = vector.load %arg16[%c2_165, %c0_166] : memref<16x32xf32, #tpu.memory_space<vmem>>, vector<2x32xf32>
    tpu.vector_store %arg16[%c2_165, %c0_166], %427 {strides = array<i32>} : memref<16x32xf32, #tpu.memory_space<vmem>>, vector<2x32xf32>,
    %c4_167 = arith.constant 4 : index
    %c0_168 = arith.constant 0 : index
    %429 = vector.load %arg19[%c4_167, %c0_168] : memref<16x128xf32, #tpu.memory_space<vmem>>, vector<2x128xf32>
    %cst_169 = arith.constant dense<0.000000e+00> : vector<2x128xf32>
    %430 = tpu.matmul %427, %346, %cst_169 {dimension_numbers = #tpu.dot_dimension_numbers<[1], [0], [0], [1], [0, 0, 1, 1], [], []>} : vector<2x32xf32>, vector<32x128xf32>, vector<2x128xf32> -> vector<2x128xf32>
    %431 = arith.addf %429, %430 : vector<2x128xf32>
    %432 = vector.extract_strided_slice %431 {offsets = [0, 0], sizes = [2, 96], strides = [1, 1]} : vector<2x128xf32> to vector<2x96xf32>
    %433 = arith.negf %432 : vector<2x96xf32>
    %434 = math.exp %433 : vector<2x96xf32>
    %cst_170 = arith.constant 1.000000e+00 : f32
    %435 = vector.broadcast %cst_170 : f32 to vector<2x96xf32>
    %436 = arith.addf %435, %434 : vector<2x96xf32>
    %437 = arith.divf %435, %436 : vector<2x96xf32>
    %438 = vector.extract_strided_slice %431 {offsets = [0, 96], sizes = [2, 32], strides = [1, 1]} : vector<2x128xf32> to vector<2x32xf32>
    %439 = math.tanh %438 : vector<2x32xf32>
    %440 = vector.extract_strided_slice %437 {offsets = [0, 0], sizes = [2, 32], strides = [1, 1]} : vector<2x96xf32> to vector<2x32xf32>
    %441 = vector.extract_strided_slice %437 {offsets = [0, 32], sizes = [2, 32], strides = [1, 1]} : vector<2x96xf32> to vector<2x32xf32>
    %442 = vector.extract_strided_slice %437 {offsets = [0, 64], sizes = [2, 32], strides = [1, 1]} : vector<2x96xf32> to vector<2x32xf32>
    %443 = arith.mulf %441, %406 : vector<2x32xf32>
    %444 = arith.mulf %440, %439 : vector<2x32xf32>
    %445 = arith.addf %443, %444 : vector<2x32xf32>
    %446 = math.tanh %445 : vector<2x32xf32>
    %447 = arith.mulf %442, %446 : vector<2x32xf32>
    %448 = vector.shape_cast %447 : vector<2x32xf32> to vector<2x1x32xf32>
    "tpu.trace_start"() <{level = 10 : i32, message = "bqh,blh->bql"}> : () -> ()
    %cst_171 = arith.constant dense<0.000000e+00> : vector<2x1x10xf32>
    %449 = tpu.matmul %448, %350, %cst_171 {dimension_numbers = #tpu.dot_dimension_numbers<[2], [2], [1], [1], [0, 0, 0, 1, 1, 1], [0], [0]>} : vector<2x1x32xf32>, vector<2x10x32xf32>, vector<2x1x10xf32> -> vector<2x1x10xf32>
    "tpu.trace_stop"() : () -> ()
    %450 = arith.addf %449, %6 : vector<2x1x10xf32>
    %cst_172 = arith.constant dense<0xFF800000> : vector<2x1xf32>
    %451 = vector.multi_reduction <maximumf>, %450, %cst_172 [2] : vector<2x1x10xf32> to vector<2x1xf32>
    %452 = vector.shape_cast %451 : vector<2x1xf32> to vector<2x1x1xf32>
    %453 = vector.broadcast %452 : vector<2x1x1xf32> to vector<2x1x10xf32>
    %454 = arith.subf %450, %453 : vector<2x1x10xf32>
    %455 = math.exp %454 : vector<2x1x10xf32>
    %cst_173 = arith.constant dense<0.000000e+00> : vector<2x1xf32>
    %456 = vector.multi_reduction <add>, %455, %cst_173 [2] : vector<2x1x10xf32> to vector<2x1xf32>
    %457 = vector.shape_cast %456 : vector<2x1xf32> to vector<2x1x1xf32>
    %458 = tpu.reciprocal %457 {approx = true} : vector<2x1x1xf32> -> vector<2x1x1xf32>
    %459 = vector.broadcast %458 : vector<2x1x1xf32> to vector<2x1x10xf32>
    %460 = arith.mulf %455, %459 : vector<2x1x10xf32>
    "tpu.trace_start"() <{level = 10 : i32, message = "bql,blh->bqh"}> : () -> ()
    %cst_174 = arith.constant dense<0.000000e+00> : vector<2x1x32xf32>
    %461 = tpu.matmul %460, %0, %cst_174 {dimension_numbers = #tpu.dot_dimension_numbers<[2], [1], [1], [2], [0, 0, 0, 1, 1, 2], [0], [0]>} : vector<2x1x10xf32>, vector<2x10x32xf32>, vector<2x1x32xf32> -> vector<2x1x32xf32>
    "tpu.trace_stop"() : () -> ()
    %462 = vector.shape_cast %461 : vector<2x1x32xf32> to vector<2x32xf32>
    %cst_175 = arith.constant dense<0.000000e+00> : vector<2x32xf32>
    %463 = tpu.matmul %462, %347, %cst_175 {dimension_numbers = #tpu.dot_dimension_numbers<[1], [0], [0], [1], [0, 0, 1, 1], [], []>} : vector<2x32xf32>, vector<32x32xf32>, vector<2x32xf32> -> vector<2x32xf32>
    %cst_176 = arith.constant dense<0.000000e+00> : vector<2x32xf32>
    %464 = tpu.matmul %447, %348, %cst_176 {dimension_numbers = #tpu.dot_dimension_numbers<[1], [0], [0], [1], [0, 0, 1, 1], [], []>} : vector<2x32xf32>, vector<32x32xf32>, vector<2x32xf32> -> vector<2x32xf32>
    %465 = arith.addf %463, %464 : vector<2x32xf32>
    %466 = math.tanh %465 : vector<2x32xf32>
    %c4_177 = arith.constant 4 : index
    %c0_178 = arith.constant 0 : index
    %467 = vector.load %arg16[%c4_177, %c0_178] : memref<16x32xf32, #tpu.memory_space<vmem>>, vector<2x32xf32>
    tpu.vector_store %arg16[%c4_177, %c0_178], %466 {strides = array<i32>} : memref<16x32xf32, #tpu.memory_space<vmem>>, vector<2x32xf32>,
    %c6_179 = arith.constant 6 : index
    %c0_180 = arith.constant 0 : index
    %468 = vector.load %arg19[%c6_179, %c0_180] : memref<16x128xf32, #tpu.memory_space<vmem>>, vector<2x128xf32>
    %cst_181 = arith.constant dense<0.000000e+00> : vector<2x128xf32>
    %469 = tpu.matmul %466, %346, %cst_181 {dimension_numbers = #tpu.dot_dimension_numbers<[1], [0], [0], [1], [0, 0, 1, 1], [], []>} : vector<2x32xf32>, vector<32x128xf32>, vector<2x128xf32> -> vector<2x128xf32>
    %470 = arith.addf %468, %469 : vector<2x128xf32>
    %471 = vector.extract_strided_slice %470 {offsets = [0, 0], sizes = [2, 96], strides = [1, 1]} : vector<2x128xf32> to vector<2x96xf32>
    %472 = arith.negf %471 : vector<2x96xf32>
    %473 = math.exp %472 : vector<2x96xf32>
    %cst_182 = arith.constant 1.000000e+00 : f32
    %474 = vector.broadcast %cst_182 : f32 to vector<2x96xf32>
    %475 = arith.addf %474, %473 : vector<2x96xf32>
    %476 = arith.divf %474, %475 : vector<2x96xf32>
    %477 = vector.extract_strided_slice %470 {offsets = [0, 96], sizes = [2, 32], strides = [1, 1]} : vector<2x128xf32> to vector<2x32xf32>
    %478 = math.tanh %477 : vector<2x32xf32>
    %479 = vector.extract_strided_slice %476 {offsets = [0, 0], sizes = [2, 32], strides = [1, 1]} : vector<2x96xf32> to vector<2x32xf32>
    %480 = vector.extract_strided_slice %476 {offsets = [0, 32], sizes = [2, 32], strides = [1, 1]} : vector<2x96xf32> to vector<2x32xf32>
    %481 = vector.extract_strided_slice %476 {offsets = [0, 64], sizes = [2, 32], strides = [1, 1]} : vector<2x96xf32> to vector<2x32xf32>
    %482 = arith.mulf %480, %445 : vector<2x32xf32>
    %483 = arith.mulf %479, %478 : vector<2x32xf32>
    %484 = arith.addf %482, %483 : vector<2x32xf32>
    %485 = math.tanh %484 : vector<2x32xf32>
    %486 = arith.mulf %481, %485 : vector<2x32xf32>
    %487 = vector.shape_cast %486 : vector<2x32xf32> to vector<2x1x32xf32>
    "tpu.trace_start"() <{level = 10 : i32, message = "bqh,blh->bql"}> : () -> ()
    %cst_183 = arith.constant dense<0.000000e+00> : vector<2x1x10xf32>
    %488 = tpu.matmul %487, %350, %cst_183 {dimension_numbers = #tpu.dot_dimension_numbers<[2], [2], [1], [1], [0, 0, 0, 1, 1, 1], [0], [0]>} : vector<2x1x32xf32>, vector<2x10x32xf32>, vector<2x1x10xf32> -> vector<2x1x10xf32>
    "tpu.trace_stop"() : () -> ()
    %489 = arith.addf %488, %6 : vector<2x1x10xf32>
    %cst_184 = arith.constant dense<0xFF800000> : vector<2x1xf32>
    %490 = vector.multi_reduction <maximumf>, %489, %cst_184 [2] : vector<2x1x10xf32> to vector<2x1xf32>
    %491 = vector.shape_cast %490 : vector<2x1xf32> to vector<2x1x1xf32>
    %492 = vector.broadcast %491 : vector<2x1x1xf32> to vector<2x1x10xf32>
    %493 = arith.subf %489, %492 : vector<2x1x10xf32>
    %494 = math.exp %493 : vector<2x1x10xf32>
    %cst_185 = arith.constant dense<0.000000e+00> : vector<2x1xf32>
    %495 = vector.multi_reduction <add>, %494, %cst_185 [2] : vector<2x1x10xf32> to vector<2x1xf32>
    %496 = vector.shape_cast %495 : vector<2x1xf32> to vector<2x1x1xf32>
    %497 = tpu.reciprocal %496 {approx = true} : vector<2x1x1xf32> -> vector<2x1x1xf32>
    %498 = vector.broadcast %497 : vector<2x1x1xf32> to vector<2x1x10xf32>
    %499 = arith.mulf %494, %498 : vector<2x1x10xf32>
    "tpu.trace_start"() <{level = 10 : i32, message = "bql,blh->bqh"}> : () -> ()
    %cst_186 = arith.constant dense<0.000000e+00> : vector<2x1x32xf32>
    %500 = tpu.matmul %499, %0, %cst_186 {dimension_numbers = #tpu.dot_dimension_numbers<[2], [1], [1], [2], [0, 0, 0, 1, 1, 2], [0], [0]>} : vector<2x1x10xf32>, vector<2x10x32xf32>, vector<2x1x32xf32> -> vector<2x1x32xf32>
    "tpu.trace_stop"() : () -> ()
    %501 = vector.shape_cast %500 : vector<2x1x32xf32> to vector<2x32xf32>
    %cst_187 = arith.constant dense<0.000000e+00> : vector<2x32xf32>
    %502 = tpu.matmul %501, %347, %cst_187 {dimension_numbers = #tpu.dot_dimension_numbers<[1], [0], [0], [1], [0, 0, 1, 1], [], []>} : vector<2x32xf32>, vector<32x32xf32>, vector<2x32xf32> -> vector<2x32xf32>
    %cst_188 = arith.constant dense<0.000000e+00> : vector<2x32xf32>
    %503 = tpu.matmul %486, %348, %cst_188 {dimension_numbers = #tpu.dot_dimension_numbers<[1], [0], [0], [1], [0, 0, 1, 1], [], []>} : vector<2x32xf32>, vector<32x32xf32>, vector<2x32xf32> -> vector<2x32xf32>
    %504 = arith.addf %502, %503 : vector<2x32xf32>
    %505 = math.tanh %504 : vector<2x32xf32>
    %c6_189 = arith.constant 6 : index
    %c0_190 = arith.constant 0 : index
    %506 = vector.load %arg16[%c6_189, %c0_190] : memref<16x32xf32, #tpu.memory_space<vmem>>, vector<2x32xf32>
    tpu.vector_store %arg16[%c6_189, %c0_190], %505 {strides = array<i32>} : memref<16x32xf32, #tpu.memory_space<vmem>>, vector<2x32xf32>,
    %c8_191 = arith.constant 8 : index
    %c0_192 = arith.constant 0 : index
    %507 = vector.load %arg19[%c8_191, %c0_192] : memref<16x128xf32, #tpu.memory_space<vmem>>, vector<2x128xf32>
    %cst_193 = arith.constant dense<0.000000e+00> : vector<2x128xf32>
    %508 = tpu.matmul %505, %346, %cst_193 {dimension_numbers = #tpu.dot_dimension_numbers<[1], [0], [0], [1], [0, 0, 1, 1], [], []>} : vector<2x32xf32>, vector<32x128xf32>, vector<2x128xf32> -> vector<2x128xf32>
    %509 = arith.addf %507, %508 : vector<2x128xf32>
    %510 = vector.extract_strided_slice %509 {offsets = [0, 0], sizes = [2, 96], strides = [1, 1]} : vector<2x128xf32> to vector<2x96xf32>
    %511 = arith.negf %510 : vector<2x96xf32>
    %512 = math.exp %511 : vector<2x96xf32>
    %cst_194 = arith.constant 1.000000e+00 : f32
    %513 = vector.broadcast %cst_194 : f32 to vector<2x96xf32>
    %514 = arith.addf %513, %512 : vector<2x96xf32>
    %515 = arith.divf %513, %514 : vector<2x96xf32>
    %516 = vector.extract_strided_slice %509 {offsets = [0, 96], sizes = [2, 32], strides = [1, 1]} : vector<2x128xf32> to vector<2x32xf32>
    %517 = math.tanh %516 : vector<2x32xf32>
    %518 = vector.extract_strided_slice %515 {offsets = [0, 0], sizes = [2, 32], strides = [1, 1]} : vector<2x96xf32> to vector<2x32xf32>
    %519 = vector.extract_strided_slice %515 {offsets = [0, 32], sizes = [2, 32], strides = [1, 1]} : vector<2x96xf32> to vector<2x32xf32>
    %520 = vector.extract_strided_slice %515 {offsets = [0, 64], sizes = [2, 32], strides = [1, 1]} : vector<2x96xf32> to vector<2x32xf32>
    %521 = arith.mulf %519, %484 : vector<2x32xf32>
    %522 = arith.mulf %518, %517 : vector<2x32xf32>
    %523 = arith.addf %521, %522 : vector<2x32xf32>
    %524 = math.tanh %523 : vector<2x32xf32>
    %525 = arith.mulf %520, %524 : vector<2x32xf32>
    %526 = vector.shape_cast %525 : vector<2x32xf32> to vector<2x1x32xf32>
    "tpu.trace_start"() <{level = 10 : i32, message = "bqh,blh->bql"}> : () -> ()
    %cst_195 = arith.constant dense<0.000000e+00> : vector<2x1x10xf32>
    %527 = tpu.matmul %526, %350, %cst_195 {dimension_numbers = #tpu.dot_dimension_numbers<[2], [2], [1], [1], [0, 0, 0, 1, 1, 1], [0], [0]>} : vector<2x1x32xf32>, vector<2x10x32xf32>, vector<2x1x10xf32> -> vector<2x1x10xf32>
    "tpu.trace_stop"() : () -> ()
    %528 = arith.addf %527, %6 : vector<2x1x10xf32>
    %cst_196 = arith.constant dense<0xFF800000> : vector<2x1xf32>
    %529 = vector.multi_reduction <maximumf>, %528, %cst_196 [2] : vector<2x1x10xf32> to vector<2x1xf32>
    %530 = vector.shape_cast %529 : vector<2x1xf32> to vector<2x1x1xf32>
    %531 = vector.broadcast %530 : vector<2x1x1xf32> to vector<2x1x10xf32>
    %532 = arith.subf %528, %531 : vector<2x1x10xf32>
    %533 = math.exp %532 : vector<2x1x10xf32>
    %cst_197 = arith.constant dense<0.000000e+00> : vector<2x1xf32>
    %534 = vector.multi_reduction <add>, %533, %cst_197 [2] : vector<2x1x10xf32> to vector<2x1xf32>
    %535 = vector.shape_cast %534 : vector<2x1xf32> to vector<2x1x1xf32>
    %536 = tpu.reciprocal %535 {approx = true} : vector<2x1x1xf32> -> vector<2x1x1xf32>
    %537 = vector.broadcast %536 : vector<2x1x1xf32> to vector<2x1x10xf32>
    %538 = arith.mulf %533, %537 : vector<2x1x10xf32>
    "tpu.trace_start"() <{level = 10 : i32, message = "bql,blh->bqh"}> : () -> ()
    %cst_198 = arith.constant dense<0.000000e+00> : vector<2x1x32xf32>
    %539 = tpu.matmul %538, %0, %cst_198 {dimension_numbers = #tpu.dot_dimension_numbers<[2], [1], [1], [2], [0, 0, 0, 1, 1, 2], [0], [0]>} : vector<2x1x10xf32>, vector<2x10x32xf32>, vector<2x1x32xf32> -> vector<2x1x32xf32>
    "tpu.trace_stop"() : () -> ()
    %540 = vector.shape_cast %539 : vector<2x1x32xf32> to vector<2x32xf32>
    %cst_199 = arith.constant dense<0.000000e+00> : vector<2x32xf32>
    %541 = tpu.matmul %540, %347, %cst_199 {dimension_numbers = #tpu.dot_dimension_numbers<[1], [0], [0], [1], [0, 0, 1, 1], [], []>} : vector<2x32xf32>, vector<32x32xf32>, vector<2x32xf32> -> vector<2x32xf32>
    %cst_200 = arith.constant dense<0.000000e+00> : vector<2x32xf32>
    %542 = tpu.matmul %525, %348, %cst_200 {dimension_numbers = #tpu.dot_dimension_numbers<[1], [0], [0], [1], [0, 0, 1, 1], [], []>} : vector<2x32xf32>, vector<32x32xf32>, vector<2x32xf32> -> vector<2x32xf32>
    %543 = arith.addf %541, %542 : vector<2x32xf32>
    %544 = math.tanh %543 : vector<2x32xf32>
    %c8_201 = arith.constant 8 : index
    %c0_202 = arith.constant 0 : index
    %545 = vector.load %arg16[%c8_201, %c0_202] : memref<16x32xf32, #tpu.memory_space<vmem>>, vector<2x32xf32>
    tpu.vector_store %arg16[%c8_201, %c0_202], %544 {strides = array<i32>} : memref<16x32xf32, #tpu.memory_space<vmem>>, vector<2x32xf32>,
    %c10_203 = arith.constant 10 : index
    %c0_204 = arith.constant 0 : index
    %546 = vector.load %arg19[%c10_203, %c0_204] : memref<16x128xf32, #tpu.memory_space<vmem>>, vector<2x128xf32>
    %cst_205 = arith.constant dense<0.000000e+00> : vector<2x128xf32>
    %547 = tpu.matmul %544, %346, %cst_205 {dimension_numbers = #tpu.dot_dimension_numbers<[1], [0], [0], [1], [0, 0, 1, 1], [], []>} : vector<2x32xf32>, vector<32x128xf32>, vector<2x128xf32> -> vector<2x128xf32>
    %548 = arith.addf %546, %547 : vector<2x128xf32>
    %549 = vector.extract_strided_slice %548 {offsets = [0, 0], sizes = [2, 96], strides = [1, 1]} : vector<2x128xf32> to vector<2x96xf32>
    %550 = arith.negf %549 : vector<2x96xf32>
    %551 = math.exp %550 : vector<2x96xf32>
    %cst_206 = arith.constant 1.000000e+00 : f32
    %552 = vector.broadcast %cst_206 : f32 to vector<2x96xf32>
    %553 = arith.addf %552, %551 : vector<2x96xf32>
    %554 = arith.divf %552, %553 : vector<2x96xf32>
    %555 = vector.extract_strided_slice %548 {offsets = [0, 96], sizes = [2, 32], strides = [1, 1]} : vector<2x128xf32> to vector<2x32xf32>
    %556 = math.tanh %555 : vector<2x32xf32>
    %557 = vector.extract_strided_slice %554 {offsets = [0, 0], sizes = [2, 32], strides = [1, 1]} : vector<2x96xf32> to vector<2x32xf32>
    %558 = vector.extract_strided_slice %554 {offsets = [0, 32], sizes = [2, 32], strides = [1, 1]} : vector<2x96xf32> to vector<2x32xf32>
    %559 = vector.extract_strided_slice %554 {offsets = [0, 64], sizes = [2, 32], strides = [1, 1]} : vector<2x96xf32> to vector<2x32xf32>
    %560 = arith.mulf %558, %523 : vector<2x32xf32>
    %561 = arith.mulf %557, %556 : vector<2x32xf32>
    %562 = arith.addf %560, %561 : vector<2x32xf32>
    %563 = math.tanh %562 : vector<2x32xf32>
    %564 = arith.mulf %559, %563 : vector<2x32xf32>
    %565 = vector.shape_cast %564 : vector<2x32xf32> to vector<2x1x32xf32>
    "tpu.trace_start"() <{level = 10 : i32, message = "bqh,blh->bql"}> : () -> ()
    %cst_207 = arith.constant dense<0.000000e+00> : vector<2x1x10xf32>
    %566 = tpu.matmul %565, %350, %cst_207 {dimension_numbers = #tpu.dot_dimension_numbers<[2], [2], [1], [1], [0, 0, 0, 1, 1, 1], [0], [0]>} : vector<2x1x32xf32>, vector<2x10x32xf32>, vector<2x1x10xf32> -> vector<2x1x10xf32>
    "tpu.trace_stop"() : () -> ()
    %567 = arith.addf %566, %6 : vector<2x1x10xf32>
    %cst_208 = arith.constant dense<0xFF800000> : vector<2x1xf32>
    %568 = vector.multi_reduction <maximumf>, %567, %cst_208 [2] : vector<2x1x10xf32> to vector<2x1xf32>
    %569 = vector.shape_cast %568 : vector<2x1xf32> to vector<2x1x1xf32>
    %570 = vector.broadcast %569 : vector<2x1x1xf32> to vector<2x1x10xf32>
    %571 = arith.subf %567, %570 : vector<2x1x10xf32>
    %572 = math.exp %571 : vector<2x1x10xf32>
    %cst_209 = arith.constant dense<0.000000e+00> : vector<2x1xf32>
    %573 = vector.multi_reduction <add>, %572, %cst_209 [2] : vector<2x1x10xf32> to vector<2x1xf32>
    %574 = vector.shape_cast %573 : vector<2x1xf32> to vector<2x1x1xf32>
    %575 = tpu.reciprocal %574 {approx = true} : vector<2x1x1xf32> -> vector<2x1x1xf32>
    %576 = vector.broadcast %575 : vector<2x1x1xf32> to vector<2x1x10xf32>
    %577 = arith.mulf %572, %576 : vector<2x1x10xf32>
    "tpu.trace_start"() <{level = 10 : i32, message = "bql,blh->bqh"}> : () -> ()
    %cst_210 = arith.constant dense<0.000000e+00> : vector<2x1x32xf32>
    %578 = tpu.matmul %577, %0, %cst_210 {dimension_numbers = #tpu.dot_dimension_numbers<[2], [1], [1], [2], [0, 0, 0, 1, 1, 2], [0], [0]>} : vector<2x1x10xf32>, vector<2x10x32xf32>, vector<2x1x32xf32> -> vector<2x1x32xf32>
    "tpu.trace_stop"() : () -> ()
    %579 = vector.shape_cast %578 : vector<2x1x32xf32> to vector<2x32xf32>
    %cst_211 = arith.constant dense<0.000000e+00> : vector<2x32xf32>
    %580 = tpu.matmul %579, %347, %cst_211 {dimension_numbers = #tpu.dot_dimension_numbers<[1], [0], [0], [1], [0, 0, 1, 1], [], []>} : vector<2x32xf32>, vector<32x32xf32>, vector<2x32xf32> -> vector<2x32xf32>
    %cst_212 = arith.constant dense<0.000000e+00> : vector<2x32xf32>
    %581 = tpu.matmul %564, %348, %cst_212 {dimension_numbers = #tpu.dot_dimension_numbers<[1], [0], [0], [1], [0, 0, 1, 1], [], []>} : vector<2x32xf32>, vector<32x32xf32>, vector<2x32xf32> -> vector<2x32xf32>
    %582 = arith.addf %580, %581 : vector<2x32xf32>
    %583 = math.tanh %582 : vector<2x32xf32>
    %c10_213 = arith.constant 10 : index
    %c0_214 = arith.constant 0 : index
    %584 = vector.load %arg16[%c10_213, %c0_214] : memref<16x32xf32, #tpu.memory_space<vmem>>, vector<2x32xf32>
    tpu.vector_store %arg16[%c10_213, %c0_214], %583 {strides = array<i32>} : memref<16x32xf32, #tpu.memory_space<vmem>>, vector<2x32xf32>,
    %c12_215 = arith.constant 12 : index
    %c0_216 = arith.constant 0 : index
    %585 = vector.load %arg19[%c12_215, %c0_216] : memref<16x128xf32, #tpu.memory_space<vmem>>, vector<2x128xf32>
    %cst_217 = arith.constant dense<0.000000e+00> : vector<2x128xf32>
    %586 = tpu.matmul %583, %346, %cst_217 {dimension_numbers = #tpu.dot_dimension_numbers<[1], [0], [0], [1], [0, 0, 1, 1], [], []>} : vector<2x32xf32>, vector<32x128xf32>, vector<2x128xf32> -> vector<2x128xf32>
    %587 = arith.addf %585, %586 : vector<2x128xf32>
    %588 = vector.extract_strided_slice %587 {offsets = [0, 0], sizes = [2, 96], strides = [1, 1]} : vector<2x128xf32> to vector<2x96xf32>
    %589 = arith.negf %588 : vector<2x96xf32>
    %590 = math.exp %589 : vector<2x96xf32>
    %cst_218 = arith.constant 1.000000e+00 : f32
    %591 = vector.broadcast %cst_218 : f32 to vector<2x96xf32>
    %592 = arith.addf %591, %590 : vector<2x96xf32>
    %593 = arith.divf %591, %592 : vector<2x96xf32>
    %594 = vector.extract_strided_slice %587 {offsets = [0, 96], sizes = [2, 32], strides = [1, 1]} : vector<2x128xf32> to vector<2x32xf32>
    %595 = math.tanh %594 : vector<2x32xf32>
    %596 = vector.extract_strided_slice %593 {offsets = [0, 0], sizes = [2, 32], strides = [1, 1]} : vector<2x96xf32> to vector<2x32xf32>
    %597 = vector.extract_strided_slice %593 {offsets = [0, 32], sizes = [2, 32], strides = [1, 1]} : vector<2x96xf32> to vector<2x32xf32>
    %598 = vector.extract_strided_slice %593 {offsets = [0, 64], sizes = [2, 32], strides = [1, 1]} : vector<2x96xf32> to vector<2x32xf32>
    %599 = arith.mulf %597, %562 : vector<2x32xf32>
    %600 = arith.mulf %596, %595 : vector<2x32xf32>
    %601 = arith.addf %599, %600 : vector<2x32xf32>
    %602 = math.tanh %601 : vector<2x32xf32>
    %603 = arith.mulf %598, %602 : vector<2x32xf32>
    %604 = vector.shape_cast %603 : vector<2x32xf32> to vector<2x1x32xf32>
    "tpu.trace_start"() <{level = 10 : i32, message = "bqh,blh->bql"}> : () -> ()
    %cst_219 = arith.constant dense<0.000000e+00> : vector<2x1x10xf32>
    %605 = tpu.matmul %604, %350, %cst_219 {dimension_numbers = #tpu.dot_dimension_numbers<[2], [2], [1], [1], [0, 0, 0, 1, 1, 1], [0], [0]>} : vector<2x1x32xf32>, vector<2x10x32xf32>, vector<2x1x10xf32> -> vector<2x1x10xf32>
    "tpu.trace_stop"() : () -> ()
    %606 = arith.addf %605, %6 : vector<2x1x10xf32>
    %cst_220 = arith.constant dense<0xFF800000> : vector<2x1xf32>
    %607 = vector.multi_reduction <maximumf>, %606, %cst_220 [2] : vector<2x1x10xf32> to vector<2x1xf32>
    %608 = vector.shape_cast %607 : vector<2x1xf32> to vector<2x1x1xf32>
    %609 = vector.broadcast %608 : vector<2x1x1xf32> to vector<2x1x10xf32>
    %610 = arith.subf %606, %609 : vector<2x1x10xf32>
    %611 = math.exp %610 : vector<2x1x10xf32>
    %cst_221 = arith.constant dense<0.000000e+00> : vector<2x1xf32>
    %612 = vector.multi_reduction <add>, %611, %cst_221 [2] : vector<2x1x10xf32> to vector<2x1xf32>
    %613 = vector.shape_cast %612 : vector<2x1xf32> to vector<2x1x1xf32>
    %614 = tpu.reciprocal %613 {approx = true} : vector<2x1x1xf32> -> vector<2x1x1xf32>
    %615 = vector.broadcast %614 : vector<2x1x1xf32> to vector<2x1x10xf32>
    %616 = arith.mulf %611, %615 : vector<2x1x10xf32>
    "tpu.trace_start"() <{level = 10 : i32, message = "bql,blh->bqh"}> : () -> ()
    %cst_222 = arith.constant dense<0.000000e+00> : vector<2x1x32xf32>
    %617 = tpu.matmul %616, %0, %cst_222 {dimension_numbers = #tpu.dot_dimension_numbers<[2], [1], [1], [2], [0, 0, 0, 1, 1, 2], [0], [0]>} : vector<2x1x10xf32>, vector<2x10x32xf32>, vector<2x1x32xf32> -> vector<2x1x32xf32>
    "tpu.trace_stop"() : () -> ()
    %618 = vector.shape_cast %617 : vector<2x1x32xf32> to vector<2x32xf32>
    %cst_223 = arith.constant dense<0.000000e+00> : vector<2x32xf32>
    %619 = tpu.matmul %618, %347, %cst_223 {dimension_numbers = #tpu.dot_dimension_numbers<[1], [0], [0], [1], [0, 0, 1, 1], [], []>} : vector<2x32xf32>, vector<32x32xf32>, vector<2x32xf32> -> vector<2x32xf32>
    %cst_224 = arith.constant dense<0.000000e+00> : vector<2x32xf32>
    %620 = tpu.matmul %603, %348, %cst_224 {dimension_numbers = #tpu.dot_dimension_numbers<[1], [0], [0], [1], [0, 0, 1, 1], [], []>} : vector<2x32xf32>, vector<32x32xf32>, vector<2x32xf32> -> vector<2x32xf32>
    %621 = arith.addf %619, %620 : vector<2x32xf32>
    %622 = math.tanh %621 : vector<2x32xf32>
    %c12_225 = arith.constant 12 : index
    %c0_226 = arith.constant 0 : index
    %623 = vector.load %arg16[%c12_225, %c0_226] : memref<16x32xf32, #tpu.memory_space<vmem>>, vector<2x32xf32>
    tpu.vector_store %arg16[%c12_225, %c0_226], %622 {strides = array<i32>} : memref<16x32xf32, #tpu.memory_space<vmem>>, vector<2x32xf32>,
    %c14_227 = arith.constant 14 : index
    %c0_228 = arith.constant 0 : index
    %624 = vector.load %arg19[%c14_227, %c0_228] : memref<16x128xf32, #tpu.memory_space<vmem>>, vector<2x128xf32>
    %cst_229 = arith.constant dense<0.000000e+00> : vector<2x128xf32>
    %625 = tpu.matmul %622, %346, %cst_229 {dimension_numbers = #tpu.dot_dimension_numbers<[1], [0], [0], [1], [0, 0, 1, 1], [], []>} : vector<2x32xf32>, vector<32x128xf32>, vector<2x128xf32> -> vector<2x128xf32>
    %626 = arith.addf %624, %625 : vector<2x128xf32>
    %627 = vector.extract_strided_slice %626 {offsets = [0, 0], sizes = [2, 96], strides = [1, 1]} : vector<2x128xf32> to vector<2x96xf32>
    %628 = arith.negf %627 : vector<2x96xf32>
    %629 = math.exp %628 : vector<2x96xf32>
    %cst_230 = arith.constant 1.000000e+00 : f32
    %630 = vector.broadcast %cst_230 : f32 to vector<2x96xf32>
    %631 = arith.addf %630, %629 : vector<2x96xf32>
    %632 = arith.divf %630, %631 : vector<2x96xf32>
    %633 = vector.extract_strided_slice %626 {offsets = [0, 96], sizes = [2, 32], strides = [1, 1]} : vector<2x128xf32> to vector<2x32xf32>
    %634 = math.tanh %633 : vector<2x32xf32>
    %635 = vector.extract_strided_slice %632 {offsets = [0, 0], sizes = [2, 32], strides = [1, 1]} : vector<2x96xf32> to vector<2x32xf32>
    %636 = vector.extract_strided_slice %632 {offsets = [0, 32], sizes = [2, 32], strides = [1, 1]} : vector<2x96xf32> to vector<2x32xf32>
    %637 = vector.extract_strided_slice %632 {offsets = [0, 64], sizes = [2, 32], strides = [1, 1]} : vector<2x96xf32> to vector<2x32xf32>
    %638 = arith.mulf %636, %601 : vector<2x32xf32>
    %639 = arith.mulf %635, %634 : vector<2x32xf32>
    %640 = arith.addf %638, %639 : vector<2x32xf32>
    %641 = math.tanh %640 : vector<2x32xf32>
    %642 = arith.mulf %637, %641 : vector<2x32xf32>
    %643 = vector.shape_cast %642 : vector<2x32xf32> to vector<2x1x32xf32>
    "tpu.trace_start"() <{level = 10 : i32, message = "bqh,blh->bql"}> : () -> ()
    %cst_231 = arith.constant dense<0.000000e+00> : vector<2x1x10xf32>
    %644 = tpu.matmul %643, %350, %cst_231 {dimension_numbers = #tpu.dot_dimension_numbers<[2], [2], [1], [1], [0, 0, 0, 1, 1, 1], [0], [0]>} : vector<2x1x32xf32>, vector<2x10x32xf32>, vector<2x1x10xf32> -> vector<2x1x10xf32>
    "tpu.trace_stop"() : () -> ()
    %645 = arith.addf %644, %6 : vector<2x1x10xf32>
    %cst_232 = arith.constant dense<0xFF800000> : vector<2x1xf32>
    %646 = vector.multi_reduction <maximumf>, %645, %cst_232 [2] : vector<2x1x10xf32> to vector<2x1xf32>
    %647 = vector.shape_cast %646 : vector<2x1xf32> to vector<2x1x1xf32>
    %648 = vector.broadcast %647 : vector<2x1x1xf32> to vector<2x1x10xf32>
    %649 = arith.subf %645, %648 : vector<2x1x10xf32>
    %650 = math.exp %649 : vector<2x1x10xf32>
    %cst_233 = arith.constant dense<0.000000e+00> : vector<2x1xf32>
    %651 = vector.multi_reduction <add>, %650, %cst_233 [2] : vector<2x1x10xf32> to vector<2x1xf32>
    %652 = vector.shape_cast %651 : vector<2x1xf32> to vector<2x1x1xf32>
    %653 = tpu.reciprocal %652 {approx = true} : vector<2x1x1xf32> -> vector<2x1x1xf32>
    %654 = vector.broadcast %653 : vector<2x1x1xf32> to vector<2x1x10xf32>
    %655 = arith.mulf %650, %654 : vector<2x1x10xf32>
    "tpu.trace_start"() <{level = 10 : i32, message = "bql,blh->bqh"}> : () -> ()
    %cst_234 = arith.constant dense<0.000000e+00> : vector<2x1x32xf32>
    %656 = tpu.matmul %655, %0, %cst_234 {dimension_numbers = #tpu.dot_dimension_numbers<[2], [1], [1], [2], [0, 0, 0, 1, 1, 2], [0], [0]>} : vector<2x1x10xf32>, vector<2x10x32xf32>, vector<2x1x32xf32> -> vector<2x1x32xf32>
    "tpu.trace_stop"() : () -> ()
    %657 = vector.shape_cast %656 : vector<2x1x32xf32> to vector<2x32xf32>
    %cst_235 = arith.constant dense<0.000000e+00> : vector<2x32xf32>
    %658 = tpu.matmul %657, %347, %cst_235 {dimension_numbers = #tpu.dot_dimension_numbers<[1], [0], [0], [1], [0, 0, 1, 1], [], []>} : vector<2x32xf32>, vector<32x32xf32>, vector<2x32xf32> -> vector<2x32xf32>
    %cst_236 = arith.constant dense<0.000000e+00> : vector<2x32xf32>
    %659 = tpu.matmul %642, %348, %cst_236 {dimension_numbers = #tpu.dot_dimension_numbers<[1], [0], [0], [1], [0, 0, 1, 1], [], []>} : vector<2x32xf32>, vector<32x32xf32>, vector<2x32xf32> -> vector<2x32xf32>
    %660 = arith.addf %658, %659 : vector<2x32xf32>
    %661 = math.tanh %660 : vector<2x32xf32>
    %c14_237 = arith.constant 14 : index
    %c0_238 = arith.constant 0 : index
    %662 = vector.load %arg16[%c14_237, %c0_238] : memref<16x32xf32, #tpu.memory_space<vmem>>, vector<2x32xf32>
    tpu.vector_store %arg16[%c14_237, %c0_238], %661 {strides = array<i32>} : memref<16x32xf32, #tpu.memory_space<vmem>>, vector<2x32xf32>,
    %c1_239 = arith.constant 1 : index
    %c0_240 = arith.constant 0 : index
    %c0_241 = arith.constant 0 : index
    %663 = vector.load %arg17[%c1_239, %c0_240, %c0_241] : memref<2x2x32xf32, #tpu.memory_space<vmem>>, vector<1x2x32xf32>
    %664 = vector.shape_cast %663 : vector<1x2x32xf32> to vector<2x32xf32>
    %665 = vector.shape_cast %661 : vector<2x32xf32> to vector<1x2x32xf32>
    tpu.vector_store %arg17[%c1_239, %c0_240, %c0_241], %665 {strides = array<i32>} : memref<2x2x32xf32, #tpu.memory_space<vmem>>, vector<1x2x32xf32>,
    %c1_242 = arith.constant 1 : index
    %c0_243 = arith.constant 0 : index
    %c0_244 = arith.constant 0 : index
    %666 = vector.load %arg18[%c1_242, %c0_243, %c0_244] : memref<2x2x32xf32, #tpu.memory_space<vmem>>, vector<1x2x32xf32>
    %667 = vector.shape_cast %666 : vector<1x2x32xf32> to vector<2x32xf32>
    %668 = vector.shape_cast %640 : vector<2x32xf32> to vector<1x2x32xf32>
    tpu.vector_store %arg18[%c1_242, %c0_243, %c0_244], %668 {strides = array<i32>} : memref<2x2x32xf32, #tpu.memory_space<vmem>>, vector<1x2x32xf32>,
    return
  }
}

</mosaic_0001>

<bundles_post_ra>
// kernel: stacked_attention_lstm.1
= control target key start
LH: loop header
LB: loop body
LE: loop exit
PB: predicated region body
PF: predicated region fallthrough
CT: control target
= control target key end

     0   :  { %s14100_s0 = inlined_call_operand.vmem [shape: f32[16,32], index: 0, kind: input, shape index: {}]   ;;  %s14101_s1 = inlined_call_operand.vmem [shape: f32[2,10,32], index: 1, kind: input, shape index: {}]   ;;  %s14102_s2 = inlined_call_operand.vmem [shape: f32[2,2,10,32], index: 2, kind: input, shape index: {}]   ;;  %s14103_s3 = inlined_call_operand.vmem [shape: f32[2,1,10], index: 3, kind: input, shape index: {}]   ;;  %s14104_s4 = inlined_call_operand.vmem [shape: f32[2,32], index: 4, kind: input, shape index: {}]   ;;  %s14105_s5 = inlined_call_operand.vmem [shape: f32[2,32], index: 5, kind: input, shape index: {}]   ;;  %s14106_s6 = inlined_call_operand.vmem [shape: f32[32,128], index: 6, kind: input, shape index: {}]   ;;  %s14107_s7 = inlined_call_operand.vmem [shape: f32[32,128], index: 7, kind: input, shape index: {}]   ;;  %s14108_s8 = inlined_call_operand.vmem [shape: f32[1,128], index: 8, kind: input, shape index: {}]   ;;  %s14109_s9 = inlined_call_operand.vmem [shape: f32[32,32], index: 9, kind: input, shape index: {}]   ;;  %s14110_s10 = inlined_call_operand.vmem [shape: f32[32,32], index: 10, kind: input, shape index: {}]   ;;  %s14111_s11 = inlined_call_operand.vmem [shape: f32[32,128], index: 11, kind: input, shape index: {}]   ;;  %s14112_s12 = inlined_call_operand.vmem [shape: f32[32,128], index: 12, kind: input, shape index: {}]   ;;  %s14113_s13 = inlined_call_operand.vmem [shape: f32[1,128], index: 13, kind: input, shape index: {}]   ;;  %s14114_s14 = inlined_call_operand.vmem [shape: f32[32,32], index: 14, kind: input, shape index: {}]   ;;  %s14115_s15 = inlined_call_operand.vmem [shape: f32[32,32], index: 15, kind: input, shape index: {}]   ;;  %s14116_s16 = inlined_call_operand.vmem [shape: f32[16,32], index: 16, kind: output, shape index: {0}]   ;;  %s14117_s17 = inlined_call_operand.hbm [shape: f32[2,2,32], index: 17, kind: output, shape index: {1}]   ;;  %s14118_s18 = inlined_call_operand.hbm [shape: f32[2,2,32], index: 18, kind: output, shape index: {2}]  }
   0x1   :  { %14122 = sst [smem:[#allocation10_spill]] %s14100_s0 }
   0x2   :  { %14123 = sst [smem:[#allocation11_spill]] %s14101_s1 }
   0x3   :  { %14124 = sst [smem:[#allocation12_spill]] %s14102_s2 }
   0x4   :  { %24 = vsyncpa [#allocation5], 0  ;;  %v72_v0 = vld [vmem:[%s14106_s6] sm:$0xff]  ;;  %v73_v1 = vld [vmem:[%s14106_s6 + $0x8] sm:$0xff]  ;;  %vm83_vm0 = vcmask 261120   ;;  %s14125_s2 = sld [smem:[#allocation10_spill]] }
   0x5   :  { %v74_v2 = vld [vmem:[%s14106_s6 + $0x10] sm:$0xff]  ;;  %v11626_v3 = vpack.c.bf16 %v73_v1, %v72_v0  ;;  %v75_v4 = vld [vmem:[%s14106_s6 + $0x18] sm:$0xff]  ;;  %v12566_v6 = vmov 0.0|0.0   ;;  %vm12567_vm1 = vmmov 0   ;;  %v12568_v8 = vmov 0.0  }
   0x6   :  { %11640 = vmatprep.subr.bf16.mxu0 %v12566_v6  ;;  %v11630_v7 = vpack.c.bf16 %v75_v4, %v74_v2  ;;  %10654 = vmatprep.mubr.msk.f32.mxu0 %vm12567_vm1, %v12568_v8 }
   0x7   :  { %11627 = vmatprep.subr.bf16.mxu1 %v11626_v3 }
   0xa   :  { %v70_v5 = vld [vmem:[%s14125_s2] sm:$0xff] }
   0xb   :  { %10636 = vmatprep.mubr.msk.f32.mxu1 %vm83_vm0, %v70_v5 }
   0xc   :  { %25 = vsyncpa [#allocation7], 0  ;;  %11629 = vmatpush3.bf16.msra.mxu1 %v11626_v3  ;;  %v167_v9 = vld [vmem:[%s14107_s7] sm:$0xff]  ;;  %v168_v10 = vld [vmem:[%s14107_s7 + $0x8] sm:$0xff]  ;;  %s12569_s21 = smov 32   ;;  %s14126_s6 = sld [smem:[#allocation12_spill]]  ;;  %v290_v48 = vlaneseq }
   0xd   :  { %11631 = vmatprep.subr.bf16.mxu1 %v11630_v7  ;;  %v71_v11 = vld [vmem:[%s14125_s2 + $0x8] sm:$0xff]  ;;  %v12700_v12 = vpack.c.bf16 %v168_v10, %v167_v9  ;;  %v169_v13 = vld [vmem:[%s14107_s7 + $0x10] sm:$0xff]  ;;  %v170_v14 = vld [vmem:[%s14107_s7 + $0x18] sm:$0xff]  ;;  %v12570_v46 = vmov 1966171168   ;;  %s12571_s29 = smov 64  }
   0xe   :  { %v12711_v15 = vpack.c.bf16 %v170_v14, %v169_v13  ;;  %v68_v16 = vld [vmem:[%s14104_s4] sm:$0x3]  ;;  %vm12747_vm2 = vmpackc.low %vm83_vm0, %vm83_vm0  ;;  %v288_v47 = vunpack.c.l.s4 %v12570_v46  ;;  %v291_v50 = vshrl.u32 %v290_v48, 7  ;;  %vm477_vm5 = vcmask 73728   ;;  %s14129_s20 = sld [smem:[#allocation11_spill]]  ;;  %v177_v46 = vld [vmem:[%s14110_s10 + $0x10] sm:$0xff] }
   0xf   :  { %v9950_v17 = vld [vmem:[%s14108_s8] ss:$0 sm:$0xff]  ;;  %v63_v0 = vld [vmem:[%s14103_s3 + $0x1] sm:$0x1]  ;;  %vm504_vm6 = vcmask 1041408   ;;  %vm12572_vm7 = vmmov 1  }
  0x10   :  { %11633 = vmatpush3.bf16.msra.mxu1 %v11630_v7  ;;  %v69_v27 = vld [vmem:[%s14105_s5] sm:$0x3]  ;;  %v289_v49 = vunpack.c.0.s8 %v288_v47  ;;  %v12773_v55 = vsub.s32 0, %v291_v50  ;;  %vm65_vm4 = vcmp.gt.f32.partialorder %v63_v0, 0.5  ;;  %vm12815_vm8 = vmpackc.low %vm504_vm6, %vm12572_vm7  ;;  %vm500_vm9 = vcmask 80896   ;;  %v178_v47 = vld [vmem:[%s14110_s10 + $0x18] sm:$0xff] }
  0x11   :  { %11634 = vmatprep.subr.bf16.mxu1 %v12566_v6  ;;  %v62_v63 = vld [vmem:[%s14103_s3] sm:$0x1]  ;;  %v12797_v3 = vsel %vm65_vm4, -1e+30, %v12568_v8  ;;  %v12855_v48 = vpack.c.bf16 %v178_v47, %v177_v46  ;;  %vm731_vm10 = vcmask 1041409   ;;  %vm806_vm11 = vcmask 254976  }
  0x12   :  { %v179_v38 = vld [vmem:[%s14126_s6] sm:$0xff]  ;;  %v180_v39 = vld [vmem:[%s14126_s6 + $0x8] sm:$0x3]  ;;  %v181_v42 = vld [vmem:[%s14126_s6 + $0x10] sm:$0xff]  ;;  %v12770_v51 = vsub.s32 %v289_v49, %v291_v50  ;;  %vm64_vm3 = vcmp.gt.f32.partialorder %v62_v63, 0.5  ;;  %s12573_s0 = smov 96  }
  0x13   :  { %10637 = vmatmul.mubr.msk.f32.vlgmr.msra.gmra.mrb[0].mxu1 %vm83_vm0, %v71_v11  ;;  %v12751_v41 = vpack.c.bf16 %v180_v39, %v179_v38  ;;  %v182_v43 = vld [vmem:[%s14126_s6 + $0x18] sm:$0x3]  ;;  %v12794_v1 = vsel %vm64_vm3, -1e+30, %v12568_v8  ;;  %v175_v38 = vld [vmem:[%s14110_s10] sm:$0xff]  ;;  %v176_v39 = vld [vmem:[%s14110_s10 + $0x8] sm:$0xff] }
  0x14   :  { %11636 = vmatpush3.bf16.msra.mxu1 %v12700_v12  ;;  %10647 = vmatprep.mubr.msk.f32.mxu1 %vm12567_vm1, %v12568_v8  ;;  %v12759_v45 = vpack.c.bf16 %v182_v43, %v181_v42  ;;  %v12841_v43 = vpack.c.bf16 %v176_v39, %v175_v38  ;;  %v171_v49 = vld [vmem:[%s14109_s9] sm:$0xff]  ;;  %v172_v50 = vld [vmem:[%s14109_s9 + $0x8] sm:$0xff] }
  0x15   :  { %11637 = vmatprep.subr.bf16.mxu1 %v12566_v6  ;;  %11643 = vmatpush3.bf16.xpose.msk.msra.mxu0 %vm12747_vm2, %v12751_v41 }
  0x16   :  { %11648 = vmatprep.subr.bf16.mxu0 %v12566_v6 }
  0x18   :  { %11639 = vmatpush3.bf16.msra.mxu1 %v12711_v15 }
  0x19   :  { %11644 = vmatprep.subr.bf16.mxu1 %v12566_v6 }
  0x1b   :  { %10648 = vmatmul.mubr.msk.f32.vlgmr.msra.gmra.mrb[2].mxu1 %vm83_vm0, %v68_v16 }
  0x1c   :  { %10661 = vmatprep.mubr.msk.f32.mxu1 %vm12567_vm1, %v12568_v8 }
  0x21   :  { %11647 = vmatpush3.bf16.xpose.msk.msra.mxu1 %vm12747_vm2, %v12759_v45 }
  0x22   :  { %11652 = vmatprep.subr.bf16.mxu1 %v12566_v6 }
  0xe6   :  { %v10638_v18 = vpop.f32.mrb[0].mxu1 }
  0xe7   :  { %v162_v19 = vadd.f32 %v10638_v18, %v9950_v17  ;;  %v156_v20 = vpop.f32.mrb[1].mxu1 }
  0xe8   :  { %v157_v21 = vadd.f32 %v9950_v17, %v156_v20 }
  0xe9   :  { %166 = vst [vmem:[#allocation2 + $0x8] sm:$0xff] %v162_v19 }
  0xea   :  { %165 = vst [vmem:[#allocation2] sm:$0xff] %v157_v21 }
  0xee   :  { %v253_v22 = vpop.f32.mrb[2].mxu1 }
  0xef   :  { %v10649_v23 = vpop.f32.mrb[3].mxu1 }
  0xf1   :  { %v183_v24 = vld [vmem:[#allocation2] sm:$0x3] }
  0xf2   :  { %v257_v25 = vadd.f32 %v253_v22, %v183_v24 }
  0xf4   :  { %12229 = vtanh.f32 %v257_v25  ;;  %v9954_v28 = vmul.f32 -1.442695, %v257_v25  ;;  %v60_v25 = vld [vmem:[%s14129_s20 + $0x10] sm:$0xff] }
  0xf6   :  { %12231 = vpow2.f32 %v9954_v28 }
  0xfe   :  { %v12230_v26 = vpop.eup %12229 }
  0xff   :  { %271 = vrot.lane.b32.xlu0 %v12230_v26, %s12569_s21  ;;  %v61_v26 = vld [vmem:[%s14129_s20 + $0x18] sm:$0x3] }
 0x100   :  { %v12232_v29 = vpop.eup %12231 }
 0x101   :  { %v261_v30 = vadd.f32 1.0, %v12232_v29  ;;  %v12819_v29 = vpack.c.bf16 %v61_v26, %v60_v25 }
 0x103   :  { %266 = vrot.lane.b32.xlu0 %v69_v27, %s12569_s21  ;;  %12233 = vrcp.f32 %v261_v30  ;;  %v58_v27 = vld [vmem:[%s14129_s20] sm:$0xff]  ;;  %v59_v30 = vld [vmem:[%s14129_s20 + $0x8] sm:$0x3] }
 0x10d   :  { %v12234_v31 = vpop.eup %12233 }
 0x171   :  { %v272_v32 = vpop.permute.xlu0 %271 }
 0x172   :  { %v274_v33 = vmul.f32 %v12234_v31, %v272_v32 }
 0x174   :  { %276 = vrot.lane.b32.xlu1 %v274_v33, %s12569_s21 }
 0x175   :  { %v12733_v34 = vpop.permute.xlu0 %266 }
 0x176   :  { %v269_v35 = vmul.f32 %v12234_v31, %v12733_v34 }
 0x1e6   :  { %v277_v36 = vpop.permute.xlu1 %276 }
 0x1e7   :  { %v12736_v37 = vadd.f32 %v277_v36, %v269_v35 }
 0x1e9   :  { %12235 = vtanh.f32 %v12736_v37 }
 0x1f3   :  { %v12236_v44 = vpop.eup %12235 }
 0x1f4   :  { %282 = vrot.lane.b32.xlu1 %v12236_v44, %s12569_s21 }
 0x266   :  { %v283_v52 = vpop.permute.xlu1 %282 }
 0x267   :  { %v285_v53 = vmul.f32 %v12234_v31, %v283_v52  ;;  %v12824_v31 = vpack.c.bf16 %v59_v30, %v58_v27  ;;  %v12869_v52 = vpack.c.bf16 %v172_v50, %v171_v49 }
 0x269   :  { %v293_v54 = vrot.slane %v285_v53, %v12770_v51 }
 0x26b   :  { %v294_v56 = vcombine.high %v293_v54, %v293_v54  ;;  %v301_v57 = vrot.slane %v293_v54, %v12770_v51  ;;  %v173_v54 = vld [vmem:[%s14109_s9 + $0x10] sm:$0xff] }
 0x26d   :  { %v312_v58 = vrot.slane %v301_v57, %v12773_v55  ;;  %v308_v59 = vrot.slane %v294_v56, %v12770_v51  ;;  %v174_v56 = vld [vmem:[%s14109_s9 + $0x18] sm:$0xff] }
 0x26e   :  { %v12883_v57 = vpack.c.bf16 %v174_v56, %v173_v54 }
 0x26f   :  { %313 = vrot.lane.b32.xlu1 %v312_v58, %s12571_s29  ;;  %v396_v60 = vrot.slane %v308_v59, %v12773_v55 }
 0x271   :  { %397 = vrot.lane.b32.xlu0 %v396_v60, %s12571_s29 }
 0x2e1   :  { %v314_v61 = vpop.permute.xlu1 %313 }
 0x2e2   :  { %10655 = vmatmul.mubr.msk.f32.vlgmr.msra.gmra.mrb[0].mxu0 %vm83_vm0, %v314_v61 }
 0x2e3   :  { %v398_v62 = vpop.permute.xlu0 %397  ;;  %10668 = vmatprep.mubr.msk.f32.mxu0 %vm12567_vm1, %v12568_v8  ;;  %11651 = vmatpush3.bf16.msk.msra.mxu0 %vm12815_vm8, %v12824_v31 }
 0x2e4   :  { %10662 = vmatmul.mubr.msk.f32.vlgmr.msra.gmra.mrb[4].mxu1 %vm83_vm0, %v398_v62  ;;  %11656 = vmatprep.subr.bf16.mxu0 %v12566_v6 }
 0x2e5   :  { %10675 = vmatprep.mubr.msk.f32.mxu1 %vm12567_vm1, %v12568_v8  ;;  %11655 = vmatpush3.bf16.msk.msra.mxu1 %vm12815_vm8, %v12819_v29 }
 0x2e6   :  { %11668 = vmatprep.subr.bf16.mxu1 %v12566_v6 }
 0x3b5   :  { %v389_v2 = vpop.f32.mrb[0].mxu0 }
 0x3b6   :  { %v390_v4 = vadd.f32 %v389_v2, %v12794_v1  ;;  %v10656_v5 = vpop.f32.mrb[1].mxu0 }
 0x3b7   :  { %v473_v7 = vpop.f32.mrb[4].mxu1  ;;  %v808_v5 = vld [vmem:[#allocation2 + $0x2] sm:$0x3] }
 0x3b8   :  { %v474_v9 = vadd.f32 %v473_v7, %v12797_v3  ;;  %v10663_v10 = vpop.f32.mrb[5].mxu1  ;;  %v478_v11 = vsel %vm477_vm5, %v390_v4, -inf }
 0x3b9   :  { %479 = vmax.xlane.f32.xlu1 %v478_v11 }
 0x3ba   :  { %v481_v13 = vsel %vm477_vm5, %v474_v9, -inf }
 0x3bb   :  { %482 = vmax.xlane.f32.xlu0 %v481_v13 }
 0x3ca   :  { %654 = vrot.lane.b32.xlu1 %v285_v53, %s12571_s29 }
 0x446   :  { %v480_v14 = vpop.xlane.xlu1 %479 }
 0x447   :  { %v484_v16 = vsub.f32 %v390_v4, %v480_v14 }
 0x448   :  { %v483_v17 = vpop.xlane.xlu0 %482 }
 0x449   :  { %v485_v18 = vsub.f32 %v474_v9, %v483_v17  ;;  %v486_v19 = vmul.f32 1.442695, %v484_v16 }
 0x44a   :  { %v655_v53 = vpop.permute.xlu1 %654 }
 0x44b   :  { %v488_v20 = vmul.f32 1.442695, %v485_v18 }
 0x44d   :  { %12237 = vpow2.f32 %v488_v20 }
 0x44e   :  { %12239 = vpow2.f32 %v486_v19 }
 0x457   :  { %v12238_v21 = vpop.eup %12237 }
 0x458   :  { %v493_v22 = vsel %vm477_vm5, %v12238_v21, 0.0  ;;  %v12240_v23 = vpop.eup %12239 }
 0x459   :  { %494 = vadd.xlane.f32.xlu0 %v493_v22  ;;  %v490_v24 = vsel %vm477_vm5, %v12240_v23, 0.0 }
 0x45d   :  { %491 = vadd.xlane.f32.xlu0 %v490_v24 }
 0x4e6   :  { %v495_v32 = vpop.xlane.xlu0 %494 }
 0x4e7   :  { %12241 = vrcp.f32 %v495_v32 }
 0x4ea   :  { %v492_v33 = vpop.xlane.xlu0 %491 }
 0x4eb   :  { %12243 = vrcp.f32 %v492_v33 }
 0x4f1   :  { %v12242_v35 = vpop.eup %12241 }
 0x4f2   :  { %v499_v36 = vmul.f32 %v12242_v35, %v12238_v21 }
 0x4f4   :  { %10676 = vmatmul.mubr.msk.f32.vlgmr.msra.gmra.mrb[6].mxu1 %vm500_vm9, %v499_v36 }
 0x4f5   :  { %v12244_v42 = vpop.eup %12243  ;;  %11670 = vmatpush3.bf16.msra.mxu1 %v12700_v12  ;;  %10708 = vmatprep.mubr.msk.f32.mxu1 %vm12567_vm1, %v12568_v8 }
 0x4f6   :  { %v498_v44 = vmul.f32 %v12244_v42, %v12240_v23  ;;  %11671 = vmatprep.subr.bf16.mxu1 %v12566_v6 }
 0x4f8   :  { %10669 = vmatmul.mubr.msk.f32.vlgmr.msra.gmra.mrb[2].mxu0 %vm500_vm9, %v498_v44 }
 0x4f9   :  { %11658 = vmatpush3.bf16.msra.mxu0 %v12841_v43  ;;  %10686 = vmatprep.mubr.msk.f32.mxu0 %vm12567_vm1, %v12568_v8 }
 0x4fa   :  { %11659 = vmatprep.subr.bf16.mxu0 %v12566_v6  ;;  %11673 = vmatpush3.bf16.msra.mxu1 %v12711_v15 }
 0x4fb   :  { %11674 = vmatprep.subr.bf16.mxu1 %v12566_v6 }
 0x4fd   :  { %11661 = vmatpush3.bf16.msra.mxu0 %v12855_v48 }
 0x4fe   :  { %11662 = vmatprep.subr.bf16.mxu0 %v12566_v6 }
 0x500   :  { %10687 = vmatmul.mubr.msk.f32.vlgmr.msra.gmra.mrb[4].mxu0 %vm83_vm0, %v655_v53 }
 0x501   :  { %11664 = vmatpush3.bf16.msra.mxu0 %v12869_v52  ;;  %10697 = vmatprep.mubr.msk.f32.mxu0 %vm12567_vm1, %v12568_v8 }
 0x502   :  { %11665 = vmatprep.subr.bf16.mxu0 %v12566_v6 }
 0x505   :  { %11667 = vmatpush3.bf16.msra.mxu0 %v12883_v57 }
 0x506   :  { %11678 = vmatprep.subr.bf16.mxu0 %v12566_v6 }
 0x5c7   :  { %v650_v58 = vpop.f32.mrb[6].mxu1 }
 0x5c8   :  { %v10677_v59 = vpop.f32.mrb[7].mxu1  ;;  %v730_v60 = vrot.slane %v650_v58, 7 }
 0x5cb   :  { %v574_v61 = vpop.f32.mrb[2].mxu0 }
 0x5cc   :  { %v732_v62 = vsel %vm731_vm10, %v730_v60, %v574_v61  ;;  %v10670_v63 = vpop.f32.mrb[3].mxu0 }
 0x5cd   :  { %10698 = vmatmul.mubr.msk.f32.vlgmr.msra.gmra.mrb[4].mxu0 %vm83_vm0, %v732_v62 }
 0x5ce   :  { %11681 = vmatpush3.bf16.xpose.msk.msra.mxu0 %vm12747_vm2, %v12759_v45  ;;  %10722 = vmatprep.mubr.msk.f32.mxu0 %vm12567_vm1, %v12568_v8 }
 0x5cf   :  { %11690 = vmatprep.subr.bf16.mxu0 %v12566_v6 }
 0x6a0   :  { %v801_v0 = vpop.f32.mrb[4].mxu0 }
 0x6a1   :  { %12245 = vtanh.f32 %v801_v0  ;;  %v10699_v2 = vpop.f32.mrb[5].mxu0 }
 0x6ab   :  { %v12246_v4 = vpop.eup %12245 }
 0x6ac   :  { %807 = vst.msk [vmem:[#allocation3] sm:$0x3] %vm806_vm11, %v12246_v4  ;;  %10709 = vmatmul.mubr.msk.f32.vlgmr.msra.gmra.mrb[8].mxu1 %vm83_vm0, %v12246_v4 }
 0x6ad   :  { %11677 = vmatpush3.bf16.xpose.msk.msra.mxu1 %vm12747_vm2, %v12751_v41  ;;  %10715 = vmatprep.mubr.msk.f32.mxu1 %vm12567_vm1, %v12568_v8 }
 0x6ae   :  { %11682 = vmatprep.subr.bf16.mxu1 %v12566_v6 }
 0x77f   :  { %v878_v7 = vpop.f32.mrb[8].mxu1 }
 0x780   :  { %v882_v9 = vadd.f32 %v878_v7, %v808_v5  ;;  %v10710_v10 = vpop.f32.mrb[9].mxu1 }
 0x782   :  { %12247 = vtanh.f32 %v882_v9  ;;  %v9968_v13 = vmul.f32 -1.442695, %v882_v9 }
 0x784   :  { %12249 = vpow2.f32 %v9968_v13 }
 0x78c   :  { %v12248_v11 = vpop.eup %12247 }
 0x78d   :  { %892 = vrot.lane.b32.xlu0 %v12248_v11, %s12569_s21 }
 0x78e   :  { %v12250_v14 = vpop.eup %12249 }
 0x78f   :  { %v886_v16 = vadd.f32 1.0, %v12250_v14 }
 0x791   :  { %12251 = vrcp.f32 %v886_v16 }
 0x79b   :  { %v12252_v17 = vpop.eup %12251 }
 0x79c   :  { %v890_v20 = vmul.f32 %v12252_v17, %v12736_v37 }
 0x7ff   :  { %v893_v18 = vpop.permute.xlu0 %892 }
 0x800   :  { %v895_v19 = vmul.f32 %v12252_v17, %v893_v18 }
 0x802   :  { %897 = vrot.lane.b32.xlu1 %v895_v19, %s12569_s21 }
 0x874   :  { %v898_v21 = vpop.permute.xlu1 %897 }
 0x875   :  { %v12906_v22 = vadd.f32 %v898_v21, %v890_v20 }
 0x877   :  { %12253 = vtanh.f32 %v12906_v22 }
 0x881   :  { %v12254_v23 = vpop.eup %12253 }
 0x882   :  { %903 = vrot.lane.b32.xlu1 %v12254_v23, %s12569_s21 }
 0x8f4   :  { %v904_v24 = vpop.permute.xlu1 %903 }
 0x8f5   :  { %v906_v25 = vmul.f32 %v12252_v17, %v904_v24  ;;  %v1406_v24 = vld [vmem:[#allocation2 + $0x4] sm:$0x3] }
 0x8f7   :  { %v914_v26 = vrot.slane %v906_v25, %v12770_v51 }
 0x8f9   :  { %v915_v27 = vcombine.high %v914_v26, %v914_v26  ;;  %v922_v30 = vrot.slane %v914_v26, %v12770_v51 }
 0x8fb   :  { %v933_v32 = vrot.slane %v922_v30, %v12773_v55  ;;  %v929_v33 = vrot.slane %v915_v27, %v12770_v51 }
 0x8fd   :  { %934 = vrot.lane.b32.xlu0 %v933_v32, %s12571_s29  ;;  %v1011_v37 = vrot.slane %v929_v33, %v12773_v55 }
 0x8ff   :  { %1012 = vrot.lane.b32.xlu1 %v1011_v37, %s12571_s29 }
 0x96f   :  { %v935_v35 = vpop.permute.xlu0 %934 }
 0x970   :  { %10716 = vmatmul.mubr.msk.f32.vlgmr.msra.gmra.mrb[10].mxu1 %vm83_vm0, %v935_v35 }
 0x971   :  { %v1013_v36 = vpop.permute.xlu1 %1012  ;;  %11685 = vmatpush3.bf16.msk.msra.mxu1 %vm12815_vm8, %v12824_v31  ;;  %10729 = vmatprep.mubr.msk.f32.mxu1 %vm12567_vm1, %v12568_v8 }
 0x972   :  { %10723 = vmatmul.mubr.msk.f32.vlgmr.msra.gmra.mrb[6].mxu0 %vm83_vm0, %v1013_v36  ;;  %11686 = vmatprep.subr.bf16.mxu1 %v12566_v6 }
 0x973   :  { %11692 = vmatpush3.bf16.msra.mxu0 %v12841_v43  ;;  %10747 = vmatprep.mubr.msk.f32.mxu0 %vm12567_vm1, %v12568_v8 }
 0x974   :  { %11693 = vmatprep.subr.bf16.mxu0 %v12566_v6 }
 0x977   :  { %11695 = vmatpush3.bf16.msra.mxu0 %v12855_v48 }
 0x978   :  { %11696 = vmatprep.subr.bf16.mxu0 %v12566_v6 }
 0xa43   :  { %v1004_v38 = vpop.f32.mrb[10].mxu1 }
 0xa44   :  { %v1005_v39 = vadd.f32 %v1004_v38, %v12794_v1  ;;  %v10717_v42 = vpop.f32.mrb[11].mxu1 }
 0xa45   :  { %v1082_v44 = vpop.f32.mrb[6].mxu0 }
 0xa46   :  { %v1083_v46 = vadd.f32 %v1082_v44, %v12797_v3  ;;  %v10724_v47 = vpop.f32.mrb[7].mxu0  ;;  %v1086_v49 = vsel %vm477_vm5, %v1005_v39, -inf }
 0xa47   :  { %1087 = vmax.xlane.f32.xlu0 %v1086_v49 }
 0xa48   :  { %v1089_v50 = vsel %vm477_vm5, %v1083_v46, -inf }
 0xa49   :  { %1090 = vmax.xlane.f32.xlu1 %v1089_v50 }
 0xa5a   :  { %1254 = vrot.lane.b32.xlu1 %v906_v25, %s12571_s29 }
 0xad4   :  { %v1088_v53 = vpop.xlane.xlu0 %1087 }
 0xad5   :  { %v1092_v54 = vsub.f32 %v1005_v39, %v1088_v53 }
 0xad6   :  { %v1091_v56 = vpop.xlane.xlu1 %1090 }
 0xad7   :  { %v1094_v58 = vmul.f32 1.442695, %v1092_v54  ;;  %v1093_v59 = vsub.f32 %v1083_v46, %v1091_v56 }
 0xad9   :  { %12255 = vpow2.f32 %v1094_v58  ;;  %v1096_v60 = vmul.f32 1.442695, %v1093_v59 }
 0xada   :  { %v1255_v61 = vpop.permute.xlu1 %1254 }
 0xadb   :  { %12257 = vpow2.f32 %v1096_v60  ;;  %10748 = vmatmul.mubr.msk.f32.vlgmr.msra.gmra.mrb[8].mxu0 %vm83_vm0, %v1255_v61 }
 0xadc   :  { %11698 = vmatpush3.bf16.msra.mxu0 %v12869_v52  ;;  %10758 = vmatprep.mubr.msk.f32.mxu0 %vm12567_vm1, %v12568_v8 }
 0xadd   :  { %11699 = vmatprep.subr.bf16.mxu0 %v12566_v6 }
 0xae0   :  { %11701 = vmatpush3.bf16.msra.mxu0 %v12883_v57 }
 0xae1   :  { %11712 = vmatprep.subr.bf16.mxu0 %v12566_v6 }
 0xae3   :  { %v12256_v62 = vpop.eup %12255 }
 0xae4   :  { %v1098_v63 = vsel %vm477_vm5, %v12256_v62, 0.0 }
 0xae5   :  { %v12258_v0 = vpop.eup %12257  ;;  %1099 = vadd.xlane.f32.xlu0 %v1098_v63 }
 0xae6   :  { %v1101_v2 = vsel %vm477_vm5, %v12258_v0, 0.0 }
 0xae9   :  { %1102 = vadd.xlane.f32.xlu0 %v1101_v2 }
 0xb72   :  { %v1100_v4 = vpop.xlane.xlu0 %1099 }
 0xb73   :  { %12259 = vrcp.f32 %v1100_v4 }
 0xb76   :  { %v1103_v5 = vpop.xlane.xlu0 %1102 }
 0xb77   :  { %12261 = vrcp.f32 %v1103_v5 }
 0xb7d   :  { %v12260_v7 = vpop.eup %12259 }
 0xb7e   :  { %v1106_v9 = vmul.f32 %v12260_v7, %v12256_v62 }
 0xb80   :  { %10730 = vmatmul.mubr.msk.f32.vlgmr.msra.gmra.mrb[12].mxu1 %vm500_vm9, %v1106_v9 }
 0xb81   :  { %v12262_v10 = vpop.eup %12261  ;;  %11689 = vmatpush3.bf16.msk.msra.mxu1 %vm12815_vm8, %v12819_v29  ;;  %10736 = vmatprep.mubr.msk.f32.mxu1 %vm12567_vm1, %v12568_v8 }
 0xb82   :  { %v1107_v11 = vmul.f32 %v12262_v10, %v12258_v0  ;;  %11702 = vmatprep.subr.bf16.mxu1 %v12566_v6 }
 0xb84   :  { %10737 = vmatmul.mubr.msk.f32.vlgmr.msra.gmra.mrb[14].mxu1 %vm500_vm9, %v1107_v11 }
 0xb85   :  { %11704 = vmatpush3.bf16.msra.mxu1 %v12700_v12  ;;  %10769 = vmatprep.mubr.msk.f32.mxu1 %vm12567_vm1, %v12568_v8 }
 0xb86   :  { %11705 = vmatprep.subr.bf16.mxu1 %v12566_v6 }
 0xb89   :  { %11707 = vmatpush3.bf16.msra.mxu1 %v12711_v15 }
 0xb8a   :  { %11708 = vmatprep.subr.bf16.mxu1 %v12566_v6 }
 0xc53   :  { %v1177_v13 = vpop.f32.mrb[12].mxu1 }
 0xc54   :  { %v10731_v14 = vpop.f32.mrb[13].mxu1 }
 0xc57   :  { %v1250_v16 = vpop.f32.mrb[14].mxu1 }
 0xc58   :  { %v1330_v17 = vrot.slane %v1250_v16, 7  ;;  %v10738_v18 = vpop.f32.mrb[15].mxu1 }
 0xc5a   :  { %v1331_v19 = vsel %vm731_vm10, %v1330_v17, %v1177_v13 }
 0xc5b   :  { %10759 = vmatmul.mubr.msk.f32.vlgmr.msra.gmra.mrb[8].mxu0 %vm83_vm0, %v1331_v19 }
 0xc5c   :  { %11715 = vmatpush3.bf16.xpose.msk.msra.mxu0 %vm12747_vm2, %v12759_v45  ;;  %10783 = vmatprep.mubr.msk.f32.mxu0 %vm12567_vm1, %v12568_v8 }
 0xc5d   :  { %11724 = vmatprep.subr.bf16.mxu0 %v12566_v6 }
 0xd2e   :  { %v1400_v20 = vpop.f32.mrb[8].mxu0 }
 0xd2f   :  { %12263 = vtanh.f32 %v1400_v20  ;;  %v10760_v21 = vpop.f32.mrb[9].mxu0 }
 0xd39   :  { %v12264_v23 = vpop.eup %12263 }
 0xd3a   :  { %1405 = vst.msk [vmem:[#allocation3 + $0x2] sm:$0x3] %vm806_vm11, %v12264_v23  ;;  %10770 = vmatmul.mubr.msk.f32.vlgmr.msra.gmra.mrb[16].mxu1 %vm83_vm0, %v12264_v23 }
 0xd3b   :  { %11711 = vmatpush3.bf16.xpose.msk.msra.mxu1 %vm12747_vm2, %v12751_v41  ;;  %10776 = vmatprep.mubr.msk.f32.mxu1 %vm12567_vm1, %v12568_v8 }
 0xd3c   :  { %11716 = vmatprep.subr.bf16.mxu1 %v12566_v6 }
 0xe0d   :  { %v1476_v25 = vpop.f32.mrb[16].mxu1 }
 0xe0e   :  { %v1480_v26 = vadd.f32 %v1476_v25, %v1406_v24  ;;  %v10771_v27 = vpop.f32.mrb[17].mxu1 }
 0xe10   :  { %12265 = vtanh.f32 %v1480_v26  ;;  %v9982_v32 = vmul.f32 -1.442695, %v1480_v26 }
 0xe12   :  { %12267 = vpow2.f32 %v9982_v32 }
 0xe1a   :  { %v12266_v30 = vpop.eup %12265 }
 0xe1b   :  { %1490 = vrot.lane.b32.xlu0 %v12266_v30, %s12569_s21 }
 0xe1c   :  { %v12268_v33 = vpop.eup %12267 }
 0xe1d   :  { %v1484_v37 = vadd.f32 1.0, %v12268_v33 }
 0xe1f   :  { %12269 = vrcp.f32 %v1484_v37 }
 0xe29   :  { %v12270_v35 = vpop.eup %12269 }
 0xe2a   :  { %v1488_v39 = vmul.f32 %v12270_v35, %v12906_v22 }
 0xe8d   :  { %v1491_v36 = vpop.permute.xlu0 %1490 }
 0xe8e   :  { %v1493_v38 = vmul.f32 %v12270_v35, %v1491_v36 }
 0xe90   :  { %1495 = vrot.lane.b32.xlu1 %v1493_v38, %s12569_s21 }
 0xf02   :  { %v1496_v42 = vpop.permute.xlu1 %1495 }
 0xf03   :  { %v12978_v44 = vadd.f32 %v1496_v42, %v1488_v39 }
 0xf05   :  { %12271 = vtanh.f32 %v12978_v44 }
 0xf0f   :  { %v12272_v46 = vpop.eup %12271 }
 0xf10   :  { %1501 = vrot.lane.b32.xlu1 %v12272_v46, %s12569_s21 }
 0xf82   :  { %v1502_v47 = vpop.permute.xlu1 %1501 }
 0xf83   :  { %v1504_v49 = vmul.f32 %v12270_v35, %v1502_v47  ;;  %v2004_v47 = vld [vmem:[#allocation2 + $0x6] sm:$0x3] }
 0xf85   :  { %v1512_v50 = vrot.slane %v1504_v49, %v12770_v51 }
 0xf87   :  { %v1513_v53 = vcombine.high %v1512_v50, %v1512_v50  ;;  %v1520_v54 = vrot.slane %v1512_v50, %v12770_v51 }
 0xf89   :  { %v1531_v56 = vrot.slane %v1520_v54, %v12773_v55  ;;  %v1527_v58 = vrot.slane %v1513_v53, %v12770_v51 }
 0xf8b   :  { %1532 = vrot.lane.b32.xlu0 %v1531_v56, %s12571_s29  ;;  %v1609_v22 = vrot.slane %v1527_v58, %v12773_v55 }
 0xf8d   :  { %1610 = vrot.lane.b32.xlu1 %v1609_v22, %s12571_s29 }
 0xffd   :  { %v1533_v59 = vpop.permute.xlu0 %1532 }
 0xffe   :  { %10777 = vmatmul.mubr.msk.f32.vlgmr.msra.gmra.mrb[18].mxu1 %vm83_vm0, %v1533_v59 }
 0xfff   :  { %v1611_v60 = vpop.permute.xlu1 %1610  ;;  %11719 = vmatpush3.bf16.msk.msra.mxu1 %vm12815_vm8, %v12824_v31  ;;  %10790 = vmatprep.mubr.msk.f32.mxu1 %vm12567_vm1, %v12568_v8 }
0x1000   :  { %10784 = vmatmul.mubr.msk.f32.vlgmr.msra.gmra.mrb[10].mxu0 %vm83_vm0, %v1611_v60  ;;  %11720 = vmatprep.subr.bf16.mxu1 %v12566_v6 }
0x1001   :  { %11726 = vmatpush3.bf16.msra.mxu0 %v12841_v43  ;;  %10808 = vmatprep.mubr.msk.f32.mxu0 %vm12567_vm1, %v12568_v8 }
0x1002   :  { %11727 = vmatprep.subr.bf16.mxu0 %v12566_v6 }
0x1005   :  { %11729 = vmatpush3.bf16.msra.mxu0 %v12855_v48 }
0x1006   :  { %11730 = vmatprep.subr.bf16.mxu0 %v12566_v6 }
0x10d1   :  { %v1602_v61 = vpop.f32.mrb[18].mxu1 }
0x10d2   :  { %v1603_v62 = vadd.f32 %v1602_v61, %v12794_v1  ;;  %v10778_v63 = vpop.f32.mrb[19].mxu1 }
0x10d3   :  { %v1680_v0 = vpop.f32.mrb[10].mxu0 }
0x10d4   :  { %v1681_v2 = vadd.f32 %v1680_v0, %v12797_v3  ;;  %v10785_v4 = vpop.f32.mrb[11].mxu0  ;;  %v1684_v5 = vsel %vm477_vm5, %v1603_v62, -inf }
0x10d5   :  { %1685 = vmax.xlane.f32.xlu0 %v1684_v5 }
0x10d6   :  { %v1687_v7 = vsel %vm477_vm5, %v1681_v2, -inf }
0x10d7   :  { %1688 = vmax.xlane.f32.xlu1 %v1687_v7 }
0x10e8   :  { %1852 = vrot.lane.b32.xlu1 %v1504_v49, %s12571_s29 }
0x1162   :  { %v1686_v9 = vpop.xlane.xlu0 %1685 }
0x1163   :  { %v1690_v10 = vsub.f32 %v1603_v62, %v1686_v9 }
0x1164   :  { %v1689_v11 = vpop.xlane.xlu1 %1688 }
0x1165   :  { %v1692_v13 = vmul.f32 1.442695, %v1690_v10  ;;  %v1691_v14 = vsub.f32 %v1681_v2, %v1689_v11 }
0x1167   :  { %12273 = vpow2.f32 %v1692_v13  ;;  %v1694_v16 = vmul.f32 1.442695, %v1691_v14 }
0x1168   :  { %v1853_v17 = vpop.permute.xlu1 %1852 }
0x1169   :  { %12275 = vpow2.f32 %v1694_v16  ;;  %10809 = vmatmul.mubr.msk.f32.vlgmr.msra.gmra.mrb[12].mxu0 %vm83_vm0, %v1853_v17 }
0x116a   :  { %11732 = vmatpush3.bf16.msra.mxu0 %v12869_v52  ;;  %10819 = vmatprep.mubr.msk.f32.mxu0 %vm12567_vm1, %v12568_v8 }
0x116b   :  { %11733 = vmatprep.subr.bf16.mxu0 %v12566_v6 }
0x116e   :  { %11735 = vmatpush3.bf16.msra.mxu0 %v12883_v57 }
0x116f   :  { %11746 = vmatprep.subr.bf16.mxu0 %v12566_v6 }
0x1171   :  { %v12274_v18 = vpop.eup %12273 }
0x1172   :  { %v1696_v19 = vsel %vm477_vm5, %v12274_v18, 0.0 }
0x1173   :  { %v12276_v20 = vpop.eup %12275  ;;  %1697 = vadd.xlane.f32.xlu0 %v1696_v19 }
0x1174   :  { %v1699_v21 = vsel %vm477_vm5, %v12276_v20, 0.0 }
0x1177   :  { %1700 = vadd.xlane.f32.xlu0 %v1699_v21 }
0x1200   :  { %v1698_v23 = vpop.xlane.xlu0 %1697 }
0x1201   :  { %12277 = vrcp.f32 %v1698_v23 }
0x1204   :  { %v1701_v24 = vpop.xlane.xlu0 %1700 }
0x1205   :  { %12279 = vrcp.f32 %v1701_v24 }
0x120b   :  { %v12278_v25 = vpop.eup %12277 }
0x120c   :  { %v1704_v26 = vmul.f32 %v12278_v25, %v12274_v18 }
0x120e   :  { %10791 = vmatmul.mubr.msk.f32.vlgmr.msra.gmra.mrb[20].mxu1 %vm500_vm9, %v1704_v26 }
0x120f   :  { %v12280_v27 = vpop.eup %12279  ;;  %11723 = vmatpush3.bf16.msk.msra.mxu1 %vm12815_vm8, %v12819_v29  ;;  %10797 = vmatprep.mubr.msk.f32.mxu1 %vm12567_vm1, %v12568_v8 }
0x1210   :  { %v1705_v30 = vmul.f32 %v12280_v27, %v12276_v20  ;;  %11736 = vmatprep.subr.bf16.mxu1 %v12566_v6 }
0x1212   :  { %10798 = vmatmul.mubr.msk.f32.vlgmr.msra.gmra.mrb[22].mxu1 %vm500_vm9, %v1705_v30 }
0x1213   :  { %11738 = vmatpush3.bf16.msra.mxu1 %v12700_v12  ;;  %10830 = vmatprep.mubr.msk.f32.mxu1 %vm12567_vm1, %v12568_v8 }
0x1214   :  { %11739 = vmatprep.subr.bf16.mxu1 %v12566_v6 }
0x1217   :  { %11741 = vmatpush3.bf16.msra.mxu1 %v12711_v15 }
0x1218   :  { %11742 = vmatprep.subr.bf16.mxu1 %v12566_v6 }
0x12e1   :  { %v1775_v32 = vpop.f32.mrb[20].mxu1 }
0x12e2   :  { %v10792_v33 = vpop.f32.mrb[21].mxu1 }
0x12e5   :  { %v1848_v37 = vpop.f32.mrb[22].mxu1 }
0x12e6   :  { %v1928_v35 = vrot.slane %v1848_v37, 7  ;;  %v10799_v36 = vpop.f32.mrb[23].mxu1 }
0x12e8   :  { %v1929_v38 = vsel %vm731_vm10, %v1928_v35, %v1775_v32 }
0x12e9   :  { %10820 = vmatmul.mubr.msk.f32.vlgmr.msra.gmra.mrb[12].mxu0 %vm83_vm0, %v1929_v38 }
0x12ea   :  { %11749 = vmatpush3.bf16.xpose.msk.msra.mxu0 %vm12747_vm2, %v12759_v45  ;;  %10844 = vmatprep.mubr.msk.f32.mxu0 %vm12567_vm1, %v12568_v8 }
0x12eb   :  { %11758 = vmatprep.subr.bf16.mxu0 %v12566_v6 }
0x13bc   :  { %v1998_v39 = vpop.f32.mrb[12].mxu0 }
0x13bd   :  { %12281 = vtanh.f32 %v1998_v39  ;;  %v10821_v42 = vpop.f32.mrb[13].mxu0 }
0x13c7   :  { %v12282_v46 = vpop.eup %12281 }
0x13c8   :  { %2003 = vst.msk [vmem:[#allocation3 + $0x4] sm:$0x3] %vm806_vm11, %v12282_v46  ;;  %10831 = vmatmul.mubr.msk.f32.vlgmr.msra.gmra.mrb[24].mxu1 %vm83_vm0, %v12282_v46 }
0x13c9   :  { %11745 = vmatpush3.bf16.xpose.msk.msra.mxu1 %vm12747_vm2, %v12751_v41  ;;  %10837 = vmatprep.mubr.msk.f32.mxu1 %vm12567_vm1, %v12568_v8 }
0x13ca   :  { %11750 = vmatprep.subr.bf16.mxu1 %v12566_v6 }
0x149b   :  { %v2074_v49 = vpop.f32.mrb[24].mxu1 }
0x149c   :  { %v2078_v50 = vadd.f32 %v2074_v49, %v2004_v47  ;;  %v10832_v53 = vpop.f32.mrb[25].mxu1 }
0x149e   :  { %12283 = vtanh.f32 %v2078_v50  ;;  %v9996_v56 = vmul.f32 -1.442695, %v2078_v50 }
0x14a0   :  { %12285 = vpow2.f32 %v9996_v56 }
0x14a8   :  { %v12284_v54 = vpop.eup %12283 }
0x14a9   :  { %2088 = vrot.lane.b32.xlu0 %v12284_v54, %s12569_s21 }
0x14aa   :  { %v12286_v58 = vpop.eup %12285 }
0x14ab   :  { %v2082_v22 = vadd.f32 1.0, %v12286_v58 }
0x14ad   :  { %12287 = vrcp.f32 %v2082_v22 }
0x14b7   :  { %v12288_v59 = vpop.eup %12287 }
0x14b8   :  { %v2086_v62 = vmul.f32 %v12288_v59, %v12978_v44 }
0x151b   :  { %v2089_v60 = vpop.permute.xlu0 %2088 }
0x151c   :  { %v2091_v61 = vmul.f32 %v12288_v59, %v2089_v60 }
0x151e   :  { %2093 = vrot.lane.b32.xlu1 %v2091_v61, %s12569_s21 }
0x1590   :  { %v2094_v63 = vpop.permute.xlu1 %2093 }
0x1591   :  { %v13050_v0 = vadd.f32 %v2094_v63, %v2086_v62 }
0x1593   :  { %12289 = vtanh.f32 %v13050_v0 }
0x159d   :  { %v12290_v2 = vpop.eup %12289 }
0x159e   :  { %2099 = vrot.lane.b32.xlu1 %v12290_v2, %s12569_s21 }
0x1610   :  { %v2100_v4 = vpop.permute.xlu1 %2099 }
0x1611   :  { %v2102_v5 = vmul.f32 %v12288_v59, %v2100_v4  ;;  %v2602_v4 = vld [vmem:[#allocation2 + $0x8] sm:$0x3] }
0x1613   :  { %v2110_v7 = vrot.slane %v2102_v5, %v12770_v51 }
0x1615   :  { %v2111_v9 = vcombine.high %v2110_v7, %v2110_v7  ;;  %v2118_v10 = vrot.slane %v2110_v7, %v12770_v51 }
0x1617   :  { %v2129_v11 = vrot.slane %v2118_v10, %v12773_v55  ;;  %v2125_v13 = vrot.slane %v2111_v9, %v12770_v51 }
0x1619   :  { %2130 = vrot.lane.b32.xlu0 %v2129_v11, %s12571_s29  ;;  %v2207_v44 = vrot.slane %v2125_v13, %v12773_v55 }
0x161b   :  { %2208 = vrot.lane.b32.xlu1 %v2207_v44, %s12571_s29 }
0x168b   :  { %v2131_v14 = vpop.permute.xlu0 %2130 }
0x168c   :  { %10838 = vmatmul.mubr.msk.f32.vlgmr.msra.gmra.mrb[26].mxu1 %vm83_vm0, %v2131_v14 }
0x168d   :  { %v2209_v16 = vpop.permute.xlu1 %2208  ;;  %11753 = vmatpush3.bf16.msk.msra.mxu1 %vm12815_vm8, %v12824_v31  ;;  %10851 = vmatprep.mubr.msk.f32.mxu1 %vm12567_vm1, %v12568_v8 }
0x168e   :  { %10845 = vmatmul.mubr.msk.f32.vlgmr.msra.gmra.mrb[14].mxu0 %vm83_vm0, %v2209_v16  ;;  %11754 = vmatprep.subr.bf16.mxu1 %v12566_v6 }
0x168f   :  { %11760 = vmatpush3.bf16.msra.mxu0 %v12841_v43  ;;  %10869 = vmatprep.mubr.msk.f32.mxu0 %vm12567_vm1, %v12568_v8 }
0x1690   :  { %11761 = vmatprep.subr.bf16.mxu0 %v12566_v6 }
0x1693   :  { %11763 = vmatpush3.bf16.msra.mxu0 %v12855_v48 }
0x1694   :  { %11764 = vmatprep.subr.bf16.mxu0 %v12566_v6 }
0x175f   :  { %v2200_v17 = vpop.f32.mrb[26].mxu1 }
0x1760   :  { %v2201_v18 = vadd.f32 %v2200_v17, %v12794_v1  ;;  %v10839_v19 = vpop.f32.mrb[27].mxu1 }
0x1761   :  { %v2278_v20 = vpop.f32.mrb[14].mxu0 }
0x1762   :  { %v2279_v21 = vadd.f32 %v2278_v20, %v12797_v3  ;;  %v10846_v23 = vpop.f32.mrb[15].mxu0  ;;  %v2282_v24 = vsel %vm477_vm5, %v2201_v18, -inf }
0x1763   :  { %2283 = vmax.xlane.f32.xlu0 %v2282_v24 }
0x1764   :  { %v2285_v25 = vsel %vm477_vm5, %v2279_v21, -inf }
0x1765   :  { %2286 = vmax.xlane.f32.xlu1 %v2285_v25 }
0x1776   :  { %2450 = vrot.lane.b32.xlu1 %v2102_v5, %s12571_s29 }
0x17f0   :  { %v2284_v26 = vpop.xlane.xlu0 %2283 }
0x17f1   :  { %v2288_v27 = vsub.f32 %v2201_v18, %v2284_v26 }
0x17f2   :  { %v2287_v30 = vpop.xlane.xlu1 %2286 }
0x17f3   :  { %v2290_v32 = vmul.f32 1.442695, %v2288_v27  ;;  %v2289_v33 = vsub.f32 %v2279_v21, %v2287_v30 }
0x17f5   :  { %12291 = vpow2.f32 %v2290_v32  ;;  %v2292_v37 = vmul.f32 1.442695, %v2289_v33 }
0x17f6   :  { %v2451_v35 = vpop.permute.xlu1 %2450 }
0x17f7   :  { %12293 = vpow2.f32 %v2292_v37  ;;  %10870 = vmatmul.mubr.msk.f32.vlgmr.msra.gmra.mrb[16].mxu0 %vm83_vm0, %v2451_v35 }
0x17f8   :  { %11766 = vmatpush3.bf16.msra.mxu0 %v12869_v52  ;;  %10880 = vmatprep.mubr.msk.f32.mxu0 %vm12567_vm1, %v12568_v8 }
0x17f9   :  { %11767 = vmatprep.subr.bf16.mxu0 %v12566_v6 }
0x17fc   :  { %11769 = vmatpush3.bf16.msra.mxu0 %v12883_v57 }
0x17fd   :  { %11780 = vmatprep.subr.bf16.mxu0 %v12566_v6 }
0x17ff   :  { %v12292_v36 = vpop.eup %12291 }
0x1800   :  { %v2294_v38 = vsel %vm477_vm5, %v12292_v36, 0.0 }
0x1801   :  { %v12294_v39 = vpop.eup %12293  ;;  %2295 = vadd.xlane.f32.xlu0 %v2294_v38 }
0x1802   :  { %v2297_v42 = vsel %vm477_vm5, %v12294_v39, 0.0 }
0x1805   :  { %2298 = vadd.xlane.f32.xlu0 %v2297_v42 }
0x188e   :  { %v2296_v46 = vpop.xlane.xlu0 %2295 }
0x188f   :  { %12295 = vrcp.f32 %v2296_v46 }
0x1892   :  { %v2299_v47 = vpop.xlane.xlu0 %2298 }
0x1893   :  { %12297 = vrcp.f32 %v2299_v47 }
0x1899   :  { %v12296_v49 = vpop.eup %12295 }
0x189a   :  { %v2302_v50 = vmul.f32 %v12296_v49, %v12292_v36 }
0x189c   :  { %10852 = vmatmul.mubr.msk.f32.vlgmr.msra.gmra.mrb[28].mxu1 %vm500_vm9, %v2302_v50 }
0x189d   :  { %v12298_v53 = vpop.eup %12297  ;;  %11757 = vmatpush3.bf16.msk.msra.mxu1 %vm12815_vm8, %v12819_v29  ;;  %10858 = vmatprep.mubr.msk.f32.mxu1 %vm12567_vm1, %v12568_v8 }
0x189e   :  { %v2303_v54 = vmul.f32 %v12298_v53, %v12294_v39  ;;  %11770 = vmatprep.subr.bf16.mxu1 %v12566_v6 }
0x18a0   :  { %10859 = vmatmul.mubr.msk.f32.vlgmr.msra.gmra.mrb[30].mxu1 %vm500_vm9, %v2303_v54 }
0x18a1   :  { %11772 = vmatpush3.bf16.msra.mxu1 %v12700_v12  ;;  %10891 = vmatprep.mubr.msk.f32.mxu1 %vm12567_vm1, %v12568_v8 }
0x18a2   :  { %11773 = vmatprep.subr.bf16.mxu1 %v12566_v6 }
0x18a5   :  { %11775 = vmatpush3.bf16.msra.mxu1 %v12711_v15 }
0x18a6   :  { %11776 = vmatprep.subr.bf16.mxu1 %v12566_v6 }
0x196f   :  { %v2373_v56 = vpop.f32.mrb[28].mxu1 }
0x1970   :  { %v10853_v58 = vpop.f32.mrb[29].mxu1 }
0x1973   :  { %v2446_v22 = vpop.f32.mrb[30].mxu1 }
0x1974   :  { %v2526_v59 = vrot.slane %v2446_v22, 7  ;;  %v10860_v60 = vpop.f32.mrb[31].mxu1 }
0x1976   :  { %v2527_v61 = vsel %vm731_vm10, %v2526_v59, %v2373_v56 }
0x1977   :  { %10881 = vmatmul.mubr.msk.f32.vlgmr.msra.gmra.mrb[16].mxu0 %vm83_vm0, %v2527_v61 }
0x1978   :  { %11783 = vmatpush3.bf16.xpose.msk.msra.mxu0 %vm12747_vm2, %v12759_v45  ;;  %10905 = vmatprep.mubr.msk.f32.mxu0 %vm12567_vm1, %v12568_v8 }
0x1979   :  { %11792 = vmatprep.subr.bf16.mxu0 %v12566_v6 }
0x1a4a   :  { %v2596_v62 = vpop.f32.mrb[16].mxu0 }
0x1a4b   :  { %12299 = vtanh.f32 %v2596_v62  ;;  %v10882_v63 = vpop.f32.mrb[17].mxu0 }
0x1a55   :  { %v12300_v2 = vpop.eup %12299 }
0x1a56   :  { %2601 = vst.msk [vmem:[#allocation3 + $0x6] sm:$0x3] %vm806_vm11, %v12300_v2  ;;  %10892 = vmatmul.mubr.msk.f32.vlgmr.msra.gmra.mrb[32].mxu1 %vm83_vm0, %v12300_v2 }
0x1a57   :  { %11779 = vmatpush3.bf16.xpose.msk.msra.mxu1 %vm12747_vm2, %v12751_v41  ;;  %10898 = vmatprep.mubr.msk.f32.mxu1 %vm12567_vm1, %v12568_v8 }
0x1a58   :  { %11784 = vmatprep.subr.bf16.mxu1 %v12566_v6 }
0x1b29   :  { %v2672_v5 = vpop.f32.mrb[32].mxu1 }
0x1b2a   :  { %v2676_v7 = vadd.f32 %v2672_v5, %v2602_v4  ;;  %v10893_v9 = vpop.f32.mrb[33].mxu1 }
0x1b2c   :  { %12301 = vtanh.f32 %v2676_v7  ;;  %v10010_v11 = vmul.f32 -1.442695, %v2676_v7 }
0x1b2e   :  { %12303 = vpow2.f32 %v10010_v11 }
0x1b36   :  { %v12302_v10 = vpop.eup %12301 }
0x1b37   :  { %2686 = vrot.lane.b32.xlu0 %v12302_v10, %s12569_s21 }
0x1b38   :  { %v12304_v13 = vpop.eup %12303 }
0x1b39   :  { %v2680_v44 = vadd.f32 1.0, %v12304_v13 }
0x1b3b   :  { %12305 = vrcp.f32 %v2680_v44 }
0x1b45   :  { %v12306_v14 = vpop.eup %12305 }
0x1b46   :  { %v2684_v18 = vmul.f32 %v12306_v14, %v13050_v0 }
0x1ba9   :  { %v2687_v16 = vpop.permute.xlu0 %2686 }
0x1baa   :  { %v2689_v17 = vmul.f32 %v12306_v14, %v2687_v16 }
0x1bac   :  { %2691 = vrot.lane.b32.xlu1 %v2689_v17, %s12569_s21 }
0x1c1e   :  { %v2692_v19 = vpop.permute.xlu1 %2691 }
0x1c1f   :  { %v13122_v20 = vadd.f32 %v2692_v19, %v2684_v18 }
0x1c21   :  { %12307 = vtanh.f32 %v13122_v20 }
0x1c2b   :  { %v12308_v21 = vpop.eup %12307 }
0x1c2c   :  { %2697 = vrot.lane.b32.xlu1 %v12308_v21, %s12569_s21 }
0x1c9e   :  { %v2698_v23 = vpop.permute.xlu1 %2697 }
0x1c9f   :  { %v2700_v24 = vmul.f32 %v12306_v14, %v2698_v23  ;;  %v3200_v23 = vld [vmem:[#allocation2 + $0xa] sm:$0x3] }
0x1ca1   :  { %v2708_v25 = vrot.slane %v2700_v24, %v12770_v51 }
0x1ca3   :  { %v2709_v26 = vcombine.high %v2708_v25, %v2708_v25  ;;  %v2716_v27 = vrot.slane %v2708_v25, %v12770_v51 }
0x1ca5   :  { %v2727_v30 = vrot.slane %v2716_v27, %v12773_v55  ;;  %v2723_v32 = vrot.slane %v2709_v26, %v12770_v51 }
0x1ca7   :  { %2728 = vrot.lane.b32.xlu0 %v2727_v30, %s12571_s29  ;;  %v2805_v0 = vrot.slane %v2723_v32, %v12773_v55 }
0x1ca9   :  { %2806 = vrot.lane.b32.xlu1 %v2805_v0, %s12571_s29 }
0x1d19   :  { %v2729_v33 = vpop.permute.xlu0 %2728 }
0x1d1a   :  { %10899 = vmatmul.mubr.msk.f32.vlgmr.msra.gmra.mrb[34].mxu1 %vm83_vm0, %v2729_v33 }
0x1d1b   :  { %v2807_v37 = vpop.permute.xlu1 %2806  ;;  %11787 = vmatpush3.bf16.msk.msra.mxu1 %vm12815_vm8, %v12824_v31  ;;  %10912 = vmatprep.mubr.msk.f32.mxu1 %vm12567_vm1, %v12568_v8 }
0x1d1c   :  { %10906 = vmatmul.mubr.msk.f32.vlgmr.msra.gmra.mrb[18].mxu0 %vm83_vm0, %v2807_v37  ;;  %11788 = vmatprep.subr.bf16.mxu1 %v12566_v6 }
0x1d1d   :  { %11794 = vmatpush3.bf16.msra.mxu0 %v12841_v43  ;;  %10930 = vmatprep.mubr.msk.f32.mxu0 %vm12567_vm1, %v12568_v8 }
0x1d1e   :  { %11795 = vmatprep.subr.bf16.mxu0 %v12566_v6 }
0x1d21   :  { %11797 = vmatpush3.bf16.msra.mxu0 %v12855_v48 }
0x1d22   :  { %11798 = vmatprep.subr.bf16.mxu0 %v12566_v6 }
0x1ded   :  { %v2798_v35 = vpop.f32.mrb[34].mxu1 }
0x1dee   :  { %v2799_v36 = vadd.f32 %v2798_v35, %v12794_v1  ;;  %v10900_v38 = vpop.f32.mrb[35].mxu1 }
0x1def   :  { %v2876_v39 = vpop.f32.mrb[18].mxu0 }
0x1df0   :  { %v2877_v42 = vadd.f32 %v2876_v39, %v12797_v3  ;;  %v10907_v46 = vpop.f32.mrb[19].mxu0  ;;  %v2880_v47 = vsel %vm477_vm5, %v2799_v36, -inf }
0x1df1   :  { %2881 = vmax.xlane.f32.xlu0 %v2880_v47 }
0x1df2   :  { %v2883_v49 = vsel %vm477_vm5, %v2877_v42, -inf }
0x1df3   :  { %2884 = vmax.xlane.f32.xlu1 %v2883_v49 }
0x1e04   :  { %3048 = vrot.lane.b32.xlu1 %v2700_v24, %s12571_s29 }
0x1e7e   :  { %v2882_v50 = vpop.xlane.xlu0 %2881 }
0x1e7f   :  { %v2886_v53 = vsub.f32 %v2799_v36, %v2882_v50 }
0x1e80   :  { %v2885_v54 = vpop.xlane.xlu1 %2884 }
0x1e81   :  { %v2888_v56 = vmul.f32 1.442695, %v2886_v53  ;;  %v2887_v58 = vsub.f32 %v2877_v42, %v2885_v54 }
0x1e83   :  { %12309 = vpow2.f32 %v2888_v56  ;;  %v2890_v22 = vmul.f32 1.442695, %v2887_v58 }
0x1e84   :  { %v3049_v59 = vpop.permute.xlu1 %3048 }
0x1e85   :  { %12311 = vpow2.f32 %v2890_v22  ;;  %10931 = vmatmul.mubr.msk.f32.vlgmr.msra.gmra.mrb[20].mxu0 %vm83_vm0, %v3049_v59 }
0x1e86   :  { %11800 = vmatpush3.bf16.msra.mxu0 %v12869_v52  ;;  %10941 = vmatprep.mubr.msk.f32.mxu0 %vm12567_vm1, %v12568_v8 }
0x1e87   :  { %11801 = vmatprep.subr.bf16.mxu0 %v12566_v6 }
0x1e8a   :  { %11803 = vmatpush3.bf16.msra.mxu0 %v12883_v57 }
0x1e8b   :  { %11814 = vmatprep.subr.bf16.mxu0 %v12566_v6 }
0x1e8d   :  { %v12310_v60 = vpop.eup %12309 }
0x1e8e   :  { %v2892_v61 = vsel %vm477_vm5, %v12310_v60, 0.0 }
0x1e8f   :  { %v12312_v62 = vpop.eup %12311  ;;  %2893 = vadd.xlane.f32.xlu0 %v2892_v61 }
0x1e90   :  { %v2895_v63 = vsel %vm477_vm5, %v12312_v62, 0.0 }
0x1e93   :  { %2896 = vadd.xlane.f32.xlu0 %v2895_v63 }
0x1f1c   :  { %v2894_v2 = vpop.xlane.xlu0 %2893 }
0x1f1d   :  { %12313 = vrcp.f32 %v2894_v2 }
0x1f20   :  { %v2897_v4 = vpop.xlane.xlu0 %2896 }
0x1f21   :  { %12315 = vrcp.f32 %v2897_v4 }
0x1f27   :  { %v12314_v5 = vpop.eup %12313 }
0x1f28   :  { %v2900_v7 = vmul.f32 %v12314_v5, %v12310_v60 }
0x1f2a   :  { %10913 = vmatmul.mubr.msk.f32.vlgmr.msra.gmra.mrb[36].mxu1 %vm500_vm9, %v2900_v7 }
0x1f2b   :  { %v12316_v9 = vpop.eup %12315  ;;  %11791 = vmatpush3.bf16.msk.msra.mxu1 %vm12815_vm8, %v12819_v29  ;;  %10919 = vmatprep.mubr.msk.f32.mxu1 %vm12567_vm1, %v12568_v8 }
0x1f2c   :  { %v2901_v10 = vmul.f32 %v12316_v9, %v12312_v62  ;;  %11804 = vmatprep.subr.bf16.mxu1 %v12566_v6 }
0x1f2e   :  { %10920 = vmatmul.mubr.msk.f32.vlgmr.msra.gmra.mrb[38].mxu1 %vm500_vm9, %v2901_v10 }
0x1f2f   :  { %11806 = vmatpush3.bf16.msra.mxu1 %v12700_v12  ;;  %10952 = vmatprep.mubr.msk.f32.mxu1 %vm12567_vm1, %v12568_v8 }
0x1f30   :  { %11807 = vmatprep.subr.bf16.mxu1 %v12566_v6 }
0x1f33   :  { %11809 = vmatpush3.bf16.msra.mxu1 %v12711_v15 }
0x1f34   :  { %11810 = vmatprep.subr.bf16.mxu1 %v12566_v6 }
0x1ffd   :  { %v2971_v11 = vpop.f32.mrb[36].mxu1 }
0x1ffe   :  { %v10914_v13 = vpop.f32.mrb[37].mxu1 }
0x2001   :  { %v3044_v44 = vpop.f32.mrb[38].mxu1 }
0x2002   :  { %v3124_v14 = vrot.slane %v3044_v44, 7  ;;  %v10921_v16 = vpop.f32.mrb[39].mxu1 }
0x2004   :  { %v3125_v17 = vsel %vm731_vm10, %v3124_v14, %v2971_v11 }
0x2005   :  { %10942 = vmatmul.mubr.msk.f32.vlgmr.msra.gmra.mrb[20].mxu0 %vm83_vm0, %v3125_v17 }
0x2006   :  { %11817 = vmatpush3.bf16.xpose.msk.msra.mxu0 %vm12747_vm2, %v12759_v45  ;;  %10966 = vmatprep.mubr.msk.f32.mxu0 %vm12567_vm1, %v12568_v8 }
0x2007   :  { %11826 = vmatprep.subr.bf16.mxu0 %v12566_v6 }
0x20d8   :  { %v3194_v18 = vpop.f32.mrb[20].mxu0 }
0x20d9   :  { %12317 = vtanh.f32 %v3194_v18  ;;  %v10943_v19 = vpop.f32.mrb[21].mxu0 }
0x20e3   :  { %v12318_v21 = vpop.eup %12317 }
0x20e4   :  { %3199 = vst.msk [vmem:[#allocation3 + $0x8] sm:$0x3] %vm806_vm11, %v12318_v21  ;;  %10953 = vmatmul.mubr.msk.f32.vlgmr.msra.gmra.mrb[40].mxu1 %vm83_vm0, %v12318_v21 }
0x20e5   :  { %11813 = vmatpush3.bf16.xpose.msk.msra.mxu1 %vm12747_vm2, %v12751_v41  ;;  %10959 = vmatprep.mubr.msk.f32.mxu1 %vm12567_vm1, %v12568_v8 }
0x20e6   :  { %11818 = vmatprep.subr.bf16.mxu1 %v12566_v6 }
0x21b7   :  { %v3270_v24 = vpop.f32.mrb[40].mxu1 }
0x21b8   :  { %v3274_v25 = vadd.f32 %v3270_v24, %v3200_v23  ;;  %v10954_v26 = vpop.f32.mrb[41].mxu1 }
0x21ba   :  { %12319 = vtanh.f32 %v3274_v25  ;;  %v10024_v30 = vmul.f32 -1.442695, %v3274_v25 }
0x21bc   :  { %12321 = vpow2.f32 %v10024_v30 }
0x21c4   :  { %v12320_v27 = vpop.eup %12319 }
0x21c5   :  { %3284 = vrot.lane.b32.xlu0 %v12320_v27, %s12569_s21 }
0x21c6   :  { %v12322_v32 = vpop.eup %12321 }
0x21c7   :  { %v3278_v0 = vadd.f32 1.0, %v12322_v32 }
0x21c9   :  { %12323 = vrcp.f32 %v3278_v0 }
0x21d3   :  { %v12324_v33 = vpop.eup %12323 }
0x21d4   :  { %v3282_v36 = vmul.f32 %v12324_v33, %v13122_v20 }
0x2237   :  { %v3285_v37 = vpop.permute.xlu0 %3284 }
0x2238   :  { %v3287_v35 = vmul.f32 %v12324_v33, %v3285_v37 }
0x223a   :  { %3289 = vrot.lane.b32.xlu1 %v3287_v35, %s12569_s21 }
0x22ac   :  { %v3290_v38 = vpop.permute.xlu1 %3289 }
0x22ad   :  { %v13194_v39 = vadd.f32 %v3290_v38, %v3282_v36 }
0x22af   :  { %12325 = vtanh.f32 %v13194_v39 }
0x22b9   :  { %v12326_v42 = vpop.eup %12325 }
0x22ba   :  { %3295 = vrot.lane.b32.xlu1 %v12326_v42, %s12569_s21 }
0x232c   :  { %v3296_v46 = vpop.permute.xlu1 %3295 }
0x232d   :  { %v3298_v47 = vmul.f32 %v12324_v33, %v3296_v46  ;;  %v3798_v46 = vld [vmem:[#allocation2 + $0xc] sm:$0x3] }
0x232f   :  { %v3306_v49 = vrot.slane %v3298_v47, %v12770_v51 }
0x2331   :  { %v3307_v50 = vcombine.high %v3306_v49, %v3306_v49  ;;  %v3314_v53 = vrot.slane %v3306_v49, %v12770_v51 }
0x2333   :  { %v3325_v54 = vrot.slane %v3314_v53, %v12773_v55  ;;  %v3321_v56 = vrot.slane %v3307_v50, %v12770_v51 }
0x2335   :  { %3326 = vrot.lane.b32.xlu0 %v3325_v54, %s12571_s29  ;;  %v3403_v20 = vrot.slane %v3321_v56, %v12773_v55 }
0x2337   :  { %3404 = vrot.lane.b32.xlu1 %v3403_v20, %s12571_s29 }
0x23a7   :  { %v3327_v58 = vpop.permute.xlu0 %3326 }
0x23a8   :  { %10960 = vmatmul.mubr.msk.f32.vlgmr.msra.gmra.mrb[42].mxu1 %vm83_vm0, %v3327_v58 }
0x23a9   :  { %v3405_v22 = vpop.permute.xlu1 %3404  ;;  %11821 = vmatpush3.bf16.msk.msra.mxu1 %vm12815_vm8, %v12824_v31  ;;  %10973 = vmatprep.mubr.msk.f32.mxu1 %vm12567_vm1, %v12568_v8 }
0x23aa   :  { %10967 = vmatmul.mubr.msk.f32.vlgmr.msra.gmra.mrb[22].mxu0 %vm83_vm0, %v3405_v22  ;;  %11822 = vmatprep.subr.bf16.mxu1 %v12566_v6 }
0x23ab   :  { %11828 = vmatpush3.bf16.msra.mxu0 %v12841_v43  ;;  %10991 = vmatprep.mubr.msk.f32.mxu0 %vm12567_vm1, %v12568_v8 }
0x23ac   :  { %11829 = vmatprep.subr.bf16.mxu0 %v12566_v6 }
0x23af   :  { %11831 = vmatpush3.bf16.msra.mxu0 %v12855_v48 }
0x23b0   :  { %11832 = vmatprep.subr.bf16.mxu0 %v12566_v6 }
0x247b   :  { %v3396_v59 = vpop.f32.mrb[42].mxu1 }
0x247c   :  { %v3397_v60 = vadd.f32 %v3396_v59, %v12794_v1  ;;  %v10961_v61 = vpop.f32.mrb[43].mxu1 }
0x247d   :  { %v3474_v62 = vpop.f32.mrb[22].mxu0 }
0x247e   :  { %v3475_v63 = vadd.f32 %v3474_v62, %v12797_v3  ;;  %v10968_v2 = vpop.f32.mrb[23].mxu0  ;;  %v3478_v4 = vsel %vm477_vm5, %v3397_v60, -inf }
0x247f   :  { %3479 = vmax.xlane.f32.xlu0 %v3478_v4 }
0x2480   :  { %v3481_v5 = vsel %vm477_vm5, %v3475_v63, -inf }
0x2481   :  { %3482 = vmax.xlane.f32.xlu1 %v3481_v5 }
0x2492   :  { %3646 = vrot.lane.b32.xlu1 %v3298_v47, %s12571_s29 }
0x250c   :  { %v3480_v7 = vpop.xlane.xlu0 %3479 }
0x250d   :  { %v3484_v9 = vsub.f32 %v3397_v60, %v3480_v7 }
0x250e   :  { %v3483_v10 = vpop.xlane.xlu1 %3482 }
0x250f   :  { %v3486_v11 = vmul.f32 1.442695, %v3484_v9  ;;  %v3485_v13 = vsub.f32 %v3475_v63, %v3483_v10 }
0x2511   :  { %12327 = vpow2.f32 %v3486_v11  ;;  %v3488_v44 = vmul.f32 1.442695, %v3485_v13 }
0x2512   :  { %v3647_v14 = vpop.permute.xlu1 %3646 }
0x2513   :  { %12329 = vpow2.f32 %v3488_v44  ;;  %10992 = vmatmul.mubr.msk.f32.vlgmr.msra.gmra.mrb[24].mxu0 %vm83_vm0, %v3647_v14 }
0x2514   :  { %11834 = vmatpush3.bf16.msra.mxu0 %v12869_v52  ;;  %11002 = vmatprep.mubr.msk.f32.mxu0 %vm12567_vm1, %v12568_v8 }
0x2515   :  { %11835 = vmatprep.subr.bf16.mxu0 %v12566_v6 }
0x2518   :  { %11837 = vmatpush3.bf16.msra.mxu0 %v12883_v57 }
0x2519   :  { %11848 = vmatprep.subr.bf16.mxu0 %v12566_v6 }
0x251b   :  { %v12328_v16 = vpop.eup %12327 }
0x251c   :  { %v3490_v17 = vsel %vm477_vm5, %v12328_v16, 0.0 }
0x251d   :  { %v12330_v18 = vpop.eup %12329  ;;  %3491 = vadd.xlane.f32.xlu0 %v3490_v17 }
0x251e   :  { %v3493_v19 = vsel %vm477_vm5, %v12330_v18, 0.0 }
0x2521   :  { %3494 = vadd.xlane.f32.xlu0 %v3493_v19 }
0x25aa   :  { %v3492_v21 = vpop.xlane.xlu0 %3491 }
0x25ab   :  { %12331 = vrcp.f32 %v3492_v21 }
0x25ae   :  { %v3495_v23 = vpop.xlane.xlu0 %3494 }
0x25af   :  { %12333 = vrcp.f32 %v3495_v23 }
0x25b5   :  { %v12332_v24 = vpop.eup %12331 }
0x25b6   :  { %v3498_v25 = vmul.f32 %v12332_v24, %v12328_v16 }
0x25b8   :  { %10974 = vmatmul.mubr.msk.f32.vlgmr.msra.gmra.mrb[44].mxu1 %vm500_vm9, %v3498_v25 }
0x25b9   :  { %v12334_v26 = vpop.eup %12333  ;;  %11825 = vmatpush3.bf16.msk.msra.mxu1 %vm12815_vm8, %v12819_v29  ;;  %10980 = vmatprep.mubr.msk.f32.mxu1 %vm12567_vm1, %v12568_v8 }
0x25ba   :  { %v3499_v27 = vmul.f32 %v12334_v26, %v12330_v18  ;;  %11838 = vmatprep.subr.bf16.mxu1 %v12566_v6 }
0x25bc   :  { %10981 = vmatmul.mubr.msk.f32.vlgmr.msra.gmra.mrb[46].mxu1 %vm500_vm9, %v3499_v27 }
0x25bd   :  { %11840 = vmatpush3.bf16.msra.mxu1 %v12700_v12  ;;  %11013 = vmatprep.mubr.msk.f32.mxu1 %vm12567_vm1, %v12568_v8 }
0x25be   :  { %11841 = vmatprep.subr.bf16.mxu1 %v12566_v6 }
0x25c1   :  { %11843 = vmatpush3.bf16.msra.mxu1 %v12711_v15 }
0x25c2   :  { %11844 = vmatprep.subr.bf16.mxu1 %v12566_v6 }
0x268b   :  { %v3569_v30 = vpop.f32.mrb[44].mxu1 }
0x268c   :  { %v10975_v32 = vpop.f32.mrb[45].mxu1 }
0x268f   :  { %v3642_v0 = vpop.f32.mrb[46].mxu1 }
0x2690   :  { %v3722_v33 = vrot.slane %v3642_v0, 7  ;;  %v10982_v37 = vpop.f32.mrb[47].mxu1 }
0x2692   :  { %v3723_v35 = vsel %vm731_vm10, %v3722_v33, %v3569_v30 }
0x2693   :  { %11003 = vmatmul.mubr.msk.f32.vlgmr.msra.gmra.mrb[24].mxu0 %vm83_vm0, %v3723_v35 }
0x2694   :  { %11851 = vmatpush3.bf16.xpose.msk.msra.mxu0 %vm12747_vm2, %v12759_v45  ;;  %11027 = vmatprep.mubr.msk.f32.mxu0 %vm12567_vm1, %v12568_v8 }
0x2695   :  { %11860 = vmatprep.subr.bf16.mxu0 %v12566_v6 }
0x2766   :  { %v3792_v36 = vpop.f32.mrb[24].mxu0 }
0x2767   :  { %12335 = vtanh.f32 %v3792_v36  ;;  %v11004_v38 = vpop.f32.mrb[25].mxu0 }
0x2771   :  { %v12336_v42 = vpop.eup %12335 }
0x2772   :  { %3797 = vst.msk [vmem:[#allocation3 + $0xa] sm:$0x3] %vm806_vm11, %v12336_v42  ;;  %11014 = vmatmul.mubr.msk.f32.vlgmr.msra.gmra.mrb[48].mxu1 %vm83_vm0, %v12336_v42 }
0x2773   :  { %11847 = vmatpush3.bf16.xpose.msk.msra.mxu1 %vm12747_vm2, %v12751_v41  ;;  %11020 = vmatprep.mubr.msk.f32.mxu1 %vm12567_vm1, %v12568_v8 }
0x2774   :  { %11852 = vmatprep.subr.bf16.mxu1 %v12566_v6 }
0x2845   :  { %v3868_v47 = vpop.f32.mrb[48].mxu1 }
0x2846   :  { %v3872_v49 = vadd.f32 %v3868_v47, %v3798_v46  ;;  %v11015_v50 = vpop.f32.mrb[49].mxu1 }
0x2848   :  { %12337 = vtanh.f32 %v3872_v49  ;;  %v10038_v54 = vmul.f32 -1.442695, %v3872_v49 }
0x284a   :  { %12339 = vpow2.f32 %v10038_v54 }
0x2852   :  { %v12338_v53 = vpop.eup %12337 }
0x2853   :  { %3882 = vrot.lane.b32.xlu0 %v12338_v53, %s12569_s21 }
0x2854   :  { %v12340_v56 = vpop.eup %12339 }
0x2855   :  { %v3876_v20 = vadd.f32 1.0, %v12340_v56 }
0x2857   :  { %12341 = vrcp.f32 %v3876_v20 }
0x2861   :  { %v12342_v58 = vpop.eup %12341 }
0x2862   :  { %v3880_v60 = vmul.f32 %v12342_v58, %v13194_v39 }
0x28c5   :  { %v3883_v22 = vpop.permute.xlu0 %3882 }
0x28c6   :  { %v3885_v59 = vmul.f32 %v12342_v58, %v3883_v22 }
0x28c8   :  { %3887 = vrot.lane.b32.xlu1 %v3885_v59, %s12569_s21 }
0x293a   :  { %v3888_v61 = vpop.permute.xlu1 %3887 }
0x293b   :  { %v13266_v62 = vadd.f32 %v3888_v61, %v3880_v60 }
0x293d   :  { %12343 = vtanh.f32 %v13266_v62 }
0x2947   :  { %v12344_v63 = vpop.eup %12343 }
0x2948   :  { %3893 = vrot.lane.b32.xlu1 %v12344_v63, %s12569_s21 }
0x29ba   :  { %v3894_v2 = vpop.permute.xlu1 %3893 }
0x29bb   :  { %v3896_v4 = vmul.f32 %v12342_v58, %v3894_v2 }
0x29bd   :  { %v3904_v5 = vrot.slane %v3896_v4, %v12770_v51 }
0x29bf   :  { %v3905_v7 = vcombine.high %v3904_v5, %v3904_v5  ;;  %v3912_v9 = vrot.slane %v3904_v5, %v12770_v51 }
0x29c1   :  { %v3923_v10 = vrot.slane %v3912_v9, %v12773_v55  ;;  %v3919_v11 = vrot.slane %v3905_v7, %v12770_v51 }
0x29c3   :  { %3924 = vrot.lane.b32.xlu0 %v3923_v10, %s12571_s29  ;;  %v4001_v39 = vrot.slane %v3919_v11, %v12773_v55 }
0x29c5   :  { %4002 = vrot.lane.b32.xlu1 %v4001_v39, %s12571_s29 }
0x2a35   :  { %v3925_v13 = vpop.permute.xlu0 %3924 }
0x2a36   :  { %11021 = vmatmul.mubr.msk.f32.vlgmr.msra.gmra.mrb[50].mxu1 %vm83_vm0, %v3925_v13 }
0x2a37   :  { %v4003_v44 = vpop.permute.xlu1 %4002  ;;  %11855 = vmatpush3.bf16.msk.msra.mxu1 %vm12815_vm8, %v12824_v31  ;;  %11034 = vmatprep.mubr.msk.f32.mxu1 %vm12567_vm1, %v12568_v8 }
0x2a38   :  { %11028 = vmatmul.mubr.msk.f32.vlgmr.msra.gmra.mrb[26].mxu0 %vm83_vm0, %v4003_v44  ;;  %11856 = vmatprep.subr.bf16.mxu1 %v12566_v6 }
0x2a39   :  { %11862 = vmatpush3.bf16.msra.mxu0 %v12841_v43  ;;  %11052 = vmatprep.mubr.msk.f32.mxu0 %vm12567_vm1, %v12568_v8 }
0x2a3a   :  { %11863 = vmatprep.subr.bf16.mxu0 %v12566_v6 }
0x2a3d   :  { %11865 = vmatpush3.bf16.msra.mxu0 %v12855_v48 }
0x2a3e   :  { %11866 = vmatprep.subr.bf16.mxu0 %v12566_v6 }
0x2b09   :  { %v3994_v14 = vpop.f32.mrb[50].mxu1 }
0x2b0a   :  { %v3995_v16 = vadd.f32 %v3994_v14, %v12794_v1  ;;  %v11022_v17 = vpop.f32.mrb[51].mxu1 }
0x2b0b   :  { %v4072_v18 = vpop.f32.mrb[26].mxu0 }
0x2b0c   :  { %v4073_v19 = vadd.f32 %v4072_v18, %v12797_v3  ;;  %v11029_v21 = vpop.f32.mrb[27].mxu0  ;;  %v4076_v23 = vsel %vm477_vm5, %v3995_v16, -inf }
0x2b0d   :  { %4077 = vmax.xlane.f32.xlu0 %v4076_v23 }
0x2b0e   :  { %v4079_v24 = vsel %vm477_vm5, %v4073_v19, -inf }
0x2b0f   :  { %4080 = vmax.xlane.f32.xlu1 %v4079_v24 }
0x2b20   :  { %4244 = vrot.lane.b32.xlu1 %v3896_v4, %s12571_s29 }
0x2b9a   :  { %v4078_v25 = vpop.xlane.xlu0 %4077 }
0x2b9b   :  { %v4082_v26 = vsub.f32 %v3995_v16, %v4078_v25 }
0x2b9c   :  { %v4081_v27 = vpop.xlane.xlu1 %4080 }
0x2b9d   :  { %v4084_v30 = vmul.f32 1.442695, %v4082_v26  ;;  %v4083_v32 = vsub.f32 %v4073_v19, %v4081_v27 }
0x2b9f   :  { %12345 = vpow2.f32 %v4084_v30  ;;  %v4086_v0 = vmul.f32 1.442695, %v4083_v32 }
0x2ba0   :  { %v4245_v33 = vpop.permute.xlu1 %4244 }
0x2ba1   :  { %12347 = vpow2.f32 %v4086_v0  ;;  %11053 = vmatmul.mubr.msk.f32.vlgmr.msra.gmra.mrb[28].mxu0 %vm83_vm0, %v4245_v33 }
0x2ba2   :  { %11868 = vmatpush3.bf16.msra.mxu0 %v12869_v52  ;;  %11063 = vmatprep.mubr.msk.f32.mxu0 %vm12567_vm1, %v12568_v8 }
0x2ba3   :  { %11869 = vmatprep.subr.bf16.mxu0 %v12566_v6 }
0x2ba6   :  { %11871 = vmatpush3.bf16.msra.mxu0 %v12883_v57 }
0x2ba7   :  { %11882 = vmatprep.subr.bf16.mxu0 %v12566_v6 }
0x2ba9   :  { %v12346_v37 = vpop.eup %12345 }
0x2baa   :  { %v4088_v35 = vsel %vm477_vm5, %v12346_v37, 0.0 }
0x2bab   :  { %v12348_v36 = vpop.eup %12347  ;;  %4089 = vadd.xlane.f32.xlu0 %v4088_v35 }
0x2bac   :  { %v4091_v38 = vsel %vm477_vm5, %v12348_v36, 0.0 }
0x2baf   :  { %4092 = vadd.xlane.f32.xlu0 %v4091_v38 }
0x2c38   :  { %v4090_v42 = vpop.xlane.xlu0 %4089 }
0x2c39   :  { %12349 = vrcp.f32 %v4090_v42 }
0x2c3c   :  { %v4093_v46 = vpop.xlane.xlu0 %4092 }
0x2c3d   :  { %12351 = vrcp.f32 %v4093_v46 }
0x2c43   :  { %v12350_v47 = vpop.eup %12349 }
0x2c44   :  { %v4096_v49 = vmul.f32 %v12350_v47, %v12346_v37 }
0x2c46   :  { %11035 = vmatmul.mubr.msk.f32.vlgmr.msra.gmra.mrb[52].mxu1 %vm500_vm9, %v4096_v49 }
0x2c47   :  { %v12352_v50 = vpop.eup %12351  ;;  %11859 = vmatpush3.bf16.msk.msra.mxu1 %vm12815_vm8, %v12819_v29  ;;  %11041 = vmatprep.mubr.msk.f32.mxu1 %vm12567_vm1, %v12568_v8 }
0x2c48   :  { %v4097_v53 = vmul.f32 %v12352_v50, %v12348_v36  ;;  %11872 = vmatprep.subr.bf16.mxu1 %v12566_v6 }
0x2c4a   :  { %11042 = vmatmul.mubr.msk.f32.vlgmr.msra.gmra.mrb[54].mxu1 %vm500_vm9, %v4097_v53 }
0x2c4b   :  { %11874 = vmatpush3.bf16.msra.mxu1 %v12700_v12  ;;  %11074 = vmatprep.mubr.msk.f32.mxu1 %vm12567_vm1, %v12568_v8 }
0x2c4c   :  { %11875 = vmatprep.subr.bf16.mxu1 %v12566_v6 }
0x2c4f   :  { %11877 = vmatpush3.bf16.msra.mxu1 %v12711_v15 }
0x2c50   :  { %11878 = vmatprep.subr.bf16.mxu1 %v12566_v6 }
0x2d19   :  { %v4167_v54 = vpop.f32.mrb[52].mxu1 }
0x2d1a   :  { %v11036_v56 = vpop.f32.mrb[53].mxu1 }
0x2d1d   :  { %v4240_v20 = vpop.f32.mrb[54].mxu1 }
0x2d1e   :  { %v4320_v58 = vrot.slane %v4240_v20, 7  ;;  %v11043_v22 = vpop.f32.mrb[55].mxu1 }
0x2d20   :  { %v4321_v59 = vsel %vm731_vm10, %v4320_v58, %v4167_v54 }
0x2d21   :  { %11064 = vmatmul.mubr.msk.f32.vlgmr.msra.gmra.mrb[28].mxu0 %vm83_vm0, %v4321_v59 }
0x2d22   :  { %11885 = vmatpush3.bf16.xpose.msk.msra.mxu0 %vm12747_vm2, %v12759_v45  ;;  %11088 = vmatprep.mubr.msk.f32.mxu0 %vm12567_vm1, %v12568_v8  ;;  %v4396_v45 = vld [vmem:[#allocation2 + $0xe] sm:$0x3] }
0x2d23   :  { %11894 = vmatprep.subr.bf16.mxu0 %v12566_v6 }
0x2df4   :  { %v4390_v12 = vpop.f32.mrb[28].mxu0 }
0x2df5   :  { %12353 = vtanh.f32 %v4390_v12  ;;  %v11065_v15 = vpop.f32.mrb[29].mxu0  ;;  %v5000_v12 = vld [vmem:[#allocation3] sm:$0xff] }
0x2dff   :  { %v12354_v60 = vpop.eup %12353 }
0x2e00   :  { %4395 = vst.msk [vmem:[#allocation3 + $0xc] sm:$0x3] %vm806_vm11, %v12354_v60  ;;  %11075 = vmatmul.mubr.msk.f32.vlgmr.msra.gmra.mrb[56].mxu1 %vm83_vm0, %v12354_v60 }
0x2e01   :  { %11881 = vmatpush3.bf16.xpose.msk.msra.mxu1 %vm12747_vm2, %v12751_v41  ;;  %11081 = vmatprep.mubr.msk.f32.mxu1 %vm12567_vm1, %v12568_v8 }
0x2e02   :  { %11886 = vmatprep.subr.bf16.mxu1 %v12566_v6 }
0x2ed3   :  { %v4466_v61 = vpop.f32.mrb[56].mxu1 }
0x2ed4   :  { %v4470_v63 = vadd.f32 %v4466_v61, %v4396_v45  ;;  %v11076_v2 = vpop.f32.mrb[57].mxu1 }
0x2ed6   :  { %12355 = vtanh.f32 %v4470_v63  ;;  %v10052_v5 = vmul.f32 -1.442695, %v4470_v63 }
0x2ed8   :  { %12357 = vpow2.f32 %v10052_v5  ;;  %v5003_v5 = vld [vmem:[%s14111_s11 + $0x8] sm:$0xff] }
0x2ee0   :  { %v12356_v4 = vpop.eup %12355 }
0x2ee1   :  { %4480 = vrot.lane.b32.xlu0 %v12356_v4, %s12569_s21  ;;  %v5002_v4 = vld [vmem:[%s14111_s11] sm:$0xff] }
0x2ee2   :  { %v12358_v7 = vpop.eup %12357 }
0x2ee3   :  { %v4474_v9 = vadd.f32 1.0, %v12358_v7  ;;  %v11906_v7 = vpack.c.bf16 %v5003_v5, %v5002_v4 }
0x2ee5   :  { %12359 = vrcp.f32 %v4474_v9  ;;  %v5004_v9 = vld [vmem:[%s14111_s11 + $0x10] sm:$0xff] }
0x2eef   :  { %v12360_v10 = vpop.eup %12359 }
0x2ef0   :  { %v4478_v39 = vmul.f32 %v12360_v10, %v13266_v62 }
0x2f53   :  { %v4481_v41 = vpop.permute.xlu0 %4480 }
0x2f54   :  { %v4483_v11 = vmul.f32 %v12360_v10, %v4481_v41 }
0x2f56   :  { %4485 = vrot.lane.b32.xlu1 %v4483_v11, %s12569_s21 }
0x2fc8   :  { %v4486_v13 = vpop.permute.xlu1 %4485 }
0x2fc9   :  { %v13338_v44 = vadd.f32 %v4486_v13, %v4478_v39 }
0x2fcb   :  { %12361 = vtanh.f32 %v13338_v44 }
0x2fd5   :  { %v12362_v14 = vpop.eup %12361 }
0x2fd6   :  { %4491 = vrot.lane.b32.xlu1 %v12362_v14, %s12569_s21  ;;  %v5096_v14 = vld [vmem:[%s14112_s12] sm:$0xff] }
0x3048   :  { %v4492_v16 = vpop.permute.xlu1 %4491 }
0x3049   :  { %v4494_v17 = vmul.f32 %v12360_v10, %v4492_v16  ;;  %v5005_v10 = vld [vmem:[%s14111_s11 + $0x18] sm:$0xff]  ;;  %v5097_v16 = vld [vmem:[%s14112_s12 + $0x8] sm:$0xff] }
0x304a   :  { %v11910_v41 = vpack.c.bf16 %v5005_v10, %v5004_v9 }
0x304b   :  { %v4502_v18 = vrot.slane %v4494_v17, %v12770_v51 }
0x304d   :  { %v4503_v19 = vcombine.high %v4502_v18, %v4502_v18  ;;  %v4510_v21 = vrot.slane %v4502_v18, %v12770_v51  ;;  %v5098_v18 = vld [vmem:[%s14112_s12 + $0x10] sm:$0xff] }
0x304f   :  { %v4521_v23 = vrot.slane %v4510_v21, %v12773_v55  ;;  %v4517_v24 = vrot.slane %v4503_v19, %v12770_v51  ;;  %v5099_v19 = vld [vmem:[%s14112_s12 + $0x18] sm:$0xff] }
0x3051   :  { %4522 = vrot.lane.b32.xlu0 %v4521_v23, %s12571_s29  ;;  %v4599_v62 = vrot.slane %v4517_v24, %v12773_v55  ;;  %v13420_v23 = vpack.c.bf16 %v5099_v19, %v5098_v18  ;;  %v12517_v24 = vld [vmem:[%s14104_s4] sm:$0x3] }
0x3053   :  { %4600 = vrot.lane.b32.xlu1 %v4599_v62, %s12571_s29  ;;  %v10065_v62 = vld [vmem:[%s14113_s13] ss:$0 sm:$0xff] }
0x30c3   :  { %v4523_v25 = vpop.permute.xlu0 %4522 }
0x30c4   :  { %11082 = vmatmul.mubr.msk.f32.vlgmr.msra.gmra.mrb[58].mxu1 %vm83_vm0, %v4523_v25 }
0x30c5   :  { %v4601_v26 = vpop.permute.xlu1 %4600  ;;  %11889 = vmatpush3.bf16.msk.msra.mxu1 %vm12815_vm8, %v12824_v31  ;;  %11095 = vmatprep.mubr.msk.f32.mxu1 %vm12567_vm1, %v12568_v8 }
0x30c6   :  { %11089 = vmatmul.mubr.msk.f32.vlgmr.msra.gmra.mrb[30].mxu0 %vm83_vm0, %v4601_v26  ;;  %11890 = vmatprep.subr.bf16.mxu1 %v12566_v6 }
0x30c7   :  { %11896 = vmatpush3.bf16.msra.mxu0 %v12841_v43  ;;  %11113 = vmatprep.mubr.msk.f32.mxu0 %vm12567_vm1, %v12568_v8 }
0x30c8   :  { %11897 = vmatprep.subr.bf16.mxu0 %v12566_v6 }
0x30cb   :  { %11899 = vmatpush3.bf16.msra.mxu0 %v12855_v48 }
0x30cc   :  { %11900 = vmatprep.subr.bf16.mxu0 %v12566_v6 }
0x3197   :  { %v4592_v27 = vpop.f32.mrb[58].mxu1 }
0x3198   :  { %v4593_v30 = vadd.f32 %v4592_v27, %v12794_v1  ;;  %v11083_v32 = vpop.f32.mrb[59].mxu1 }
0x3199   :  { %v4670_v0 = vpop.f32.mrb[30].mxu0 }
0x319a   :  { %v4671_v33 = vadd.f32 %v4670_v0, %v12797_v3  ;;  %v11090_v37 = vpop.f32.mrb[31].mxu0  ;;  %v4674_v35 = vsel %vm477_vm5, %v4593_v30, -inf }
0x319b   :  { %4675 = vmax.xlane.f32.xlu0 %v4674_v35 }
0x319c   :  { %v4677_v43 = vsel %vm477_vm5, %v4671_v33, -inf }
0x319d   :  { %4678 = vmax.xlane.f32.xlu1 %v4677_v43 }
0x31ae   :  { %4842 = vrot.lane.b32.xlu1 %v4494_v17, %s12571_s29  ;;  %v13410_v17 = vpack.c.bf16 %v5097_v16, %v5096_v14 }
0x3228   :  { %v4676_v36 = vpop.xlane.xlu0 %4675 }
0x3229   :  { %v4680_v48 = vsub.f32 %v4593_v30, %v4676_v36 }
0x322a   :  { %v4679_v38 = vpop.xlane.xlu1 %4678 }
0x322b   :  { %v4682_v42 = vmul.f32 1.442695, %v4680_v48  ;;  %v4681_v46 = vsub.f32 %v4671_v33, %v4679_v38 }
0x322d   :  { %12363 = vpow2.f32 %v4682_v42  ;;  %v4684_v47 = vmul.f32 1.442695, %v4681_v46 }
0x322e   :  { %v4843_v49 = vpop.permute.xlu1 %4842 }
0x322f   :  { %12365 = vpow2.f32 %v4684_v47  ;;  %11114 = vmatmul.mubr.msk.f32.vlgmr.msra.gmra.mrb[32].mxu0 %vm83_vm0, %v4843_v49 }
0x3230   :  { %11902 = vmatpush3.bf16.msra.mxu0 %v12869_v52  ;;  %11124 = vmatprep.mubr.msk.f32.mxu0 %vm12567_vm1, %v12568_v8 }
0x3231   :  { %11903 = vmatprep.subr.bf16.mxu0 %v12566_v6 }
0x3234   :  { %11905 = vmatpush3.bf16.msra.mxu0 %v12883_v57 }
0x3235   :  { %11920 = vmatprep.subr.bf16.mxu0 %v12566_v6 }
0x3237   :  { %v12364_v50 = vpop.eup %12363 }
0x3238   :  { %v4686_v53 = vsel %vm477_vm5, %v12364_v50, 0.0 }
0x3239   :  { %v12366_v54 = vpop.eup %12365  ;;  %4687 = vadd.xlane.f32.xlu0 %v4686_v53  ;;  %v10068_v53 = vld [vmem:[%s14126_s6 + $0x20] sm:$0xff] }
0x323a   :  { %v4689_v56 = vsel %vm477_vm5, %v12366_v54, 0.0 }
0x323d   :  { %4690 = vadd.xlane.f32.xlu0 %v4689_v56  ;;  %v10070_v56 = vld [vmem:[%s14126_s6 + $0x30] sm:$0xff] }
0x32c6   :  { %v4688_v20 = vpop.xlane.xlu0 %4687 }
0x32c7   :  { %12367 = vrcp.f32 %v4688_v20 }
0x32ca   :  { %v4691_v52 = vpop.xlane.xlu0 %4690 }
0x32cb   :  { %12369 = vrcp.f32 %v4691_v52 }
0x32d1   :  { %v12368_v58 = vpop.eup %12367 }
0x32d2   :  { %v4694_v22 = vmul.f32 %v12368_v58, %v12364_v50 }
0x32d4   :  { %11096 = vmatmul.mubr.msk.f32.vlgmr.msra.gmra.mrb[60].mxu1 %vm500_vm9, %v4694_v22 }
0x32d5   :  { %v12370_v59 = vpop.eup %12369  ;;  %11893 = vmatpush3.bf16.msk.msra.mxu1 %vm12815_vm8, %v12819_v29  ;;  %11102 = vmatprep.mubr.msk.f32.mxu1 %vm12567_vm1, %v12568_v8 }
0x32d6   :  { %v4695_v57 = vmul.f32 %v12370_v59, %v12366_v54  ;;  %11907 = vmatprep.subr.bf16.mxu1 %v11906_v7  ;;  %v10069_v54 = vld [vmem:[%s14126_s6 + $0x28] sm:$0x3] }
0x32d7   :  { %v13451_v20 = vpack.c.bf16 %v10069_v54, %v10068_v53  ;;  %v5102_v54 = vld [vmem:[%s14114_s14 + $0x10] sm:$0xff] }
0x32d8   :  { %11103 = vmatmul.mubr.msk.f32.vlgmr.msra.gmra.mrb[62].mxu1 %vm500_vm9, %v4695_v57 }
0x32d9   :  { %11135 = vmatprep.mubr.msk.f32.mxu1 %vm83_vm0, %v5000_v12  ;;  %11909 = vmatpush3.bf16.msra.mxu1 %v11906_v7 }
0x32da   :  { %11911 = vmatprep.subr.bf16.mxu1 %v11910_v41 }
0x32dd   :  { %11913 = vmatpush3.bf16.msra.mxu1 %v11910_v41 }
0x32de   :  { %11914 = vmatprep.subr.bf16.mxu1 %v12566_v6 }
0x33a7   :  { %v4765_v15 = vpop.f32.mrb[60].mxu1 }
0x33a8   :  { %v11097_v60 = vpop.f32.mrb[61].mxu1 }
0x33ab   :  { %v4838_v45 = vpop.f32.mrb[62].mxu1 }
0x33ac   :  { %v4918_v61 = vrot.slane %v4838_v45, 7  ;;  %v11104_v63 = vpop.f32.mrb[63].mxu1 }
0x33ae   :  { %v4919_v2 = vsel %vm731_vm10, %v4918_v61, %v4765_v15 }
0x33af   :  { %11125 = vmatmul.mubr.msk.f32.vlgmr.msra.gmra.mrb[32].mxu0 %vm83_vm0, %v4919_v2 }
0x33b0   :  { %11153 = vmatprep.mubr.msk.f32.mxu0 %vm12567_vm1, %v12568_v8  ;;  %11923 = vmatpush3.bf16.xpose.msk.msra.mxu0 %vm12747_vm2, %v13451_v20 }
0x33b1   :  { %11928 = vmatprep.subr.bf16.mxu0 %v12566_v6 }
0x3482   :  { %v4988_v11 = vpop.f32.mrb[32].mxu0 }
0x3483   :  { %12371 = vtanh.f32 %v4988_v11  ;;  %v11126_v39 = vpop.f32.mrb[33].mxu0 }
0x348d   :  { %v12372_v13 = vpop.eup %12371 }
0x348e   :  { %4993 = vst.msk [vmem:[#allocation3 + $0xe] sm:$0x3] %vm806_vm11, %v12372_v13  ;;  %4994 = vst.msk [vmem:[#allocation4] sm:$0x3] %vm806_vm11, %v12372_v13 }
0x3495   :  { %v5001_v21 = vld [vmem:[#allocation3 + $0x8] sm:$0xff] }
0x3496   :  { %11136 = vmatmul.mubr.msk.f32.vlgmr.msra.gmra.mrb[64].mxu1 %vm83_vm0, %v5001_v21 }
0x3497   :  { %11916 = vmatpush3.bf16.msra.mxu1 %v13410_v17  ;;  %11146 = vmatprep.mubr.msk.f32.mxu1 %vm12567_vm1, %v12568_v8 }
0x3498   :  { %11917 = vmatprep.subr.bf16.mxu1 %v12566_v6 }
0x349b   :  { %11919 = vmatpush3.bf16.msra.mxu1 %v13420_v23 }
0x349c   :  { %11924 = vmatprep.subr.bf16.mxu1 %v12566_v6 }
0x349e   :  { %11147 = vmatmul.mubr.msk.f32.vlgmr.msra.gmra.mrb[66].mxu1 %vm83_vm0, %v12517_v24 }
0x349f   :  { %11160 = vmatprep.mubr.msk.f32.mxu1 %vm12567_vm1, %v12568_v8 }
0x3569   :  { %v11137_v25 = vpop.f32.mrb[64].mxu1 }
0x356a   :  { %v5091_v26 = vadd.f32 %v11137_v25, %v10065_v62  ;;  %v5085_v27 = vpop.f32.mrb[65].mxu1 }
0x356b   :  { %v5086_v30 = vadd.f32 %v10065_v62, %v5085_v27 }
0x356c   :  { %5095 = vst [vmem:[#allocation2 + $0x8] sm:$0xff] %v5091_v26 }
0x356d   :  { %5094 = vst [vmem:[#allocation2] sm:$0xff] %v5086_v30 }
0x3571   :  { %v5180_v32 = vpop.f32.mrb[66].mxu1 }
0x3572   :  { %v11148_v0 = vpop.f32.mrb[67].mxu1 }
0x3574   :  { %v5113_v33 = vld [vmem:[#allocation2] sm:$0x3] }
0x3575   :  { %v5184_v37 = vadd.f32 %v5180_v32, %v5113_v33  ;;  %v5104_v33 = vld [vmem:[%s14115_s15] sm:$0xff] }
0x3577   :  { %12373 = vtanh.f32 %v5184_v37  ;;  %v10073_v43 = vmul.f32 -1.442695, %v5184_v37  ;;  %v5105_v37 = vld [vmem:[%s14115_s15 + $0x8] sm:$0xff] }
0x3579   :  { %12375 = vpow2.f32 %v10073_v43  ;;  %v13502_v43 = vpack.c.bf16 %v5105_v37, %v5104_v33 }
0x3581   :  { %v12374_v35 = vpop.eup %12373 }
0x3582   :  { %5194 = vrot.lane.b32.xlu0 %v12374_v35, %s12569_s21 }
0x3583   :  { %v12376_v36 = vpop.eup %12375 }
0x3584   :  { %v5188_v48 = vadd.f32 1.0, %v12376_v36 }
0x3586   :  { %12377 = vrcp.f32 %v5188_v48  ;;  %v5106_v48 = vld [vmem:[%s14115_s15 + $0x10] sm:$0xff] }
0x3590   :  { %v12378_v38 = vpop.eup %12377 }
0x3591   :  { %v5192_v47 = vmul.f32 %v12378_v38, %v12733_v34  ;;  %v10071_v34 = vld [vmem:[%s14126_s6 + $0x38] sm:$0x3] }
0x3592   :  { %v13456_v58 = vpack.c.bf16 %v10071_v34, %v10070_v56  ;;  %v5103_v56 = vld [vmem:[%s14114_s14 + $0x18] sm:$0xff] }
0x3593   :  { %v13544_v34 = vpack.c.bf16 %v5103_v56, %v5102_v54 }
0x3594   :  { %11927 = vmatpush3.bf16.xpose.msk.msra.mxu1 %vm12747_vm2, %v13456_v58 }
0x3595   :  { %11932 = vmatprep.subr.bf16.mxu1 %v12566_v6 }
0x35f4   :  { %v5195_v42 = vpop.permute.xlu0 %5194 }
0x35f5   :  { %v5197_v46 = vmul.f32 %v12378_v38, %v5195_v42 }
0x35f7   :  { %5199 = vrot.lane.b32.xlu1 %v5197_v46, %s12569_s21  ;;  %v5100_v46 = vld [vmem:[%s14114_s14] sm:$0xff] }
0x3669   :  { %v5200_v49 = vpop.permute.xlu1 %5199 }
0x366a   :  { %v13439_v50 = vadd.f32 %v5200_v49, %v5192_v47  ;;  %v5101_v47 = vld [vmem:[%s14114_s14 + $0x8] sm:$0xff] }
0x366b   :  { %v13530_v49 = vpack.c.bf16 %v5101_v47, %v5100_v46 }
0x366c   :  { %12379 = vtanh.f32 %v13439_v50 }
0x3676   :  { %v12380_v52 = vpop.eup %12379 }
0x3677   :  { %5205 = vrot.lane.b32.xlu1 %v12380_v52, %s12569_s21 }
0x36e9   :  { %v5206_v22 = vpop.permute.xlu1 %5205 }
0x36ea   :  { %v5208_v59 = vmul.f32 %v12378_v38, %v5206_v22  ;;  %v5107_v38 = vld [vmem:[%s14115_s15 + $0x18] sm:$0xff] }
0x36eb   :  { %v13516_v42 = vpack.c.bf16 %v5107_v38, %v5106_v48 }
0x36ec   :  { %v5216_v57 = vrot.slane %v5208_v59, %v12770_v51 }
0x36ee   :  { %v5217_v12 = vcombine.high %v5216_v57, %v5216_v57  ;;  %v5224_v15 = vrot.slane %v5216_v57, %v12770_v51 }
0x36f0   :  { %v5235_v60 = vrot.slane %v5224_v15, %v12773_v55  ;;  %v5231_v45 = vrot.slane %v5217_v12, %v12770_v51 }
0x36f2   :  { %5236 = vrot.lane.b32.xlu1 %v5235_v60, %s12571_s29  ;;  %v5319_v61 = vrot.slane %v5231_v45, %v12773_v55 }
0x36f4   :  { %5320 = vrot.lane.b32.xlu0 %v5319_v61, %s12571_s29 }
0x3764   :  { %v5237_v63 = vpop.permute.xlu1 %5236 }
0x3765   :  { %11154 = vmatmul.mubr.msk.f32.vlgmr.msra.gmra.mrb[34].mxu0 %vm83_vm0, %v5237_v63  ;;  %v5720_v63 = vld [vmem:[#allocation2 + $0x2] sm:$0x3] }
0x3766   :  { %v5321_v2 = vpop.permute.xlu0 %5320  ;;  %11931 = vmatpush3.bf16.msk.msra.mxu0 %vm12815_vm8, %v12824_v31  ;;  %11167 = vmatprep.mubr.msk.f32.mxu0 %vm12567_vm1, %v12568_v8 }
0x3767   :  { %11161 = vmatmul.mubr.msk.f32.vlgmr.msra.gmra.mrb[68].mxu1 %vm83_vm0, %v5321_v2  ;;  %11936 = vmatprep.subr.bf16.mxu0 %v12566_v6 }
0x3768   :  { %11935 = vmatpush3.bf16.msk.msra.mxu1 %vm12815_vm8, %v12819_v29  ;;  %11174 = vmatprep.mubr.msk.f32.mxu1 %vm12567_vm1, %v12568_v8 }
0x3769   :  { %11948 = vmatprep.subr.bf16.mxu1 %v12566_v6 }
0x3838   :  { %v5312_v4 = vpop.f32.mrb[34].mxu0 }
0x3839   :  { %v5313_v5 = vadd.f32 %v5312_v4, %v12794_v1  ;;  %v11155_v7 = vpop.f32.mrb[35].mxu0 }
0x383a   :  { %v5396_v9 = vpop.f32.mrb[68].mxu1 }
0x383b   :  { %v5397_v10 = vadd.f32 %v5396_v9, %v12797_v3  ;;  %v11162_v41 = vpop.f32.mrb[69].mxu1  ;;  %v5400_v11 = vsel %vm477_vm5, %v5313_v5, -inf }
0x383c   :  { %5401 = vmax.xlane.f32.xlu1 %v5400_v11 }
0x383d   :  { %v5403_v39 = vsel %vm477_vm5, %v5397_v10, -inf }
0x383e   :  { %5404 = vmax.xlane.f32.xlu0 %v5403_v39 }
0x384d   :  { %5568 = vrot.lane.b32.xlu1 %v5208_v59, %s12571_s29 }
0x38c9   :  { %v5402_v13 = vpop.xlane.xlu1 %5401 }
0x38ca   :  { %v5406_v14 = vsub.f32 %v5313_v5, %v5402_v13 }
0x38cb   :  { %v5405_v16 = vpop.xlane.xlu0 %5404 }
0x38cc   :  { %v5407_v18 = vsub.f32 %v5397_v10, %v5405_v16  ;;  %v5408_v19 = vmul.f32 1.442695, %v5406_v14 }
0x38cd   :  { %v5569_v53 = vpop.permute.xlu1 %5568 }
0x38ce   :  { %v5410_v21 = vmul.f32 1.442695, %v5407_v18 }
0x38d0   :  { %12381 = vpow2.f32 %v5410_v21 }
0x38d1   :  { %12383 = vpow2.f32 %v5408_v19 }
0x38da   :  { %v12382_v24 = vpop.eup %12381 }
0x38db   :  { %v5415_v62 = vsel %vm477_vm5, %v12382_v24, 0.0  ;;  %v12384_v25 = vpop.eup %12383 }
0x38dc   :  { %5416 = vadd.xlane.f32.xlu0 %v5415_v62  ;;  %v5412_v26 = vsel %vm477_vm5, %v12384_v25, 0.0 }
0x38e0   :  { %5413 = vadd.xlane.f32.xlu0 %v5412_v26 }
0x3969   :  { %v5417_v27 = vpop.xlane.xlu0 %5416 }
0x396a   :  { %12385 = vrcp.f32 %v5417_v27 }
0x396d   :  { %v5414_v30 = vpop.xlane.xlu0 %5413 }
0x396e   :  { %12387 = vrcp.f32 %v5414_v30 }
0x3974   :  { %v12386_v32 = vpop.eup %12385 }
0x3975   :  { %v5421_v0 = vmul.f32 %v12386_v32, %v12382_v24 }
0x3977   :  { %11175 = vmatmul.mubr.msk.f32.vlgmr.msra.gmra.mrb[70].mxu1 %vm500_vm9, %v5421_v0 }
0x3978   :  { %v12388_v35 = vpop.eup %12387  ;;  %11950 = vmatpush3.bf16.msra.mxu1 %v13410_v17  ;;  %11207 = vmatprep.mubr.msk.f32.mxu1 %vm12567_vm1, %v12568_v8 }
0x3979   :  { %v5420_v36 = vmul.f32 %v12388_v35, %v12384_v25  ;;  %11951 = vmatprep.subr.bf16.mxu1 %v12566_v6 }
0x397b   :  { %11168 = vmatmul.mubr.msk.f32.vlgmr.msra.gmra.mrb[36].mxu0 %vm500_vm9, %v5420_v36 }
0x397c   :  { %11938 = vmatpush3.bf16.msra.mxu0 %v13502_v43  ;;  %11185 = vmatprep.mubr.msk.f32.mxu0 %vm12567_vm1, %v12568_v8 }
0x397d   :  { %11939 = vmatprep.subr.bf16.mxu0 %v12566_v6  ;;  %11953 = vmatpush3.bf16.msra.mxu1 %v13420_v23 }
0x397e   :  { %11954 = vmatprep.subr.bf16.mxu1 %v12566_v6 }
0x3980   :  { %11941 = vmatpush3.bf16.msra.mxu0 %v13516_v42 }
0x3981   :  { %11942 = vmatprep.subr.bf16.mxu0 %v12566_v6 }
0x3983   :  { %11186 = vmatmul.mubr.msk.f32.vlgmr.msra.gmra.mrb[38].mxu0 %vm83_vm0, %v5569_v53 }
0x3984   :  { %11944 = vmatpush3.bf16.msra.mxu0 %v13530_v49  ;;  %11196 = vmatprep.mubr.msk.f32.mxu0 %vm12567_vm1, %v12568_v8 }
0x3985   :  { %11945 = vmatprep.subr.bf16.mxu0 %v12566_v6 }
0x3988   :  { %11947 = vmatpush3.bf16.msra.mxu0 %v13544_v34 }
0x3989   :  { %11958 = vmatprep.subr.bf16.mxu0 %v12566_v6 }
0x3a4a   :  { %v5564_v52 = vpop.f32.mrb[70].mxu1 }
0x3a4b   :  { %v11176_v22 = vpop.f32.mrb[71].mxu1  ;;  %v5644_v59 = vrot.slane %v5564_v52, 7 }
0x3a4e   :  { %v5491_v57 = vpop.f32.mrb[36].mxu0 }
0x3a4f   :  { %v5645_v12 = vsel %vm731_vm10, %v5644_v59, %v5491_v57  ;;  %v11169_v15 = vpop.f32.mrb[37].mxu0 }
0x3a50   :  { %11197 = vmatmul.mubr.msk.f32.vlgmr.msra.gmra.mrb[38].mxu0 %vm83_vm0, %v5645_v12 }
0x3a51   :  { %11961 = vmatpush3.bf16.xpose.msk.msra.mxu0 %vm12747_vm2, %v13456_v58  ;;  %11221 = vmatprep.mubr.msk.f32.mxu0 %vm12567_vm1, %v12568_v8 }
0x3a52   :  { %11970 = vmatprep.subr.bf16.mxu0 %v12566_v6 }
0x3b23   :  { %v5714_v60 = vpop.f32.mrb[38].mxu0 }
0x3b24   :  { %12389 = vtanh.f32 %v5714_v60  ;;  %v11198_v45 = vpop.f32.mrb[39].mxu0 }
0x3b2e   :  { %v12390_v61 = vpop.eup %12389 }
0x3b2f   :  { %5719 = vst.msk [vmem:[%s14116_s16] sm:$0x3] %vm806_vm11, %v12390_v61  ;;  %11208 = vmatmul.mubr.msk.f32.vlgmr.msra.gmra.mrb[72].mxu1 %vm83_vm0, %v12390_v61 }
0x3b30   :  { %11957 = vmatpush3.bf16.xpose.msk.msra.mxu1 %vm12747_vm2, %v13451_v20  ;;  %11214 = vmatprep.mubr.msk.f32.mxu1 %vm12567_vm1, %v12568_v8 }
0x3b31   :  { %11962 = vmatprep.subr.bf16.mxu1 %v12566_v6 }
0x3c02   :  { %v5790_v2 = vpop.f32.mrb[72].mxu1 }
0x3c03   :  { %v5794_v4 = vadd.f32 %v5790_v2, %v5720_v63  ;;  %v11209_v5 = vpop.f32.mrb[73].mxu1 }
0x3c05   :  { %12391 = vtanh.f32 %v5794_v4  ;;  %v10087_v9 = vmul.f32 -1.442695, %v5794_v4 }
0x3c07   :  { %12393 = vpow2.f32 %v10087_v9 }
0x3c0f   :  { %v12392_v7 = vpop.eup %12391 }
0x3c10   :  { %5804 = vrot.lane.b32.xlu0 %v12392_v7, %s12569_s21 }
0x3c11   :  { %v12394_v10 = vpop.eup %12393 }
0x3c12   :  { %v5798_v41 = vadd.f32 1.0, %v12394_v10 }
0x3c14   :  { %12395 = vrcp.f32 %v5798_v41 }
0x3c1e   :  { %v12396_v11 = vpop.eup %12395 }
0x3c1f   :  { %v5802_v14 = vmul.f32 %v12396_v11, %v13439_v50 }
0x3c82   :  { %v5805_v39 = vpop.permute.xlu0 %5804 }
0x3c83   :  { %v5807_v13 = vmul.f32 %v12396_v11, %v5805_v39 }
0x3c85   :  { %5809 = vrot.lane.b32.xlu1 %v5807_v13, %s12569_s21 }
0x3cf7   :  { %v5810_v16 = vpop.permute.xlu1 %5809 }
0x3cf8   :  { %v13570_v18 = vadd.f32 %v5810_v16, %v5802_v14 }
0x3cfa   :  { %12397 = vtanh.f32 %v13570_v18 }
0x3d04   :  { %v12398_v19 = vpop.eup %12397 }
0x3d05   :  { %5815 = vrot.lane.b32.xlu1 %v12398_v19, %s12569_s21 }
0x3d77   :  { %v5816_v21 = vpop.permute.xlu1 %5815 }
0x3d78   :  { %v5818_v24 = vmul.f32 %v12396_v11, %v5816_v21  ;;  %v6318_v21 = vld [vmem:[#allocation2 + $0x4] sm:$0x3] }
0x3d7a   :  { %v5826_v62 = vrot.slane %v5818_v24, %v12770_v51 }
0x3d7c   :  { %v5827_v25 = vcombine.high %v5826_v62, %v5826_v62  ;;  %v5834_v26 = vrot.slane %v5826_v62, %v12770_v51 }
0x3d7e   :  { %v5845_v27 = vrot.slane %v5834_v26, %v12773_v55  ;;  %v5841_v30 = vrot.slane %v5827_v25, %v12770_v51 }
0x3d80   :  { %5846 = vrot.lane.b32.xlu0 %v5845_v27, %s12571_s29  ;;  %v5923_v50 = vrot.slane %v5841_v30, %v12773_v55 }
0x3d82   :  { %5924 = vrot.lane.b32.xlu1 %v5923_v50, %s12571_s29 }
0x3df2   :  { %v5847_v32 = vpop.permute.xlu0 %5846 }
0x3df3   :  { %11215 = vmatmul.mubr.msk.f32.vlgmr.msra.gmra.mrb[74].mxu1 %vm83_vm0, %v5847_v32 }
0x3df4   :  { %v5925_v0 = vpop.permute.xlu1 %5924  ;;  %11965 = vmatpush3.bf16.msk.msra.mxu1 %vm12815_vm8, %v12824_v31  ;;  %11228 = vmatprep.mubr.msk.f32.mxu1 %vm12567_vm1, %v12568_v8 }
0x3df5   :  { %11222 = vmatmul.mubr.msk.f32.vlgmr.msra.gmra.mrb[40].mxu0 %vm83_vm0, %v5925_v0  ;;  %11966 = vmatprep.subr.bf16.mxu1 %v12566_v6 }
0x3df6   :  { %11972 = vmatpush3.bf16.msra.mxu0 %v13502_v43  ;;  %11246 = vmatprep.mubr.msk.f32.mxu0 %vm12567_vm1, %v12568_v8 }
0x3df7   :  { %11973 = vmatprep.subr.bf16.mxu0 %v12566_v6 }
0x3dfa   :  { %11975 = vmatpush3.bf16.msra.mxu0 %v13516_v42 }
0x3dfb   :  { %11976 = vmatprep.subr.bf16.mxu0 %v12566_v6 }
0x3ec6   :  { %v5916_v33 = vpop.f32.mrb[74].mxu1 }
0x3ec7   :  { %v5917_v37 = vadd.f32 %v5916_v33, %v12794_v1  ;;  %v11216_v35 = vpop.f32.mrb[75].mxu1 }
0x3ec8   :  { %v5994_v36 = vpop.f32.mrb[40].mxu0 }
0x3ec9   :  { %v5995_v48 = vadd.f32 %v5994_v36, %v12797_v3  ;;  %v11223_v38 = vpop.f32.mrb[41].mxu0  ;;  %v5998_v46 = vsel %vm477_vm5, %v5917_v37, -inf }
0x3eca   :  { %5999 = vmax.xlane.f32.xlu0 %v5998_v46 }
0x3ecb   :  { %v6001_v47 = vsel %vm477_vm5, %v5995_v48, -inf }
0x3ecc   :  { %6002 = vmax.xlane.f32.xlu1 %v6001_v47 }
0x3edd   :  { %6166 = vrot.lane.b32.xlu1 %v5818_v24, %s12571_s29 }
0x3f57   :  { %v6000_v53 = vpop.xlane.xlu0 %5999 }
0x3f58   :  { %v6004_v54 = vsub.f32 %v5917_v37, %v6000_v53 }
0x3f59   :  { %v6003_v56 = vpop.xlane.xlu1 %6002 }
0x3f5a   :  { %v6006_v52 = vmul.f32 1.442695, %v6004_v54  ;;  %v6005_v22 = vsub.f32 %v5995_v48, %v6003_v56 }
0x3f5c   :  { %12399 = vpow2.f32 %v6006_v52  ;;  %v6008_v59 = vmul.f32 1.442695, %v6005_v22 }
0x3f5d   :  { %v6167_v57 = vpop.permute.xlu1 %6166 }
0x3f5e   :  { %12401 = vpow2.f32 %v6008_v59  ;;  %11247 = vmatmul.mubr.msk.f32.vlgmr.msra.gmra.mrb[42].mxu0 %vm83_vm0, %v6167_v57 }
0x3f5f   :  { %11978 = vmatpush3.bf16.msra.mxu0 %v13530_v49  ;;  %11257 = vmatprep.mubr.msk.f32.mxu0 %vm12567_vm1, %v12568_v8 }
0x3f60   :  { %11979 = vmatprep.subr.bf16.mxu0 %v12566_v6 }
0x3f63   :  { %11981 = vmatpush3.bf16.msra.mxu0 %v13544_v34 }
0x3f64   :  { %11992 = vmatprep.subr.bf16.mxu0 %v12566_v6 }
0x3f66   :  { %v12400_v12 = vpop.eup %12399 }
0x3f67   :  { %v6010_v15 = vsel %vm477_vm5, %v12400_v12, 0.0 }
0x3f68   :  { %v12402_v60 = vpop.eup %12401  ;;  %6011 = vadd.xlane.f32.xlu0 %v6010_v15 }
0x3f69   :  { %v6013_v45 = vsel %vm477_vm5, %v12402_v60, 0.0 }
0x3f6c   :  { %6014 = vadd.xlane.f32.xlu0 %v6013_v45 }
0x3ff5   :  { %v6012_v61 = vpop.xlane.xlu0 %6011 }
0x3ff6   :  { %12403 = vrcp.f32 %v6012_v61 }
0x3ff9   :  { %v6015_v63 = vpop.xlane.xlu0 %6014 }
0x3ffa   :  { %12405 = vrcp.f32 %v6015_v63 }
0x4000   :  { %v12404_v2 = vpop.eup %12403 }
0x4001   :  { %v6018_v4 = vmul.f32 %v12404_v2, %v12400_v12 }
0x4003   :  { %11229 = vmatmul.mubr.msk.f32.vlgmr.msra.gmra.mrb[76].mxu1 %vm500_vm9, %v6018_v4 }
0x4004   :  { %v12406_v5 = vpop.eup %12405  ;;  %11969 = vmatpush3.bf16.msk.msra.mxu1 %vm12815_vm8, %v12819_v29  ;;  %11235 = vmatprep.mubr.msk.f32.mxu1 %vm12567_vm1, %v12568_v8 }
0x4005   :  { %v6019_v7 = vmul.f32 %v12406_v5, %v12402_v60  ;;  %11982 = vmatprep.subr.bf16.mxu1 %v12566_v6 }
0x4007   :  { %11236 = vmatmul.mubr.msk.f32.vlgmr.msra.gmra.mrb[78].mxu1 %vm500_vm9, %v6019_v7 }
0x4008   :  { %11984 = vmatpush3.bf16.msra.mxu1 %v13410_v17  ;;  %11268 = vmatprep.mubr.msk.f32.mxu1 %vm12567_vm1, %v12568_v8 }
0x4009   :  { %11985 = vmatprep.subr.bf16.mxu1 %v12566_v6 }
0x400c   :  { %11987 = vmatpush3.bf16.msra.mxu1 %v13420_v23 }
0x400d   :  { %11988 = vmatprep.subr.bf16.mxu1 %v12566_v6 }
0x40d6   :  { %v6089_v9 = vpop.f32.mrb[76].mxu1 }
0x40d7   :  { %v11230_v10 = vpop.f32.mrb[77].mxu1 }
0x40da   :  { %v6162_v41 = vpop.f32.mrb[78].mxu1 }
0x40db   :  { %v6242_v11 = vrot.slane %v6162_v41, 7  ;;  %v11237_v39 = vpop.f32.mrb[79].mxu1 }
0x40dd   :  { %v6243_v13 = vsel %vm731_vm10, %v6242_v11, %v6089_v9 }
0x40de   :  { %11258 = vmatmul.mubr.msk.f32.vlgmr.msra.gmra.mrb[42].mxu0 %vm83_vm0, %v6243_v13 }
0x40df   :  { %11995 = vmatpush3.bf16.xpose.msk.msra.mxu0 %vm12747_vm2, %v13456_v58  ;;  %11282 = vmatprep.mubr.msk.f32.mxu0 %vm12567_vm1, %v12568_v8 }
0x40e0   :  { %12004 = vmatprep.subr.bf16.mxu0 %v12566_v6 }
0x41b1   :  { %v6312_v14 = vpop.f32.mrb[42].mxu0 }
0x41b2   :  { %12407 = vtanh.f32 %v6312_v14  ;;  %v11259_v16 = vpop.f32.mrb[43].mxu0 }
0x41bc   :  { %v12408_v19 = vpop.eup %12407 }
0x41bd   :  { %6317 = vst.msk [vmem:[%s14116_s16 + $0x2] sm:$0x3] %vm806_vm11, %v12408_v19  ;;  %11269 = vmatmul.mubr.msk.f32.vlgmr.msra.gmra.mrb[80].mxu1 %vm83_vm0, %v12408_v19 }
0x41be   :  { %11991 = vmatpush3.bf16.xpose.msk.msra.mxu1 %vm12747_vm2, %v13451_v20  ;;  %11275 = vmatprep.mubr.msk.f32.mxu1 %vm12567_vm1, %v12568_v8 }
0x41bf   :  { %11996 = vmatprep.subr.bf16.mxu1 %v12566_v6 }
0x4290   :  { %v6388_v24 = vpop.f32.mrb[80].mxu1 }
0x4291   :  { %v6392_v62 = vadd.f32 %v6388_v24, %v6318_v21  ;;  %v11270_v25 = vpop.f32.mrb[81].mxu1 }
0x4293   :  { %12409 = vtanh.f32 %v6392_v62  ;;  %v10101_v27 = vmul.f32 -1.442695, %v6392_v62 }
0x4295   :  { %12411 = vpow2.f32 %v10101_v27 }
0x429d   :  { %v12410_v26 = vpop.eup %12409 }
0x429e   :  { %6402 = vrot.lane.b32.xlu0 %v12410_v26, %s12569_s21 }
0x429f   :  { %v12412_v30 = vpop.eup %12411 }
0x42a0   :  { %v6396_v50 = vadd.f32 1.0, %v12412_v30 }
0x42a2   :  { %12413 = vrcp.f32 %v6396_v50 }
0x42ac   :  { %v12414_v32 = vpop.eup %12413 }
0x42ad   :  { %v6400_v37 = vmul.f32 %v12414_v32, %v13570_v18 }
0x4310   :  { %v6403_v0 = vpop.permute.xlu0 %6402 }
0x4311   :  { %v6405_v33 = vmul.f32 %v12414_v32, %v6403_v0 }
0x4313   :  { %6407 = vrot.lane.b32.xlu1 %v6405_v33, %s12569_s21 }
0x4385   :  { %v6408_v35 = vpop.permute.xlu1 %6407 }
0x4386   :  { %v13645_v36 = vadd.f32 %v6408_v35, %v6400_v37 }
0x4388   :  { %12415 = vtanh.f32 %v13645_v36 }
0x4392   :  { %v12416_v48 = vpop.eup %12415 }
0x4393   :  { %6413 = vrot.lane.b32.xlu1 %v12416_v48, %s12569_s21 }
0x4405   :  { %v6414_v38 = vpop.permute.xlu1 %6413 }
0x4406   :  { %v6416_v46 = vmul.f32 %v12414_v32, %v6414_v38  ;;  %v6916_v38 = vld [vmem:[#allocation2 + $0x6] sm:$0x3] }
0x4408   :  { %v6424_v47 = vrot.slane %v6416_v46, %v12770_v51 }
0x440a   :  { %v6425_v53 = vcombine.high %v6424_v47, %v6424_v47  ;;  %v6432_v54 = vrot.slane %v6424_v47, %v12770_v51 }
0x440c   :  { %v6439_v56 = vrot.slane %v6425_v53, %v12770_v51  ;;  %v6443_v52 = vrot.slane %v6432_v54, %v12773_v55 }
0x440e   :  { %6444 = vrot.lane.b32.xlu0 %v6443_v52, %s12571_s29  ;;  %v6521_v18 = vrot.slane %v6439_v56, %v12773_v55 }
0x4410   :  { %6522 = vrot.lane.b32.xlu1 %v6521_v18, %s12571_s29 }
0x4480   :  { %v6445_v22 = vpop.permute.xlu0 %6444 }
0x4481   :  { %11276 = vmatmul.mubr.msk.f32.vlgmr.msra.gmra.mrb[82].mxu1 %vm83_vm0, %v6445_v22 }
0x4482   :  { %v6523_v59 = vpop.permute.xlu1 %6522  ;;  %11999 = vmatpush3.bf16.msk.msra.mxu1 %vm12815_vm8, %v12824_v31  ;;  %11289 = vmatprep.mubr.msk.f32.mxu1 %vm12567_vm1, %v12568_v8 }
0x4483   :  { %11283 = vmatmul.mubr.msk.f32.vlgmr.msra.gmra.mrb[44].mxu0 %vm83_vm0, %v6523_v59  ;;  %12000 = vmatprep.subr.bf16.mxu1 %v12566_v6 }
0x4484   :  { %12006 = vmatpush3.bf16.msra.mxu0 %v13502_v43  ;;  %11307 = vmatprep.mubr.msk.f32.mxu0 %vm12567_vm1, %v12568_v8 }
0x4485   :  { %12007 = vmatprep.subr.bf16.mxu0 %v12566_v6 }
0x4488   :  { %12009 = vmatpush3.bf16.msra.mxu0 %v13516_v42 }
0x4489   :  { %12010 = vmatprep.subr.bf16.mxu0 %v12566_v6 }
0x4554   :  { %v6514_v57 = vpop.f32.mrb[82].mxu1 }
0x4555   :  { %v6515_v12 = vadd.f32 %v6514_v57, %v12794_v1  ;;  %v11277_v15 = vpop.f32.mrb[83].mxu1 }
0x4556   :  { %v6592_v60 = vpop.f32.mrb[44].mxu0 }
0x4557   :  { %v6593_v45 = vadd.f32 %v6592_v60, %v12797_v3  ;;  %v11284_v61 = vpop.f32.mrb[45].mxu0  ;;  %v6596_v63 = vsel %vm477_vm5, %v6515_v12, -inf }
0x4558   :  { %6597 = vmax.xlane.f32.xlu0 %v6596_v63 }
0x4559   :  { %v6599_v2 = vsel %vm477_vm5, %v6593_v45, -inf }
0x455a   :  { %6600 = vmax.xlane.f32.xlu1 %v6599_v2 }
0x456b   :  { %6764 = vrot.lane.b32.xlu1 %v6416_v46, %s12571_s29 }
0x45e5   :  { %v6598_v4 = vpop.xlane.xlu0 %6597 }
0x45e6   :  { %v6602_v5 = vsub.f32 %v6515_v12, %v6598_v4 }
0x45e7   :  { %v6601_v7 = vpop.xlane.xlu1 %6600 }
0x45e8   :  { %v6604_v9 = vmul.f32 1.442695, %v6602_v5  ;;  %v6603_v10 = vsub.f32 %v6593_v45, %v6601_v7 }
0x45ea   :  { %12417 = vpow2.f32 %v6604_v9  ;;  %v6606_v41 = vmul.f32 1.442695, %v6603_v10 }
0x45eb   :  { %v6765_v11 = vpop.permute.xlu1 %6764 }
0x45ec   :  { %12419 = vpow2.f32 %v6606_v41  ;;  %11308 = vmatmul.mubr.msk.f32.vlgmr.msra.gmra.mrb[46].mxu0 %vm83_vm0, %v6765_v11 }
0x45ed   :  { %12012 = vmatpush3.bf16.msra.mxu0 %v13530_v49  ;;  %11318 = vmatprep.mubr.msk.f32.mxu0 %vm12567_vm1, %v12568_v8 }
0x45ee   :  { %12013 = vmatprep.subr.bf16.mxu0 %v12566_v6 }
0x45f1   :  { %12015 = vmatpush3.bf16.msra.mxu0 %v13544_v34 }
0x45f2   :  { %12026 = vmatprep.subr.bf16.mxu0 %v12566_v6 }
0x45f4   :  { %v12418_v39 = vpop.eup %12417 }
0x45f5   :  { %v6608_v13 = vsel %vm477_vm5, %v12418_v39, 0.0 }
0x45f6   :  { %v12420_v14 = vpop.eup %12419  ;;  %6609 = vadd.xlane.f32.xlu0 %v6608_v13 }
0x45f7   :  { %v6611_v16 = vsel %vm477_vm5, %v12420_v14, 0.0 }
0x45fa   :  { %6612 = vadd.xlane.f32.xlu0 %v6611_v16 }
0x4683   :  { %v6610_v19 = vpop.xlane.xlu0 %6609 }
0x4684   :  { %12421 = vrcp.f32 %v6610_v19 }
0x4687   :  { %v6613_v21 = vpop.xlane.xlu0 %6612 }
0x4688   :  { %12423 = vrcp.f32 %v6613_v21 }
0x468e   :  { %v12422_v24 = vpop.eup %12421 }
0x468f   :  { %v6616_v62 = vmul.f32 %v12422_v24, %v12418_v39 }
0x4691   :  { %11290 = vmatmul.mubr.msk.f32.vlgmr.msra.gmra.mrb[84].mxu1 %vm500_vm9, %v6616_v62 }
0x4692   :  { %v12424_v25 = vpop.eup %12423  ;;  %12003 = vmatpush3.bf16.msk.msra.mxu1 %vm12815_vm8, %v12819_v29  ;;  %11296 = vmatprep.mubr.msk.f32.mxu1 %vm12567_vm1, %v12568_v8 }
0x4693   :  { %v6617_v26 = vmul.f32 %v12424_v25, %v12420_v14  ;;  %12016 = vmatprep.subr.bf16.mxu1 %v12566_v6 }
0x4695   :  { %11297 = vmatmul.mubr.msk.f32.vlgmr.msra.gmra.mrb[86].mxu1 %vm500_vm9, %v6617_v26 }
0x4696   :  { %12018 = vmatpush3.bf16.msra.mxu1 %v13410_v17  ;;  %11329 = vmatprep.mubr.msk.f32.mxu1 %vm12567_vm1, %v12568_v8 }
0x4697   :  { %12019 = vmatprep.subr.bf16.mxu1 %v12566_v6 }
0x469a   :  { %12021 = vmatpush3.bf16.msra.mxu1 %v13420_v23 }
0x469b   :  { %12022 = vmatprep.subr.bf16.mxu1 %v12566_v6 }
0x4764   :  { %v6687_v27 = vpop.f32.mrb[84].mxu1 }
0x4765   :  { %v11291_v30 = vpop.f32.mrb[85].mxu1 }
0x4768   :  { %v6760_v50 = vpop.f32.mrb[86].mxu1 }
0x4769   :  { %v6840_v32 = vrot.slane %v6760_v50, 7  ;;  %v11298_v0 = vpop.f32.mrb[87].mxu1 }
0x476b   :  { %v6841_v33 = vsel %vm731_vm10, %v6840_v32, %v6687_v27 }
0x476c   :  { %11319 = vmatmul.mubr.msk.f32.vlgmr.msra.gmra.mrb[46].mxu0 %vm83_vm0, %v6841_v33 }
0x476d   :  { %12029 = vmatpush3.bf16.xpose.msk.msra.mxu0 %vm12747_vm2, %v13456_v58  ;;  %11343 = vmatprep.mubr.msk.f32.mxu0 %vm12567_vm1, %v12568_v8 }
0x476e   :  { %12038 = vmatprep.subr.bf16.mxu0 %v12566_v6 }
0x483f   :  { %v6910_v37 = vpop.f32.mrb[46].mxu0 }
0x4840   :  { %12425 = vtanh.f32 %v6910_v37  ;;  %v11320_v35 = vpop.f32.mrb[47].mxu0 }
0x484a   :  { %v12426_v48 = vpop.eup %12425 }
0x484b   :  { %6915 = vst.msk [vmem:[%s14116_s16 + $0x4] sm:$0x3] %vm806_vm11, %v12426_v48  ;;  %11330 = vmatmul.mubr.msk.f32.vlgmr.msra.gmra.mrb[88].mxu1 %vm83_vm0, %v12426_v48 }
0x484c   :  { %12025 = vmatpush3.bf16.xpose.msk.msra.mxu1 %vm12747_vm2, %v13451_v20  ;;  %11336 = vmatprep.mubr.msk.f32.mxu1 %vm12567_vm1, %v12568_v8 }
0x484d   :  { %12030 = vmatprep.subr.bf16.mxu1 %v12566_v6 }
0x491e   :  { %v6986_v46 = vpop.f32.mrb[88].mxu1 }
0x491f   :  { %v6990_v47 = vadd.f32 %v6986_v46, %v6916_v38  ;;  %v11331_v53 = vpop.f32.mrb[89].mxu1 }
0x4921   :  { %12427 = vtanh.f32 %v6990_v47  ;;  %v10115_v56 = vmul.f32 -1.442695, %v6990_v47 }
0x4923   :  { %12429 = vpow2.f32 %v10115_v56 }
0x492b   :  { %v12428_v54 = vpop.eup %12427 }
0x492c   :  { %7000 = vrot.lane.b32.xlu0 %v12428_v54, %s12569_s21 }
0x492d   :  { %v12430_v52 = vpop.eup %12429 }
0x492e   :  { %v6994_v18 = vadd.f32 1.0, %v12430_v52 }
0x4930   :  { %12431 = vrcp.f32 %v6994_v18 }
0x493a   :  { %v12432_v22 = vpop.eup %12431 }
0x493b   :  { %v6998_v12 = vmul.f32 %v12432_v22, %v13645_v36 }
0x499e   :  { %v7001_v59 = vpop.permute.xlu0 %7000 }
0x499f   :  { %v7003_v57 = vmul.f32 %v12432_v22, %v7001_v59 }
0x49a1   :  { %7005 = vrot.lane.b32.xlu1 %v7003_v57, %s12569_s21 }
0x4a13   :  { %v7006_v15 = vpop.permute.xlu1 %7005 }
0x4a14   :  { %v13720_v60 = vadd.f32 %v7006_v15, %v6998_v12 }
0x4a16   :  { %12433 = vtanh.f32 %v13720_v60 }
0x4a20   :  { %v12434_v45 = vpop.eup %12433 }
0x4a21   :  { %7011 = vrot.lane.b32.xlu1 %v12434_v45, %s12569_s21 }
0x4a93   :  { %v7012_v61 = vpop.permute.xlu1 %7011 }
0x4a94   :  { %v7014_v63 = vmul.f32 %v12432_v22, %v7012_v61  ;;  %v7514_v61 = vld [vmem:[#allocation2 + $0x8] sm:$0x3] }
0x4a96   :  { %v7022_v2 = vrot.slane %v7014_v63, %v12770_v51 }
0x4a98   :  { %v7023_v4 = vcombine.high %v7022_v2, %v7022_v2  ;;  %v7030_v5 = vrot.slane %v7022_v2, %v12770_v51 }
0x4a9a   :  { %v7037_v7 = vrot.slane %v7023_v4, %v12770_v51  ;;  %v7041_v9 = vrot.slane %v7030_v5, %v12773_v55 }
0x4a9c   :  { %7042 = vrot.lane.b32.xlu0 %v7041_v9, %s12571_s29  ;;  %v7119_v36 = vrot.slane %v7037_v7, %v12773_v55 }
0x4a9e   :  { %7120 = vrot.lane.b32.xlu1 %v7119_v36, %s12571_s29 }
0x4b0e   :  { %v7043_v10 = vpop.permute.xlu0 %7042 }
0x4b0f   :  { %11337 = vmatmul.mubr.msk.f32.vlgmr.msra.gmra.mrb[90].mxu1 %vm83_vm0, %v7043_v10 }
0x4b10   :  { %v7121_v41 = vpop.permute.xlu1 %7120  ;;  %12033 = vmatpush3.bf16.msk.msra.mxu1 %vm12815_vm8, %v12824_v31  ;;  %11350 = vmatprep.mubr.msk.f32.mxu1 %vm12567_vm1, %v12568_v8 }
0x4b11   :  { %11344 = vmatmul.mubr.msk.f32.vlgmr.msra.gmra.mrb[48].mxu0 %vm83_vm0, %v7121_v41  ;;  %12034 = vmatprep.subr.bf16.mxu1 %v12566_v6 }
0x4b12   :  { %12040 = vmatpush3.bf16.msra.mxu0 %v13502_v43  ;;  %11368 = vmatprep.mubr.msk.f32.mxu0 %vm12567_vm1, %v12568_v8 }
0x4b13   :  { %12041 = vmatprep.subr.bf16.mxu0 %v12566_v6 }
0x4b16   :  { %12043 = vmatpush3.bf16.msra.mxu0 %v13516_v42 }
0x4b17   :  { %12044 = vmatprep.subr.bf16.mxu0 %v12566_v6 }
0x4be2   :  { %v7112_v11 = vpop.f32.mrb[90].mxu1 }
0x4be3   :  { %v7113_v39 = vadd.f32 %v7112_v11, %v12794_v1  ;;  %v11338_v13 = vpop.f32.mrb[91].mxu1 }
0x4be4   :  { %v7190_v14 = vpop.f32.mrb[48].mxu0 }
0x4be5   :  { %v7191_v16 = vadd.f32 %v7190_v14, %v12797_v3  ;;  %v11345_v19 = vpop.f32.mrb[49].mxu0  ;;  %v7194_v21 = vsel %vm477_vm5, %v7113_v39, -inf }
0x4be6   :  { %7195 = vmax.xlane.f32.xlu0 %v7194_v21 }
0x4be7   :  { %v7197_v24 = vsel %vm477_vm5, %v7191_v16, -inf }
0x4be8   :  { %7198 = vmax.xlane.f32.xlu1 %v7197_v24 }
0x4bf9   :  { %7362 = vrot.lane.b32.xlu1 %v7014_v63, %s12571_s29 }
0x4c73   :  { %v7196_v62 = vpop.xlane.xlu0 %7195 }
0x4c74   :  { %v7200_v25 = vsub.f32 %v7113_v39, %v7196_v62 }
0x4c75   :  { %v7199_v26 = vpop.xlane.xlu1 %7198 }
0x4c76   :  { %v7202_v27 = vmul.f32 1.442695, %v7200_v25  ;;  %v7201_v30 = vsub.f32 %v7191_v16, %v7199_v26 }
0x4c78   :  { %12435 = vpow2.f32 %v7202_v27  ;;  %v7204_v50 = vmul.f32 1.442695, %v7201_v30 }
0x4c79   :  { %v7363_v32 = vpop.permute.xlu1 %7362 }
0x4c7a   :  { %12437 = vpow2.f32 %v7204_v50  ;;  %11369 = vmatmul.mubr.msk.f32.vlgmr.msra.gmra.mrb[50].mxu0 %vm83_vm0, %v7363_v32 }
0x4c7b   :  { %12046 = vmatpush3.bf16.msra.mxu0 %v13530_v49  ;;  %11379 = vmatprep.mubr.msk.f32.mxu0 %vm12567_vm1, %v12568_v8 }
0x4c7c   :  { %12047 = vmatprep.subr.bf16.mxu0 %v12566_v6 }
0x4c7f   :  { %12049 = vmatpush3.bf16.msra.mxu0 %v13544_v34 }
0x4c80   :  { %12060 = vmatprep.subr.bf16.mxu0 %v12566_v6 }
0x4c82   :  { %v12436_v0 = vpop.eup %12435 }
0x4c83   :  { %v7206_v33 = vsel %vm477_vm5, %v12436_v0, 0.0 }
0x4c84   :  { %v12438_v37 = vpop.eup %12437  ;;  %7207 = vadd.xlane.f32.xlu0 %v7206_v33 }
0x4c85   :  { %v7209_v35 = vsel %vm477_vm5, %v12438_v37, 0.0 }
0x4c88   :  { %7210 = vadd.xlane.f32.xlu0 %v7209_v35 }
0x4d11   :  { %v7208_v48 = vpop.xlane.xlu0 %7207 }
0x4d12   :  { %12439 = vrcp.f32 %v7208_v48 }
0x4d15   :  { %v7211_v38 = vpop.xlane.xlu0 %7210 }
0x4d16   :  { %12441 = vrcp.f32 %v7211_v38 }
0x4d1c   :  { %v12440_v46 = vpop.eup %12439 }
0x4d1d   :  { %v7214_v47 = vmul.f32 %v12440_v46, %v12436_v0 }
0x4d1f   :  { %11351 = vmatmul.mubr.msk.f32.vlgmr.msra.gmra.mrb[92].mxu1 %vm500_vm9, %v7214_v47 }
0x4d20   :  { %v12442_v53 = vpop.eup %12441  ;;  %12037 = vmatpush3.bf16.msk.msra.mxu1 %vm12815_vm8, %v12819_v29  ;;  %11357 = vmatprep.mubr.msk.f32.mxu1 %vm12567_vm1, %v12568_v8 }
0x4d21   :  { %v7215_v54 = vmul.f32 %v12442_v53, %v12438_v37  ;;  %12050 = vmatprep.subr.bf16.mxu1 %v12566_v6 }
0x4d23   :  { %11358 = vmatmul.mubr.msk.f32.vlgmr.msra.gmra.mrb[94].mxu1 %vm500_vm9, %v7215_v54 }
0x4d24   :  { %12052 = vmatpush3.bf16.msra.mxu1 %v13410_v17  ;;  %11390 = vmatprep.mubr.msk.f32.mxu1 %vm12567_vm1, %v12568_v8 }
0x4d25   :  { %12053 = vmatprep.subr.bf16.mxu1 %v12566_v6 }
0x4d28   :  { %12055 = vmatpush3.bf16.msra.mxu1 %v13420_v23 }
0x4d29   :  { %12056 = vmatprep.subr.bf16.mxu1 %v12566_v6 }
0x4df2   :  { %v7285_v56 = vpop.f32.mrb[92].mxu1 }
0x4df3   :  { %v11352_v52 = vpop.f32.mrb[93].mxu1 }
0x4df6   :  { %v7358_v18 = vpop.f32.mrb[94].mxu1 }
0x4df7   :  { %v7438_v22 = vrot.slane %v7358_v18, 7  ;;  %v11359_v59 = vpop.f32.mrb[95].mxu1 }
0x4df9   :  { %v7439_v57 = vsel %vm731_vm10, %v7438_v22, %v7285_v56 }
0x4dfa   :  { %11380 = vmatmul.mubr.msk.f32.vlgmr.msra.gmra.mrb[50].mxu0 %vm83_vm0, %v7439_v57 }
0x4dfb   :  { %12063 = vmatpush3.bf16.xpose.msk.msra.mxu0 %vm12747_vm2, %v13456_v58  ;;  %11404 = vmatprep.mubr.msk.f32.mxu0 %vm12567_vm1, %v12568_v8 }
0x4dfc   :  { %12072 = vmatprep.subr.bf16.mxu0 %v12566_v6 }
0x4ecd   :  { %v7508_v12 = vpop.f32.mrb[50].mxu0 }
0x4ece   :  { %12443 = vtanh.f32 %v7508_v12  ;;  %v11381_v15 = vpop.f32.mrb[51].mxu0 }
0x4ed8   :  { %v12444_v45 = vpop.eup %12443 }
0x4ed9   :  { %7513 = vst.msk [vmem:[%s14116_s16 + $0x6] sm:$0x3] %vm806_vm11, %v12444_v45  ;;  %11391 = vmatmul.mubr.msk.f32.vlgmr.msra.gmra.mrb[96].mxu1 %vm83_vm0, %v12444_v45 }
0x4eda   :  { %12059 = vmatpush3.bf16.xpose.msk.msra.mxu1 %vm12747_vm2, %v13451_v20  ;;  %11397 = vmatprep.mubr.msk.f32.mxu1 %vm12567_vm1, %v12568_v8 }
0x4edb   :  { %12064 = vmatprep.subr.bf16.mxu1 %v12566_v6 }
0x4fac   :  { %v7584_v63 = vpop.f32.mrb[96].mxu1 }
0x4fad   :  { %v7588_v2 = vadd.f32 %v7584_v63, %v7514_v61  ;;  %v11392_v4 = vpop.f32.mrb[97].mxu1 }
0x4faf   :  { %12445 = vtanh.f32 %v7588_v2  ;;  %v10129_v7 = vmul.f32 -1.442695, %v7588_v2 }
0x4fb1   :  { %12447 = vpow2.f32 %v10129_v7 }
0x4fb9   :  { %v12446_v5 = vpop.eup %12445 }
0x4fba   :  { %7598 = vrot.lane.b32.xlu0 %v12446_v5, %s12569_s21 }
0x4fbb   :  { %v12448_v9 = vpop.eup %12447 }
0x4fbc   :  { %v7592_v36 = vadd.f32 1.0, %v12448_v9 }
0x4fbe   :  { %12449 = vrcp.f32 %v7592_v36 }
0x4fc8   :  { %v12450_v10 = vpop.eup %12449 }
0x4fc9   :  { %v7596_v39 = vmul.f32 %v12450_v10, %v13720_v60 }
0x502c   :  { %v7599_v41 = vpop.permute.xlu0 %7598 }
0x502d   :  { %v7601_v11 = vmul.f32 %v12450_v10, %v7599_v41 }
0x502f   :  { %7603 = vrot.lane.b32.xlu1 %v7601_v11, %s12569_s21 }
0x50a1   :  { %v7604_v13 = vpop.permute.xlu1 %7603 }
0x50a2   :  { %v13795_v14 = vadd.f32 %v7604_v13, %v7596_v39 }
0x50a4   :  { %12451 = vtanh.f32 %v13795_v14 }
0x50ae   :  { %v12452_v16 = vpop.eup %12451 }
0x50af   :  { %7609 = vrot.lane.b32.xlu1 %v12452_v16, %s12569_s21 }
0x5121   :  { %v7610_v19 = vpop.permute.xlu1 %7609 }
0x5122   :  { %v7612_v21 = vmul.f32 %v12450_v10, %v7610_v19  ;;  %v8112_v19 = vld [vmem:[#allocation2 + $0xa] sm:$0x3] }
0x5124   :  { %v7620_v24 = vrot.slane %v7612_v21, %v12770_v51 }
0x5126   :  { %v7621_v62 = vcombine.high %v7620_v24, %v7620_v24  ;;  %v7628_v25 = vrot.slane %v7620_v24, %v12770_v51 }
0x5128   :  { %v7635_v26 = vrot.slane %v7621_v62, %v12770_v51  ;;  %v7639_v27 = vrot.slane %v7628_v25, %v12773_v55 }
0x512a   :  { %7640 = vrot.lane.b32.xlu0 %v7639_v27, %s12571_s29  ;;  %v7717_v60 = vrot.slane %v7635_v26, %v12773_v55 }
0x512c   :  { %7718 = vrot.lane.b32.xlu1 %v7717_v60, %s12571_s29 }
0x519c   :  { %v7641_v30 = vpop.permute.xlu0 %7640 }
0x519d   :  { %11398 = vmatmul.mubr.msk.f32.vlgmr.msra.gmra.mrb[98].mxu1 %vm83_vm0, %v7641_v30 }
0x519e   :  { %v7719_v50 = vpop.permute.xlu1 %7718  ;;  %12067 = vmatpush3.bf16.msk.msra.mxu1 %vm12815_vm8, %v12824_v31  ;;  %11411 = vmatprep.mubr.msk.f32.mxu1 %vm12567_vm1, %v12568_v8 }
0x519f   :  { %11405 = vmatmul.mubr.msk.f32.vlgmr.msra.gmra.mrb[52].mxu0 %vm83_vm0, %v7719_v50  ;;  %12068 = vmatprep.subr.bf16.mxu1 %v12566_v6 }
0x51a0   :  { %12074 = vmatpush3.bf16.msra.mxu0 %v13502_v43  ;;  %11429 = vmatprep.mubr.msk.f32.mxu0 %vm12567_vm1, %v12568_v8 }
0x51a1   :  { %12075 = vmatprep.subr.bf16.mxu0 %v12566_v6 }
0x51a4   :  { %12077 = vmatpush3.bf16.msra.mxu0 %v13516_v42 }
0x51a5   :  { %12078 = vmatprep.subr.bf16.mxu0 %v12566_v6 }
0x5270   :  { %v7710_v32 = vpop.f32.mrb[98].mxu1 }
0x5271   :  { %v7711_v0 = vadd.f32 %v7710_v32, %v12794_v1  ;;  %v11399_v33 = vpop.f32.mrb[99].mxu1 }
0x5272   :  { %v7788_v37 = vpop.f32.mrb[52].mxu0 }
0x5273   :  { %v7789_v35 = vadd.f32 %v7788_v37, %v12797_v3  ;;  %v11406_v48 = vpop.f32.mrb[53].mxu0  ;;  %v7792_v38 = vsel %vm477_vm5, %v7711_v0, -inf }
0x5274   :  { %7793 = vmax.xlane.f32.xlu0 %v7792_v38 }
0x5275   :  { %v7795_v46 = vsel %vm477_vm5, %v7789_v35, -inf }
0x5276   :  { %7796 = vmax.xlane.f32.xlu1 %v7795_v46 }
0x5287   :  { %7960 = vrot.lane.b32.xlu1 %v7612_v21, %s12571_s29 }
0x5301   :  { %v7794_v47 = vpop.xlane.xlu0 %7793 }
0x5302   :  { %v7798_v53 = vsub.f32 %v7711_v0, %v7794_v47 }
0x5303   :  { %v7797_v54 = vpop.xlane.xlu1 %7796 }
0x5304   :  { %v7800_v56 = vmul.f32 1.442695, %v7798_v53  ;;  %v7799_v52 = vsub.f32 %v7789_v35, %v7797_v54 }
0x5306   :  { %12453 = vpow2.f32 %v7800_v56  ;;  %v7802_v18 = vmul.f32 1.442695, %v7799_v52 }
0x5307   :  { %v7961_v22 = vpop.permute.xlu1 %7960 }
0x5308   :  { %12455 = vpow2.f32 %v7802_v18  ;;  %11430 = vmatmul.mubr.msk.f32.vlgmr.msra.gmra.mrb[54].mxu0 %vm83_vm0, %v7961_v22 }
0x5309   :  { %12080 = vmatpush3.bf16.msra.mxu0 %v13530_v49  ;;  %11440 = vmatprep.mubr.msk.f32.mxu0 %vm12567_vm1, %v12568_v8 }
0x530a   :  { %12081 = vmatprep.subr.bf16.mxu0 %v12566_v6 }
0x530d   :  { %12083 = vmatpush3.bf16.msra.mxu0 %v13544_v34 }
0x530e   :  { %12094 = vmatprep.subr.bf16.mxu0 %v12566_v6 }
0x5310   :  { %v12454_v59 = vpop.eup %12453 }
0x5311   :  { %v7804_v57 = vsel %vm477_vm5, %v12454_v59, 0.0 }
0x5312   :  { %v12456_v12 = vpop.eup %12455  ;;  %7805 = vadd.xlane.f32.xlu0 %v7804_v57 }
0x5313   :  { %v7807_v15 = vsel %vm477_vm5, %v12456_v12, 0.0 }
0x5316   :  { %7808 = vadd.xlane.f32.xlu0 %v7807_v15 }
0x539f   :  { %v7806_v45 = vpop.xlane.xlu0 %7805 }
0x53a0   :  { %12457 = vrcp.f32 %v7806_v45 }
0x53a3   :  { %v7809_v61 = vpop.xlane.xlu0 %7808 }
0x53a4   :  { %12459 = vrcp.f32 %v7809_v61 }
0x53aa   :  { %v12458_v63 = vpop.eup %12457 }
0x53ab   :  { %v7812_v2 = vmul.f32 %v12458_v63, %v12454_v59 }
0x53ad   :  { %11412 = vmatmul.mubr.msk.f32.vlgmr.msra.gmra.mrb[100].mxu1 %vm500_vm9, %v7812_v2 }
0x53ae   :  { %v12460_v4 = vpop.eup %12459  ;;  %12071 = vmatpush3.bf16.msk.msra.mxu1 %vm12815_vm8, %v12819_v29  ;;  %11418 = vmatprep.mubr.msk.f32.mxu1 %vm12567_vm1, %v12568_v8 }
0x53af   :  { %v7813_v5 = vmul.f32 %v12460_v4, %v12456_v12  ;;  %12084 = vmatprep.subr.bf16.mxu1 %v12566_v6 }
0x53b1   :  { %11419 = vmatmul.mubr.msk.f32.vlgmr.msra.gmra.mrb[102].mxu1 %vm500_vm9, %v7813_v5 }
0x53b2   :  { %12086 = vmatpush3.bf16.msra.mxu1 %v13410_v17  ;;  %11451 = vmatprep.mubr.msk.f32.mxu1 %vm12567_vm1, %v12568_v8 }
0x53b3   :  { %12087 = vmatprep.subr.bf16.mxu1 %v12566_v6 }
0x53b6   :  { %12089 = vmatpush3.bf16.msra.mxu1 %v13420_v23 }
0x53b7   :  { %12090 = vmatprep.subr.bf16.mxu1 %v12566_v6 }
0x5480   :  { %v7883_v7 = vpop.f32.mrb[100].mxu1 }
0x5481   :  { %v11413_v9 = vpop.f32.mrb[101].mxu1 }
0x5484   :  { %v7956_v36 = vpop.f32.mrb[102].mxu1 }
0x5485   :  { %v8036_v10 = vrot.slane %v7956_v36, 7  ;;  %v11420_v41 = vpop.f32.mrb[103].mxu1 }
0x5487   :  { %v8037_v11 = vsel %vm731_vm10, %v8036_v10, %v7883_v7 }
0x5488   :  { %11441 = vmatmul.mubr.msk.f32.vlgmr.msra.gmra.mrb[54].mxu0 %vm83_vm0, %v8037_v11 }
0x5489   :  { %12097 = vmatpush3.bf16.xpose.msk.msra.mxu0 %vm12747_vm2, %v13456_v58  ;;  %11465 = vmatprep.mubr.msk.f32.mxu0 %vm12567_vm1, %v12568_v8 }
0x548a   :  { %12106 = vmatprep.subr.bf16.mxu0 %v12566_v6 }
0x555b   :  { %v8106_v39 = vpop.f32.mrb[54].mxu0 }
0x555c   :  { %12461 = vtanh.f32 %v8106_v39  ;;  %v11442_v13 = vpop.f32.mrb[55].mxu0 }
0x5566   :  { %v12462_v16 = vpop.eup %12461 }
0x5567   :  { %8111 = vst.msk [vmem:[%s14116_s16 + $0x8] sm:$0x3] %vm806_vm11, %v12462_v16  ;;  %11452 = vmatmul.mubr.msk.f32.vlgmr.msra.gmra.mrb[104].mxu1 %vm83_vm0, %v12462_v16 }
0x5568   :  { %12093 = vmatpush3.bf16.xpose.msk.msra.mxu1 %vm12747_vm2, %v13451_v20  ;;  %11458 = vmatprep.mubr.msk.f32.mxu1 %vm12567_vm1, %v12568_v8 }
0x5569   :  { %12098 = vmatprep.subr.bf16.mxu1 %v12566_v6 }
0x563a   :  { %v8182_v21 = vpop.f32.mrb[104].mxu1 }
0x563b   :  { %v8186_v24 = vadd.f32 %v8182_v21, %v8112_v19  ;;  %v11453_v62 = vpop.f32.mrb[105].mxu1 }
0x563d   :  { %12463 = vtanh.f32 %v8186_v24  ;;  %v10143_v26 = vmul.f32 -1.442695, %v8186_v24 }
0x563f   :  { %12465 = vpow2.f32 %v10143_v26 }
0x5647   :  { %v12464_v25 = vpop.eup %12463 }
0x5648   :  { %8196 = vrot.lane.b32.xlu0 %v12464_v25, %s12569_s21 }
0x5649   :  { %v12466_v27 = vpop.eup %12465 }
0x564a   :  { %v8190_v60 = vadd.f32 1.0, %v12466_v27 }
0x564c   :  { %12467 = vrcp.f32 %v8190_v60 }
0x5656   :  { %v12468_v30 = vpop.eup %12467 }
0x5657   :  { %v8194_v0 = vmul.f32 %v12468_v30, %v13795_v14 }
0x56ba   :  { %v8197_v50 = vpop.permute.xlu0 %8196 }
0x56bb   :  { %v8199_v32 = vmul.f32 %v12468_v30, %v8197_v50 }
0x56bd   :  { %8201 = vrot.lane.b32.xlu1 %v8199_v32, %s12569_s21 }
0x572f   :  { %v8202_v33 = vpop.permute.xlu1 %8201 }
0x5730   :  { %v13870_v37 = vadd.f32 %v8202_v33, %v8194_v0 }
0x5732   :  { %12469 = vtanh.f32 %v13870_v37 }
0x573c   :  { %v12470_v35 = vpop.eup %12469 }
0x573d   :  { %8207 = vrot.lane.b32.xlu1 %v12470_v35, %s12569_s21 }
0x57af   :  { %v8208_v48 = vpop.permute.xlu1 %8207 }
0x57b0   :  { %v8210_v38 = vmul.f32 %v12468_v30, %v8208_v48  ;;  %v8710_v48 = vld [vmem:[#allocation2 + $0xc] sm:$0x3] }
0x57b2   :  { %v8218_v46 = vrot.slane %v8210_v38, %v12770_v51 }
0x57b4   :  { %v8219_v47 = vcombine.high %v8218_v46, %v8218_v46  ;;  %v8226_v53 = vrot.slane %v8218_v46, %v12770_v51 }
0x57b6   :  { %v8233_v54 = vrot.slane %v8219_v47, %v12770_v51  ;;  %v8237_v56 = vrot.slane %v8226_v53, %v12773_v55 }
0x57b8   :  { %8238 = vrot.lane.b32.xlu0 %v8237_v56, %s12571_s29  ;;  %v8315_v14 = vrot.slane %v8233_v54, %v12773_v55 }
0x57ba   :  { %8316 = vrot.lane.b32.xlu1 %v8315_v14, %s12571_s29 }
0x582a   :  { %v8239_v52 = vpop.permute.xlu0 %8238 }
0x582b   :  { %11459 = vmatmul.mubr.msk.f32.vlgmr.msra.gmra.mrb[106].mxu1 %vm83_vm0, %v8239_v52 }
0x582c   :  { %v8317_v18 = vpop.permute.xlu1 %8316  ;;  %12101 = vmatpush3.bf16.msk.msra.mxu1 %vm12815_vm8, %v12824_v31  ;;  %11472 = vmatprep.mubr.msk.f32.mxu1 %vm12567_vm1, %v12568_v8 }
0x582d   :  { %11466 = vmatmul.mubr.msk.f32.vlgmr.msra.gmra.mrb[56].mxu0 %vm83_vm0, %v8317_v18  ;;  %12102 = vmatprep.subr.bf16.mxu1 %v12566_v6 }
0x582e   :  { %12108 = vmatpush3.bf16.msra.mxu0 %v13502_v43  ;;  %11490 = vmatprep.mubr.msk.f32.mxu0 %vm12567_vm1, %v12568_v8 }
0x582f   :  { %12109 = vmatprep.subr.bf16.mxu0 %v12566_v6 }
0x5832   :  { %12111 = vmatpush3.bf16.msra.mxu0 %v13516_v42 }
0x5833   :  { %12112 = vmatprep.subr.bf16.mxu0 %v12566_v6 }
0x58fe   :  { %v8308_v22 = vpop.f32.mrb[106].mxu1 }
0x58ff   :  { %v8309_v59 = vadd.f32 %v8308_v22, %v12794_v1  ;;  %v11460_v57 = vpop.f32.mrb[107].mxu1 }
0x5900   :  { %v8386_v12 = vpop.f32.mrb[56].mxu0 }
0x5901   :  { %v8387_v15 = vadd.f32 %v8386_v12, %v12797_v3  ;;  %v11467_v45 = vpop.f32.mrb[57].mxu0  ;;  %v8390_v61 = vsel %vm477_vm5, %v8309_v59, -inf }
0x5902   :  { %8391 = vmax.xlane.f32.xlu0 %v8390_v61 }
0x5903   :  { %v8393_v63 = vsel %vm477_vm5, %v8387_v15, -inf }
0x5904   :  { %8394 = vmax.xlane.f32.xlu1 %v8393_v63 }
0x5915   :  { %8558 = vrot.lane.b32.xlu1 %v8210_v38, %s12571_s29 }
0x598f   :  { %v8392_v2 = vpop.xlane.xlu0 %8391 }
0x5990   :  { %v8396_v4 = vsub.f32 %v8309_v59, %v8392_v2 }
0x5991   :  { %v8395_v5 = vpop.xlane.xlu1 %8394 }
0x5992   :  { %v8398_v7 = vmul.f32 1.442695, %v8396_v4  ;;  %v8397_v9 = vsub.f32 %v8387_v15, %v8395_v5 }
0x5994   :  { %12471 = vpow2.f32 %v8398_v7  ;;  %v8400_v36 = vmul.f32 1.442695, %v8397_v9 }
0x5995   :  { %v8559_v10 = vpop.permute.xlu1 %8558 }
0x5996   :  { %12473 = vpow2.f32 %v8400_v36  ;;  %11491 = vmatmul.mubr.msk.f32.vlgmr.msra.gmra.mrb[58].mxu0 %vm83_vm0, %v8559_v10 }
0x5997   :  { %12114 = vmatpush3.bf16.msra.mxu0 %v13530_v49  ;;  %11501 = vmatprep.mubr.msk.f32.mxu0 %vm12567_vm1, %v12568_v8 }
0x5998   :  { %12115 = vmatprep.subr.bf16.mxu0 %v12566_v6 }
0x599b   :  { %12117 = vmatpush3.bf16.msra.mxu0 %v13544_v34 }
0x599c   :  { %12128 = vmatprep.subr.bf16.mxu0 %v12566_v6 }
0x599e   :  { %v12472_v41 = vpop.eup %12471 }
0x599f   :  { %v8402_v11 = vsel %vm477_vm5, %v12472_v41, 0.0 }
0x59a0   :  { %v12474_v39 = vpop.eup %12473  ;;  %8403 = vadd.xlane.f32.xlu0 %v8402_v11 }
0x59a1   :  { %v8405_v13 = vsel %vm477_vm5, %v12474_v39, 0.0 }
0x59a4   :  { %8406 = vadd.xlane.f32.xlu0 %v8405_v13 }
0x5a2d   :  { %v8404_v16 = vpop.xlane.xlu0 %8403 }
0x5a2e   :  { %12475 = vrcp.f32 %v8404_v16 }
0x5a31   :  { %v8407_v19 = vpop.xlane.xlu0 %8406 }
0x5a32   :  { %12477 = vrcp.f32 %v8407_v19 }
0x5a38   :  { %v12476_v21 = vpop.eup %12475 }
0x5a39   :  { %v8410_v24 = vmul.f32 %v12476_v21, %v12472_v41 }
0x5a3b   :  { %11473 = vmatmul.mubr.msk.f32.vlgmr.msra.gmra.mrb[108].mxu1 %vm500_vm9, %v8410_v24 }
0x5a3c   :  { %v12478_v62 = vpop.eup %12477  ;;  %12105 = vmatpush3.bf16.msk.msra.mxu1 %vm12815_vm8, %v12819_v29  ;;  %11479 = vmatprep.mubr.msk.f32.mxu1 %vm12567_vm1, %v12568_v8 }
0x5a3d   :  { %v8411_v25 = vmul.f32 %v12478_v62, %v12474_v39  ;;  %12118 = vmatprep.subr.bf16.mxu1 %v12566_v6 }
0x5a3f   :  { %11480 = vmatmul.mubr.msk.f32.vlgmr.msra.gmra.mrb[110].mxu1 %vm500_vm9, %v8411_v25 }
0x5a40   :  { %12120 = vmatpush3.bf16.msra.mxu1 %v13410_v17  ;;  %11512 = vmatprep.mubr.msk.f32.mxu1 %vm12567_vm1, %v12568_v8 }
0x5a41   :  { %12121 = vmatprep.subr.bf16.mxu1 %v12566_v6 }
0x5a44   :  { %12123 = vmatpush3.bf16.msra.mxu1 %v13420_v23 }
0x5a45   :  { %12124 = vmatprep.subr.bf16.mxu1 %v12566_v6 }
0x5b0e   :  { %v8481_v26 = vpop.f32.mrb[108].mxu1 }
0x5b0f   :  { %v11474_v27 = vpop.f32.mrb[109].mxu1 }
0x5b12   :  { %v8554_v60 = vpop.f32.mrb[110].mxu1 }
0x5b13   :  { %v8634_v30 = vrot.slane %v8554_v60, 7  ;;  %v11481_v50 = vpop.f32.mrb[111].mxu1 }
0x5b15   :  { %v8635_v32 = vsel %vm731_vm10, %v8634_v30, %v8481_v26 }
0x5b16   :  { %11502 = vmatmul.mubr.msk.f32.vlgmr.msra.gmra.mrb[58].mxu0 %vm83_vm0, %v8635_v32 }
0x5b17   :  { %12131 = vmatpush3.bf16.xpose.msk.msra.mxu0 %vm12747_vm2, %v13456_v58  ;;  %11526 = vmatprep.mubr.msk.f32.mxu0 %vm12567_vm1, %v12568_v8 }
0x5b18   :  { %12140 = vmatprep.subr.bf16.mxu0 %v12566_v6 }
0x5be9   :  { %v8704_v0 = vpop.f32.mrb[58].mxu0 }
0x5bea   :  { %12479 = vtanh.f32 %v8704_v0  ;;  %v11503_v33 = vpop.f32.mrb[59].mxu0 }
0x5bf4   :  { %v12480_v35 = vpop.eup %12479 }
0x5bf5   :  { %8709 = vst.msk [vmem:[%s14116_s16 + $0xa] sm:$0x3] %vm806_vm11, %v12480_v35  ;;  %11513 = vmatmul.mubr.msk.f32.vlgmr.msra.gmra.mrb[112].mxu1 %vm83_vm0, %v12480_v35 }
0x5bf6   :  { %12127 = vmatpush3.bf16.xpose.msk.msra.mxu1 %vm12747_vm2, %v13451_v20  ;;  %11519 = vmatprep.mubr.msk.f32.mxu1 %vm12567_vm1, %v12568_v8 }
0x5bf7   :  { %12132 = vmatprep.subr.bf16.mxu1 %v12566_v6 }
0x5cc8   :  { %v8780_v38 = vpop.f32.mrb[112].mxu1 }
0x5cc9   :  { %v8784_v46 = vadd.f32 %v8780_v38, %v8710_v48  ;;  %v11514_v47 = vpop.f32.mrb[113].mxu1 }
0x5ccb   :  { %12481 = vtanh.f32 %v8784_v46  ;;  %v10157_v54 = vmul.f32 -1.442695, %v8784_v46 }
0x5ccd   :  { %12483 = vpow2.f32 %v10157_v54 }
0x5cd5   :  { %v12482_v53 = vpop.eup %12481 }
0x5cd6   :  { %8794 = vrot.lane.b32.xlu0 %v12482_v53, %s12569_s21 }
0x5cd7   :  { %v12484_v56 = vpop.eup %12483 }
0x5cd8   :  { %v8788_v14 = vadd.f32 1.0, %v12484_v56 }
0x5cda   :  { %12485 = vrcp.f32 %v8788_v14 }
0x5ce4   :  { %v12486_v52 = vpop.eup %12485 }
0x5ce5   :  { %v8792_v59 = vmul.f32 %v12486_v52, %v13870_v37 }
0x5d48   :  { %v8795_v18 = vpop.permute.xlu0 %8794 }
0x5d49   :  { %v8797_v22 = vmul.f32 %v12486_v52, %v8795_v18 }
0x5d4b   :  { %8799 = vrot.lane.b32.xlu1 %v8797_v22, %s12569_s21 }
0x5dbd   :  { %v8800_v57 = vpop.permute.xlu1 %8799 }
0x5dbe   :  { %v13945_v12 = vadd.f32 %v8800_v57, %v8792_v59 }
0x5dc0   :  { %12487 = vtanh.f32 %v13945_v12 }
0x5dca   :  { %v12488_v15 = vpop.eup %12487 }
0x5dcb   :  { %8805 = vrot.lane.b32.xlu1 %v12488_v15, %s12569_s21 }
0x5e3d   :  { %v8806_v45 = vpop.permute.xlu1 %8805 }
0x5e3e   :  { %v8808_v61 = vmul.f32 %v12486_v52, %v8806_v45 }
0x5e40   :  { %v8816_v63 = vrot.slane %v8808_v61, %v12770_v51 }
0x5e42   :  { %v8817_v2 = vcombine.high %v8816_v63, %v8816_v63  ;;  %v8824_v4 = vrot.slane %v8816_v63, %v12770_v51 }
0x5e44   :  { %v8831_v5 = vrot.slane %v8817_v2, %v12770_v51  ;;  %v8835_v7 = vrot.slane %v8824_v4, %v12773_v55 }
0x5e46   :  { %8836 = vrot.lane.b32.xlu0 %v8835_v7, %s12571_s29  ;;  %v8913_v37 = vrot.slane %v8831_v5, %v12773_v55 }
0x5e48   :  { %8914 = vrot.lane.b32.xlu1 %v8913_v37, %s12571_s29 }
0x5eb8   :  { %v8837_v9 = vpop.permute.xlu0 %8836 }
0x5eb9   :  { %11520 = vmatmul.mubr.msk.f32.vlgmr.msra.gmra.mrb[114].mxu1 %vm83_vm0, %v8837_v9 }
0x5eba   :  { %v8915_v36 = vpop.permute.xlu1 %8914  ;;  %12135 = vmatpush3.bf16.msk.msra.mxu1 %vm12815_vm8, %v12824_v31  ;;  %11533 = vmatprep.mubr.msk.f32.mxu1 %vm12567_vm1, %v12568_v8 }
0x5ebb   :  { %11527 = vmatmul.mubr.msk.f32.vlgmr.msra.gmra.mrb[60].mxu0 %vm83_vm0, %v8915_v36  ;;  %12136 = vmatprep.subr.bf16.mxu1 %v12566_v6 }
0x5ebc   :  { %12142 = vmatpush3.bf16.msra.mxu0 %v13502_v43  ;;  %11551 = vmatprep.mubr.msk.f32.mxu0 %vm12567_vm1, %v12568_v8 }
0x5ebd   :  { %12143 = vmatprep.subr.bf16.mxu0 %v12566_v6 }
0x5ec0   :  { %12145 = vmatpush3.bf16.msra.mxu0 %v13516_v42 }
0x5ec1   :  { %12146 = vmatprep.subr.bf16.mxu0 %v12566_v6 }
0x5f8c   :  { %v8906_v10 = vpop.f32.mrb[114].mxu1 }
0x5f8d   :  { %v8907_v41 = vadd.f32 %v8906_v10, %v12794_v1  ;;  %v11521_v11 = vpop.f32.mrb[115].mxu1 }
0x5f8e   :  { %v8984_v39 = vpop.f32.mrb[60].mxu0 }
0x5f8f   :  { %v8985_v13 = vadd.f32 %v8984_v39, %v12797_v3  ;;  %v11528_v16 = vpop.f32.mrb[61].mxu0  ;;  %v8988_v19 = vsel %vm477_vm5, %v8907_v41, -inf }
0x5f90   :  { %8989 = vmax.xlane.f32.xlu0 %v8988_v19 }
0x5f91   :  { %v8991_v21 = vsel %vm477_vm5, %v8985_v13, -inf }
0x5f92   :  { %8992 = vmax.xlane.f32.xlu1 %v8991_v21 }
0x5fa3   :  { %9156 = vrot.lane.b32.xlu1 %v8808_v61, %s12571_s29 }
0x601d   :  { %v8990_v24 = vpop.xlane.xlu0 %8989 }
0x601e   :  { %v8994_v62 = vsub.f32 %v8907_v41, %v8990_v24 }
0x601f   :  { %v8993_v25 = vpop.xlane.xlu1 %8992 }
0x6020   :  { %v8996_v26 = vmul.f32 1.442695, %v8994_v62  ;;  %v8995_v27 = vsub.f32 %v8985_v13, %v8993_v25 }
0x6022   :  { %12489 = vpow2.f32 %v8996_v26  ;;  %v8998_v60 = vmul.f32 1.442695, %v8995_v27 }
0x6023   :  { %v9157_v30 = vpop.permute.xlu1 %9156 }
0x6024   :  { %12491 = vpow2.f32 %v8998_v60  ;;  %11552 = vmatmul.mubr.msk.f32.vlgmr.msra.gmra.mrb[62].mxu0 %vm83_vm0, %v9157_v30 }
0x6025   :  { %12148 = vmatpush3.bf16.msra.mxu0 %v13530_v49  ;;  %11562 = vmatprep.mubr.msk.f32.mxu0 %vm12567_vm1, %v12568_v8 }
0x6026   :  { %12149 = vmatprep.subr.bf16.mxu0 %v12566_v6 }
0x6029   :  { %12151 = vmatpush3.bf16.msra.mxu0 %v13544_v34 }
0x602a   :  { %12162 = vmatprep.subr.bf16.mxu0 %v12566_v6 }
0x602c   :  { %v12490_v50 = vpop.eup %12489 }
0x602d   :  { %v9000_v32 = vsel %vm477_vm5, %v12490_v50, 0.0 }
0x602e   :  { %v12492_v0 = vpop.eup %12491  ;;  %9001 = vadd.xlane.f32.xlu0 %v9000_v32 }
0x602f   :  { %v9003_v33 = vsel %vm477_vm5, %v12492_v0, 0.0 }
0x6032   :  { %9004 = vadd.xlane.f32.xlu0 %v9003_v33 }
0x60bb   :  { %v9002_v35 = vpop.xlane.xlu0 %9001 }
0x60bc   :  { %12493 = vrcp.f32 %v9002_v35 }
0x60bf   :  { %v9005_v48 = vpop.xlane.xlu0 %9004 }
0x60c0   :  { %12495 = vrcp.f32 %v9005_v48 }
0x60c6   :  { %v12494_v38 = vpop.eup %12493 }
0x60c7   :  { %v9008_v46 = vmul.f32 %v12494_v38, %v12490_v50 }
0x60c9   :  { %11534 = vmatmul.mubr.msk.f32.vlgmr.msra.gmra.mrb[116].mxu1 %vm500_vm9, %v9008_v46 }
0x60ca   :  { %v12496_v47 = vpop.eup %12495  ;;  %12139 = vmatpush3.bf16.msk.msra.mxu1 %vm12815_vm8, %v12819_v29  ;;  %11540 = vmatprep.mubr.msk.f32.mxu1 %vm12567_vm1, %v12568_v8 }
0x60cb   :  { %v9009_v53 = vmul.f32 %v12496_v47, %v12492_v0  ;;  %12152 = vmatprep.subr.bf16.mxu1 %v12566_v6 }
0x60cd   :  { %11541 = vmatmul.mubr.msk.f32.vlgmr.msra.gmra.mrb[118].mxu1 %vm500_vm9, %v9009_v53 }
0x60ce   :  { %12154 = vmatpush3.bf16.msra.mxu1 %v13410_v17  ;;  %11573 = vmatprep.mubr.msk.f32.mxu1 %vm12567_vm1, %v12568_v8 }
0x60cf   :  { %12155 = vmatprep.subr.bf16.mxu1 %v12566_v6 }
0x60d2   :  { %12157 = vmatpush3.bf16.msra.mxu1 %v13420_v23 }
0x60d3   :  { %12158 = vmatprep.subr.bf16.mxu1 %v12566_v6 }
0x619c   :  { %v9079_v54 = vpop.f32.mrb[116].mxu1 }
0x619d   :  { %v11535_v56 = vpop.f32.mrb[117].mxu1 }
0x61a0   :  { %v9152_v14 = vpop.f32.mrb[118].mxu1 }
0x61a1   :  { %v9232_v52 = vrot.slane %v9152_v14, 7  ;;  %v11542_v18 = vpop.f32.mrb[119].mxu1 }
0x61a3   :  { %v9233_v22 = vsel %vm731_vm10, %v9232_v52, %v9079_v54 }
0x61a4   :  { %11563 = vmatmul.mubr.msk.f32.vlgmr.msra.gmra.mrb[62].mxu0 %vm83_vm0, %v9233_v22 }
0x61a5   :  { %12165 = vmatpush3.bf16.xpose.msk.msra.mxu0 %vm12747_vm2, %v13456_v58  ;;  %11587 = vmatprep.mubr.msk.f32.mxu0 %vm12567_vm1, %v12568_v8  ;;  %v9308_v58 = vld [vmem:[#allocation2 + $0xe] sm:$0x3] }
0x61a6   :  { %12174 = vmatprep.subr.bf16.mxu0 %v12566_v6 }
0x6277   :  { %v9302_v17 = vpop.f32.mrb[62].mxu0 }
0x6278   :  { %12497 = vtanh.f32 %v9302_v17  ;;  %v11564_v23 = vpop.f32.mrb[63].mxu0 }
0x6282   :  { %v12498_v59 = vpop.eup %12497 }
0x6283   :  { %9307 = vst.msk [vmem:[%s14116_s16 + $0xc] sm:$0x3] %vm806_vm11, %v12498_v59  ;;  %11574 = vmatmul.mubr.msk.f32.vlgmr.msra.gmra.mrb[120].mxu1 %vm83_vm0, %v12498_v59 }
0x6284   :  { %12161 = vmatpush3.bf16.xpose.msk.msra.mxu1 %vm12747_vm2, %v13451_v20  ;;  %11580 = vmatprep.mubr.msk.f32.mxu1 %vm12567_vm1, %v12568_v8 }
0x6285   :  { %12166 = vmatprep.subr.bf16.mxu1 %v12566_v6 }
0x6356   :  { %v9378_v57 = vpop.f32.mrb[120].mxu1 }
0x6357   :  { %v9382_v15 = vadd.f32 %v9378_v57, %v9308_v58  ;;  %v11575_v45 = vpop.f32.mrb[121].mxu1 }
0x6359   :  { %12499 = vtanh.f32 %v9382_v15  ;;  %v10171_v63 = vmul.f32 -1.442695, %v9382_v15 }
0x635b   :  { %12501 = vpow2.f32 %v10171_v63 }
0x6363   :  { %v12500_v61 = vpop.eup %12499 }
0x6364   :  { %9392 = vrot.lane.b32.xlu0 %v12500_v61, %s12569_s21 }
0x6365   :  { %v12502_v2 = vpop.eup %12501 }
0x6366   :  { %v9386_v4 = vadd.f32 1.0, %v12502_v2 }
0x6368   :  { %12503 = vrcp.f32 %v9386_v4 }
0x6372   :  { %v12504_v40 = vpop.eup %12503 }
0x6373   :  { %v9390_v7 = vmul.f32 %v12504_v40, %v13945_v12 }
0x63d6   :  { %v9393_v20 = vpop.permute.xlu0 %9392 }
0x63d7   :  { %v9395_v5 = vmul.f32 %v12504_v40, %v9393_v20 }
0x63d9   :  { %9397 = vrot.lane.b32.xlu1 %v9395_v5, %s12569_s21 }
0x644b   :  { %v9398_v37 = vpop.permute.xlu1 %9397 }
0x644c   :  { %v9400_v9 = vadd.f32 %v9398_v37, %v9390_v7 }
0x644e   :  { %12505 = vtanh.f32 %v9400_v9 }
0x6458   :  { %v12506_v36 = vpop.eup %12505 }
0x6459   :  { %9403 = vrot.lane.b32.xlu1 %v12506_v36, %s12569_s21 }
0x64cb   :  { %v9404_v10 = vpop.permute.xlu1 %9403 }
0x64cc   :  { %v9406_v41 = vmul.f32 %v12504_v40, %v9404_v10 }
0x64ce   :  { %v9414_v11 = vrot.slane %v9406_v41, %v12770_v51 }
0x64d0   :  { %v9415_v39 = vcombine.high %v9414_v11, %v9414_v11  ;;  %v9422_v13 = vrot.slane %v9414_v11, %v12770_v51 }
0x64d2   :  { %v9429_v16 = vrot.slane %v9415_v39, %v12770_v51  ;;  %v9433_v19 = vrot.slane %v9422_v13, %v12773_v55 }
0x64d4   :  { %9434 = vrot.lane.b32.xlu0 %v9433_v19, %s12571_s29  ;;  %v9511_v12 = vrot.slane %v9429_v16, %v12773_v55 }
0x64d6   :  { %9512 = vrot.lane.b32.xlu1 %v9511_v12, %s12571_s29 }
0x6546   :  { %v9435_v21 = vpop.permute.xlu0 %9434 }
0x6547   :  { %11581 = vmatmul.mubr.msk.f32.vlgmr.msra.gmra.mrb[122].mxu1 %vm83_vm0, %v9435_v21 }
0x6548   :  { %v9513_v24 = vpop.permute.xlu1 %9512  ;;  %12169 = vmatpush3.bf16.msk.msra.mxu1 %vm12815_vm8, %v12824_v31  ;;  %11594 = vmatprep.mubr.msk.f32.mxu1 %vm12567_vm1, %v12568_v8 }
0x6549   :  { %11588 = vmatmul.mubr.msk.f32.vlgmr.msra.gmra.mrb[64].mxu0 %vm83_vm0, %v9513_v24  ;;  %12170 = vmatprep.subr.bf16.mxu1 %v12566_v6 }
0x654a   :  { %12176 = vmatpush3.bf16.msra.mxu0 %v13502_v43  ;;  %11612 = vmatprep.mubr.msk.f32.mxu0 %vm12567_vm1, %v12568_v8 }
0x654b   :  { %12177 = vmatprep.subr.bf16.mxu0 %v12566_v6 }
0x654e   :  { %12179 = vmatpush3.bf16.msra.mxu0 %v13516_v42 }
0x654f   :  { %12180 = vmatprep.subr.bf16.mxu0 %v12566_v6 }
0x661a   :  { %v9504_v51 = vpop.f32.mrb[122].mxu1 }
0x661b   :  { %v9505_v55 = vadd.f32 %v9504_v51, %v12794_v1  ;;  %v11582_v31 = vpop.f32.mrb[123].mxu1 }
0x661c   :  { %v9582_v62 = vpop.f32.mrb[64].mxu0 }
0x661d   :  { %v9583_v25 = vadd.f32 %v9582_v62, %v12797_v3  ;;  %v11589_v26 = vpop.f32.mrb[65].mxu0  ;;  %v9586_v27 = vsel %vm477_vm5, %v9505_v55, -inf }
0x661e   :  { %9587 = vmax.xlane.f32.xlu0 %v9586_v27 }
0x661f   :  { %v9589_v43 = vsel %vm477_vm5, %v9583_v25, -inf }
0x6620   :  { %9590 = vmax.xlane.f32.xlu1 %v9589_v43 }
0x6631   :  { %9754 = vrot.lane.b32.xlu1 %v9406_v41, %s12571_s29  ;;  %s12574_s29 = smov [#allocation6]  }
0x6632   :  { %s9933_s19 = sshll.u32 %s12574_s29, 4  ;;  %s9934_s19 = int_to_ptr.vmem [resolvable:$true] %s9933_s19 }
0x6633   :  { %s12518_s11 = scalar_lea.vmem %s9934_s19, 64  ;;  %p12523_p1 = scmp.lt.s32.totalorder %s9934_s19, %s9934_s19 }
0x6634   :  { %p12519_p0 = scmp.ne.s32.totalorder %s9934_s19, %s12518_s11  ;;  %p12524_p2 = scmp.lt.s32.totalorder %s12518_s11, %s12518_s11 }
0x6635   :  { %9909 = vrot.lane.b32.xlu1 %v9400_v9, %s12573_s0 }
0x6636   :  { %p12525_p3 = por %p12524_p2, %p12523_p1 }
0x6638   :  { %p12526_p4 = pnand %p12525_p3, %p12519_p0 }
0x66ab   :  { %v9588_v42 = vpop.xlane.xlu0 %9587 }
0x66ac   :  { %v9592_v60 = vsub.f32 %v9505_v55, %v9588_v42 }
0x66ad   :  { %v9591_v30 = vpop.xlane.xlu1 %9590 }
0x66ae   :  { %v9594_v50 = vmul.f32 1.442695, %v9592_v60  ;;  %v9593_v1 = vsub.f32 %v9583_v25, %v9591_v30 }
0x66b0   :  { %12507 = vpow2.f32 %v9594_v50  ;;  %v9596_v32 = vmul.f32 1.442695, %v9593_v1 }
0x66b1   :  { %v9755_v0 = vpop.permute.xlu1 %9754 }
0x66b2   :  { %12509 = vpow2.f32 %v9596_v32  ;;  %11613 = vmatmul.mubr.msk.f32.vlgmr.msra.gmra.mrb[66].mxu0 %vm83_vm0, %v9755_v0 }
0x66b3   :  { %12182 = vmatpush3.bf16.msra.mxu0 %v13530_v49  ;;  %11623 = vmatprep.mubr.msk.f32.mxu0 %vm12567_vm1, %v12568_v8 }
0x66b4   :  { %12183 = vmatprep.subr.bf16.mxu0 %v12566_v6 }
0x66b5   :  { %v9910_v3 = vpop.permute.xlu1 %9909 }
0x66b6   :  { %9913 = vst.msk [vmem:[#allocation6 + $0x2] sm:$0x3] %vm806_vm11, %v9910_v3 }
0x66b7   :  { %12185 = vmatpush3.bf16.msra.mxu0 %v13544_v34 }
0x66ba   :  { %v12508_v33 = vpop.eup %12507 }
0x66bb   :  { %v9598_v35 = vsel %vm477_vm5, %v12508_v33, 0.0 }
0x66bc   :  { %v12510_v48 = vpop.eup %12509  ;;  %9599 = vadd.xlane.f32.xlu0 %v9598_v35 }
0x66bd   :  { %v9601_v38 = vsel %vm477_vm5, %v12510_v48, 0.0 }
0x66c0   :  { %9602 = vadd.xlane.f32.xlu0 %v9601_v38 }
0x66d6   :  { %4996 = vrot.lane.b32.xlu0 %v13338_v44, %s12573_s0 }
0x6749   :  { %v9600_v49 = vpop.xlane.xlu0 %9599 }
0x674a   :  { %12511 = vrcp.f32 %v9600_v49 }
0x674d   :  { %v9603_v46 = vpop.xlane.xlu0 %9602 }
0x674e   :  { %12513 = vrcp.f32 %v9603_v46 }
0x6751   :  { %v4997_v6 = vpop.permute.xlu0 %4996 }
0x6752   :  { %4999 = vst.msk [vmem:[#allocation6] sm:$0x3] %vm806_vm11, %v4997_v6 }
0x6754   :  { %v12512_v47 = vpop.eup %12511 }
0x6755   :  { %v9606_v53 = vmul.f32 %v12512_v47, %v12508_v33 }
0x6757   :  { %11595 = vmatmul.mubr.msk.f32.vlgmr.msra.gmra.mrb[124].mxu1 %vm500_vm9, %v9606_v53 }
0x6758   :  { %v12514_v34 = vpop.eup %12513  ;;  %12173 = vmatpush3.bf16.msk.msra.mxu1 %vm12815_vm8, %v12819_v29  ;;  %11601 = vmatprep.mubr.msk.f32.mxu1 %vm12567_vm1, %v12568_v8 }
0x6759   :  { %v9607_v44 = vmul.f32 %v12514_v34, %v12510_v48 }
0x675b   :  { %11602 = vmatmul.mubr.msk.f32.vlgmr.msra.gmra.mrb[126].mxu1 %vm500_vm9, %v9607_v44 }
0x682a   :  { %v9677_v54 = vpop.f32.mrb[124].mxu1 }
0x682b   :  { %v11596_v56 = vpop.f32.mrb[125].mxu1 }
0x682e   :  { %v9750_v14 = vpop.f32.mrb[126].mxu1 }
0x682f   :  { %v9830_v52 = vrot.slane %v9750_v14, 7  ;;  %v11603_v18 = vpop.f32.mrb[127].mxu1 }
0x6831   :  { %v9831_v22 = vsel %vm731_vm10, %v9830_v52, %v9677_v54 }
0x6832   :  { %11624 = vmatmul.mubr.msk.f32.vlgmr.msra.gmra.mrb[66].mxu0 %vm83_vm0, %v9831_v22 }
0x6833   :  { %12529 = shalt.err (!%p12526_p4)
}
0x6834   :  { %s12530_s7 = scalar_lea.hbm %s14118_s18, 64 }
0x6835   :  { %p12531_p5 = scmp.ne.s32.totalorder %s14118_s18, %s12530_s7  ;;  %p12534_p6 = scmp.lt.u32.totalorder %s12530_s7, %s14118_s18 }
0x6837   :  { %p12536_p7 = pnand %p12534_p6, %p12531_p5 }
0x6839   :  { %12539 = shalt.err (!%p12536_p7)
}
0x683a   :  { %s12575_s2 = smov 2   ;;  %s12576_s5 = smov [#allocation4]  }
0x683b   :  { %9939 = dma.vmem_to_hbm [thread:$0]  %s9934_s19, 64, %s14118_s18, [#allocation7], %s12569_s21, %s12569_s21, %s12575_s2  }
0x683c   :  { %s9921_s4 = sshll.u32 %s12576_s5, 4  ;;  %s9922_s4 = int_to_ptr.vmem [resolvable:$true] %s9921_s4 }
0x683d   :  { %s12540_s9 = scalar_lea.vmem %s9922_s4, 64  ;;  %p12545_p9 = scmp.lt.s32.totalorder %s9922_s4, %s9922_s4 }
0x683e   :  { %p12541_p8 = scmp.ne.s32.totalorder %s9922_s4, %s12540_s9  ;;  %p12546_p10 = scmp.lt.s32.totalorder %s12540_s9, %s12540_s9 }
0x6840   :  { %p12547_p11 = por %p12546_p10, %p12545_p9 }
0x6842   :  { %p12548_p12 = pnand %p12547_p11, %p12541_p8 }
0x6905   :  { %v9900_v8 = vpop.f32.mrb[66].mxu0 }
0x6906   :  { %12515 = vtanh.f32 %v9900_v8  ;;  %v11625_v28 = vpop.f32.mrb[67].mxu0 }
0x6910   :  { %v12516_v29 = vpop.eup %12515 }
0x6911   :  { %9905 = vst.msk [vmem:[%s14116_s16 + $0xe] sm:$0x3] %vm806_vm11, %v12516_v29  ;;  %9907 = vst.msk [vmem:[#allocation4 + $0x2] sm:$0x3] %vm806_vm11, %v12516_v29 }
0x6912   :  { %12551 = shalt.err (!%p12548_p12)
}
0x6913   :  { %s12552_s24 = scalar_lea.hbm %s14117_s17, 64 }
0x6914   :  { %p12553_p13 = scmp.ne.s32.totalorder %s14117_s17, %s12552_s24  ;;  %p12556_p0 = scmp.lt.u32.totalorder %s12552_s24, %s14117_s17 }
0x6916   :  { %p12558_p1 = pnand %p12556_p0, %p12553_p13 }
0x6918   :  { %12561 = shalt.err (!%p12558_p1)
}
0x6919   :  { %9927 = dma.vmem_to_hbm [thread:$0]  %s9922_s4, 64, %s14117_s17, [#allocation5], %s12569_s21, %s12569_s21, %s12575_s2  }
0x691a   :  { %12562 = dma.done.wait [#allocation5], 64  }
0x691b   :  { %12563 = vsyncadd [#allocation5], 4294967232 }
0x691c   :  { %12564 = dma.done.wait [#allocation7], 64  }
0x691d   :  { %12565 = vsyncadd [#allocation7], 4294967232 }
0x691e   :  { %9948 = vsyncpa [#allocation5], 1 }
0x691f   :  { %9949 = vsyncpa [#allocation7], 1 }

</bundles_post_ra>
